<compile_context>
chip_gen: v7x
topology: tpu7x:2x2x1
jax: 0.10.0
libtpu: 0.0.40
codegen_flags: <defaults>
</compile_context>

<pallas_src>
import functools

import jax
import jax.numpy as jnp
from jax.experimental import pallas as pl
from jax.experimental.pallas import tpu as pltpu

LRELU_SLOPE = 0.2
BN_EPS = 1e-5


# ----------------------------- Pallas kernel ------------------------------ #
def _conv_kernel(x_ref, w_ref, shift_ref, o_ref, *,
                 tap_offsets, cgrp, m, cout, apply_lrelu):
    """Implicit-GEMM conv over a row-flattened, padded NHWC image.

    x_ref:     (1, L, cgrp) bf16  -- flattened padded image (one batch element)
    w_ref:     (taps*cgrp, cout) bf16, or (1, taps*cgrp) bf16 when cout == 1
    shift_ref: (1, cout) f32      -- folded conv-bias + BatchNorm shift
    o_ref:     (1, m, cout)       -- m = Ho * Wflat (incl. wrap-around cols)
    """
    acc = jnp.zeros((m, cout), jnp.float32)
    for t, off in enumerate(tap_offsets):            # static unroll: 4 or 16 taps
        xw = x_ref[0, pl.ds(off, m), :]              # (m, cgrp) contiguous slice
        if cout == 1:
            # Final classifier (1 output channel): VPU multiply + lane reduce.
            wt = w_ref[:, pl.ds(t * cgrp, cgrp)].astype(jnp.float32)  # (1, cgrp)
            acc = acc + jnp.sum(xw.astype(jnp.float32) * wt,
                                axis=-1, keepdims=True)
        else:
            wt = w_ref[pl.ds(t * cgrp, cgrp), :]     # (cgrp, cout) bf16
            acc = acc + jnp.dot(xw, wt, preferred_element_type=jnp.float32)
    y = acc + shift_ref[...]
    if apply_lrelu:
        y = jnp.where(y >= 0, y, LRELU_SLOPE * y)
    o_ref[0] = y.astype(o_ref.dtype)


def conv2d_pallas(xflat, wmat, shift, *, tap_offsets, cgrp, m, cout,
                  apply_lrelu, out_dtype):
    n, l, cf = xflat.shape
    assert cf == cgrp
    kernel = functools.partial(_conv_kernel, tap_offsets=tap_offsets, cgrp=cgrp,
                               m=m, cout=cout, apply_lrelu=apply_lrelu)
    return pl.pallas_call(
        kernel,
        out_shape=jax.ShapeDtypeStruct((n, m, cout), out_dtype),
        grid=(n,),
        in_specs=[
            # per-image flattened activations (lane axis = channels)
            pl.BlockSpec((1, l, cf), lambda i: (i, 0, 0)),
            # weights & shift: constant index map -> fetched once, resident
            pl.BlockSpec(wmat.shape, lambda i: (0, 0)),
            pl.BlockSpec(shift.shape, lambda i: (0, 0)),
        ],
        out_specs=pl.BlockSpec((1, m, cout), lambda i: (i, 0, 0)),
        compiler_params=pltpu.CompilerParams(
            dimension_semantics=("parallel",),
            vmem_limit_bytes=32 * 1024 * 1024,
        ),
    )(xflat, wmat, shift)


# ------------------------------ JAX glue ----------------------------------- #
def _space_to_depth(xp):
    n, hp, wp, c = xp.shape
    assert hp % 2 == 0 and wp % 2 == 0, "stride-2 path needs even padded dims"
    xs = xp.reshape(n, hp // 2, 2, wp // 2, 2, c)
    xs = jnp.transpose(xs, (0, 1, 3, 2, 4, 5))
    return xs.reshape(n, hp // 2, wp // 2, 4 * c)


def prep_input(x, stride):
    """Pad NHWC input, (optionally) space-to-depth, then row-flatten."""
    n, h, w, c = x.shape
    xp = jnp.pad(x, ((0, 0), (1, 1), (1, 1), (0, 0)))
    if stride == 2:
        xs, kk = _space_to_depth(xp), 2        # 4x4/s2 == 2x2/s1 on s2d input
    else:
        xs, kk = xp, 4
    r, wf, cf = xs.shape[1], xs.shape[2], xs.shape[3]
    # one extra zero row keeps every flattened tap window in bounds
    xs = jnp.pad(xs, ((0, 0), (0, 1), (0, 0), (0, 0)))
    xflat = xs.reshape(n, (r + 1) * wf, cf)
    ho, wo = r - kk + 1, wf - kk + 1
    return xflat, wf, ho, wo, cf, kk


def conv_layer(x, lp, out_dtype):
    n = x.shape[0]
    xflat, wf, ho, wo, cf, kk = prep_input(x, lp["stride"])
    m = ho * wf
    offs = tuple(i * wf + j for i in range(kk) for j in range(kk))
    cout = lp["shift"].shape[1]
    y = conv2d_pallas(xflat, lp["wmat"], lp["shift"], tap_offsets=offs, cgrp=cf,
                      m=m, cout=cout, apply_lrelu=lp["lrelu"], out_dtype=out_dtype)
    # drop the (kk-1) wrap-around columns per output row
    return y.reshape(n, ho, wf, cout)[:, :, :wo, :]


def discriminator_forward(x_nchw, layer_params):
    """Pallas-backed forward pass. x: (N, C, H, W) f32 -> (N, 1, Ho, Wo) f32."""
    x = jnp.transpose(x_nchw, (0, 2, 3, 1)).astype(jnp.bfloat16)   # NCHW -> NHWC
    last = len(layer_params) - 1
    for li, lp in enumerate(layer_params):
        out_dtype = jnp.float32 if li == last else jnp.bfloat16
        x = conv_layer(x, lp, out_dtype)
    return jnp.transpose(x, (0, 3, 1, 2))                          # back to NCHW


# --------------------- parameter construction (deterministic) -------------- #
def build_params(key, in_channels, base_features, n_layers):
    """Mirror NLayerDiscriminator.__init__ layer shapes (k=4, p=1)."""
    layers = []
    # (c_in, c_out, stride, has_bias, has_bn, lrelu)
    layers.append((in_channels, base_features, 2, True, False, True))
    nf_mult = 1
    for n in range(1, n_layers):
        nf_prev, nf_mult = nf_mult, min(2 ** n, 8)
        layers.append((base_features * nf_prev, base_features * nf_mult,
                       2, False, True, True))
    nf_prev, nf_mult = nf_mult, min(2 ** n_layers, 8)
    layers.append((base_features * nf_prev, base_features * nf_mult,
                   1, False, True, True))
    layers.append((base_features * nf_mult, 1, 1, True, False, False))

    params = []
    for (c_in, c_out, stride, has_bias, has_bn, lrelu) in layers:
        key, kw_, kb, kg, kbe, km, kv = jax.random.split(key, 7)
        weight = 0.02 * jax.random.normal(kw_, (c_out, c_in, 4, 4), jnp.float32)
        bias = (0.01 * jax.random.normal(kb, (c_out,), jnp.float32)
                if has_bias else None)
        bn = None
        if has_bn:
            gamma = 1.0 + 0.1 * jax.random.normal(kg, (c_out,), jnp.float32)
            beta = 0.05 * jax.random.normal(kbe, (c_out,), jnp.float32)
            mean = 0.1 * jax.random.normal(km, (c_out,), jnp.float32)
            var = 1.0 + 0.1 * jax.random.uniform(kv, (c_out,), jnp.float32)
            bn = (gamma, beta, mean, var)
        params.append(dict(weight=weight, bias=bias, bn=bn,
                           stride=stride, lrelu=lrelu))
    return params


def fold_scale_shift(p):
    """Fold conv bias + eval-mode BatchNorm into per-channel scale/shift."""
    c_out = p["weight"].shape[0]
    bias = p["bias"] if p["bias"] is not None else jnp.zeros((c_out,), jnp.float32)
    if p["bn"] is not None:
        gamma, beta, mean, var = p["bn"]
        scale = gamma / jnp.sqrt(var + BN_EPS)
        shift = (bias - mean) * scale + beta
    else:
        scale = jnp.ones((c_out,), jnp.float32)
        shift = bias
    return scale, shift


def rearrange_weight(w, stride):
    """(Cout, Cin, 4, 4) OIHW -> (taps*Cgrp, Cout) matching prep_input layout."""
    cout, cin, kh, kw = w.shape
    assert kh == 4 and kw == 4
    if stride == 2:
        w6 = w.reshape(cout, cin, 2, 2, 2, 2)          # (o, c, a, p, b, q)
        wr = jnp.transpose(w6, (2, 4, 3, 5, 1, 0))     # (a, b, p, q, c, o)
        return wr.reshape(4 * 4 * cin, cout)           # tap (a,b) major, Cgrp=4*Cin
    wr = jnp.transpose(w, (2, 3, 1, 0))                # (i, j, c, o)
    return wr.reshape(16 * cin, cout)                  # tap (i,j) major, Cgrp=Cin


def prepare_layer(p):
    """Offline prep: fold BN scale into bf16 weights, pre-shape shift."""
    scale, shift = fold_scale_shift(p)
    wmat = rearrange_weight(p["weight"], p["stride"])
    wmat = (wmat * scale[None, :]).astype(jnp.bfloat16)
    cout = wmat.shape[1]
    if cout == 1:
        wmat = wmat.T                                   # (1, K): VPU-path layout
    return dict(wmat=wmat,
                shift=shift.reshape(1, cout).astype(jnp.float32),
                stride=p["stride"], lrelu=p["lrelu"])


# ------------------------------ references --------------------------------- #
def reference_forward_f32(x, params):
    """Pure-f32 JAX reference (lax conv), mirrors the PyTorch module."""
    for p in params:
        y = jax.lax.conv_general_dilated(
            x, p["weight"], window_strides=(p["stride"],) * 2,
            padding=[(1, 1), (1, 1)],
            dimension_numbers=("NCHW", "OIHW", "NCHW"))
        if p["bias"] is not None:
            y = y + p["bias"][None, :, None, None]
        if p["bn"] is not None:
            gamma, beta, mean, var = p["bn"]
            y = (gamma[None, :, None, None]
                 * (y - mean[None, :, None, None])
                 / jnp.sqrt(var[None, :, None, None] + BN_EPS)
                 + beta[None, :, None, None])
        if p["lrelu"]:
            y = jnp.where(y >= 0, y, LRELU_SLOPE * y)
        x = y
    return x


def reference_forward_bf16(x, params):
    """lax-conv reference with the kernel's numerics (bf16 storage, f32 accum)."""
    h = x.astype(jnp.bfloat16)
    last = len(params) - 1
    for li, p in enumerate(params):
        scale, shift = fold_scale_shift(p)
        w = (p["weight"] * scale[:, None, None, None]).astype(jnp.bfloat16)
        y = jax.lax.conv_general_dilated(
            h, w, window_strides=(p["stride"],) * 2, padding=[(1, 1), (1, 1)],
            dimension_numbers=("NCHW", "OIHW", "NCHW"),
            preferred_element_type=jnp.float32)
        y = y + shift[None, :, None, None]
        if p["lrelu"]:
            y = jnp.where(y >= 0, y, LRELU_SLOPE * y)
        h = y if li == last else y.astype(jnp.bfloat16)
    return h


# ---------------------------------- main ----------------------------------- #
if __name__ == "__main__":
    # NLayerDiscriminator(in_channels=4, base_features=16, n_layers=3,
    #                     norm_layer=BatchNorm2d, final_classifier=True).
    key = jax.random.PRNGKey(0)
    key, kx = jax.random.split(key)
    x = jax.random.normal(kx, (2, 4, 32, 32), jnp.float32)   # NCHW (PyTorch layout)

    raw_params = build_params(key, in_channels=4, base_features=16, n_layers=3)
    layer_params = [prepare_layer(p) for p in raw_params]

    fwd = jax.jit(lambda inp: discriminator_forward(inp, layer_params))
    out = jax.block_until_ready(fwd(x))

    ref_b = jax.block_until_ready(reference_forward_bf16(x, raw_params))
    ref_f = jax.block_until_ready(reference_forward_f32(x, raw_params))

    assert out.shape == ref_f.shape == (2, 1, 2, 2), out.shape

    # Primary check: reference with matched numerics (bf16 storage, f32 accum)
    # validates the implicit-GEMM / space-to-depth / flatten-and-trim logic.
    err_b = float(jnp.max(jnp.abs(out - ref_b)))
    mag_b = float(jnp.max(jnp.abs(ref_b)))
    assert err_b <= 2e-2 * mag_b + 1e-6, (err_b, mag_b)

    # Sanity check against the pure-f32 reference (loose: bf16 rounding).
    err_f = float(jnp.max(jnp.abs(out - ref_f)))
    mag_f = float(jnp.max(jnp.abs(ref_f)))
    assert err_f <= 1.5e-1 * mag_f + 1e-5, (err_f, mag_f)

    print("KERNEL_OK")
</pallas_src>

<mosaic_0001>
module attributes {stable_mosaic.version = 11 : i64} {
  func.func @_conv_kernel(%arg0: i32, %arg1: memref<1x306x16xbf16, #tpu.memory_space<vmem>>, %arg2: memref<64x16xbf16, #tpu.memory_space<vmem>>, %arg3: memref<1x16xf32, #tpu.memory_space<vmem>>, %arg4: memref<1x272x16xbf16, #tpu.memory_space<vmem>>) attributes {dimension_semantics = [#tpu.dimension_semantics<parallel>], iteration_bounds = array<i64: 2>, scalar_prefetch = 0 : i64, scratch_operands = 0 : i64, tpu.core_type = #tpu.core_type<tc>, window_params = [{transform_indices = @transform_0, window_bounds = array<i64: 1, 306, 16>}, {pipeline_mode = #tpu.pipeline_mode<synchronous>, transform_indices = @transform_1, window_bounds = array<i64: 64, 16>}, {pipeline_mode = #tpu.pipeline_mode<synchronous>, transform_indices = @transform_2, window_bounds = array<i64: 1, 16>}, {transform_indices = @transform_3, window_bounds = array<i64: 1, 272, 16>}]} {
    %cst = arith.constant 0.000000e+00 : f32
    %0 = vector.broadcast %cst : f32 to vector<272x16xf32>
    %c0 = arith.constant 0 : index
    %c0_0 = arith.constant 0 : index
    %c0_1 = arith.constant 0 : index
    %1 = vector.load %arg1[%c0, %c0_0, %c0_1] : memref<1x306x16xbf16, #tpu.memory_space<vmem>>, vector<1x272x16xbf16>
    %2 = vector.shape_cast %1 : vector<1x272x16xbf16> to vector<272x16xbf16>
    %c0_2 = arith.constant 0 : index
    %c0_3 = arith.constant 0 : index
    %3 = vector.load %arg2[%c0_2, %c0_3] : memref<64x16xbf16, #tpu.memory_space<vmem>>, vector<16x16xbf16>
    %cst_4 = arith.constant dense<0.000000e+00> : vector<272x16xf32>
    %4 = tpu.matmul %2, %3, %cst_4 {dimension_numbers = #tpu.dot_dimension_numbers<[1], [0], [0], [1], [0, 0, 1, 1], [], []>} : vector<272x16xbf16>, vector<16x16xbf16>, vector<272x16xf32> -> vector<272x16xf32>
    %5 = arith.addf %0, %4 : vector<272x16xf32>
    %c0_5 = arith.constant 0 : index
    %c1 = arith.constant 1 : index
    %c0_6 = arith.constant 0 : index
    %6 = vector.load %arg1[%c0_5, %c1, %c0_6] : memref<1x306x16xbf16, #tpu.memory_space<vmem>>, vector<1x272x16xbf16>
    %7 = vector.shape_cast %6 : vector<1x272x16xbf16> to vector<272x16xbf16>
    %c16 = arith.constant 16 : index
    %c0_7 = arith.constant 0 : index
    %8 = vector.load %arg2[%c16, %c0_7] : memref<64x16xbf16, #tpu.memory_space<vmem>>, vector<16x16xbf16>
    %cst_8 = arith.constant dense<0.000000e+00> : vector<272x16xf32>
    %9 = tpu.matmul %7, %8, %cst_8 {dimension_numbers = #tpu.dot_dimension_numbers<[1], [0], [0], [1], [0, 0, 1, 1], [], []>} : vector<272x16xbf16>, vector<16x16xbf16>, vector<272x16xf32> -> vector<272x16xf32>
    %10 = arith.addf %5, %9 : vector<272x16xf32>
    %c0_9 = arith.constant 0 : index
    %c17 = arith.constant 17 : index
    %c0_10 = arith.constant 0 : index
    %11 = vector.load %arg1[%c0_9, %c17, %c0_10] : memref<1x306x16xbf16, #tpu.memory_space<vmem>>, vector<1x272x16xbf16>
    %12 = vector.shape_cast %11 : vector<1x272x16xbf16> to vector<272x16xbf16>
    %c32 = arith.constant 32 : index
    %c0_11 = arith.constant 0 : index
    %13 = vector.load %arg2[%c32, %c0_11] : memref<64x16xbf16, #tpu.memory_space<vmem>>, vector<16x16xbf16>
    %cst_12 = arith.constant dense<0.000000e+00> : vector<272x16xf32>
    %14 = tpu.matmul %12, %13, %cst_12 {dimension_numbers = #tpu.dot_dimension_numbers<[1], [0], [0], [1], [0, 0, 1, 1], [], []>} : vector<272x16xbf16>, vector<16x16xbf16>, vector<272x16xf32> -> vector<272x16xf32>
    %15 = arith.addf %10, %14 : vector<272x16xf32>
    %c0_13 = arith.constant 0 : index
    %c18 = arith.constant 18 : index
    %c0_14 = arith.constant 0 : index
    %16 = vector.load %arg1[%c0_13, %c18, %c0_14] : memref<1x306x16xbf16, #tpu.memory_space<vmem>>, vector<1x272x16xbf16>
    %17 = vector.shape_cast %16 : vector<1x272x16xbf16> to vector<272x16xbf16>
    %c48 = arith.constant 48 : index
    %c0_15 = arith.constant 0 : index
    %18 = vector.load %arg2[%c48, %c0_15] : memref<64x16xbf16, #tpu.memory_space<vmem>>, vector<16x16xbf16>
    %cst_16 = arith.constant dense<0.000000e+00> : vector<272x16xf32>
    %19 = tpu.matmul %17, %18, %cst_16 {dimension_numbers = #tpu.dot_dimension_numbers<[1], [0], [0], [1], [0, 0, 1, 1], [], []>} : vector<272x16xbf16>, vector<16x16xbf16>, vector<272x16xf32> -> vector<272x16xf32>
    %20 = arith.addf %15, %19 : vector<272x16xf32>
    %c0_17 = arith.constant 0 : index
    %c0_18 = arith.constant 0 : index
    %21 = vector.load %arg3[%c0_17, %c0_18] : memref<1x16xf32, #tpu.memory_space<vmem>>, vector<1x16xf32>
    %22 = vector.broadcast %21 : vector<1x16xf32> to vector<272x16xf32>
    %23 = arith.addf %20, %22 : vector<272x16xf32>
    %cst_19 = arith.constant 0.000000e+00 : f32
    %24 = vector.broadcast %cst_19 : f32 to vector<272x16xf32>
    %25 = arith.cmpf oge, %23, %24 : vector<272x16xf32>
    %cst_20 = arith.constant 2.000000e-01 : f32
    %26 = vector.broadcast %cst_20 : f32 to vector<272x16xf32>
    %27 = arith.mulf %26, %23 : vector<272x16xf32>
    %28 = arith.select %25, %23, %27 : vector<272x16xi1>, vector<272x16xf32>
    %29 = arith.truncf %28 : vector<272x16xf32> to vector<272x16xbf16>
    %c0_21 = arith.constant 0 : index
    %c0_22 = arith.constant 0 : index
    %c0_23 = arith.constant 0 : index
    %30 = vector.load %arg4[%c0_21, %c0_22, %c0_23] : memref<1x272x16xbf16, #tpu.memory_space<vmem>>, vector<1x272x16xbf16>
    %31 = vector.shape_cast %30 : vector<1x272x16xbf16> to vector<272x16xbf16>
    %32 = vector.shape_cast %29 : vector<272x16xbf16> to vector<1x272x16xbf16>
    tpu.vector_store %arg4[%c0_21, %c0_22, %c0_23], %32 {strides = array<i32>} : memref<1x272x16xbf16, #tpu.memory_space<vmem>>, vector<1x272x16xbf16>,
    return
  }
  func.func @transform_0(%arg0: i32) -> (i32, i32, i32) {
    %c0_i32 = arith.constant 0 : i32
    %c0_i32_0 = arith.constant 0 : i32
    %c0_i32_1 = arith.constant 0 : i32
    return %arg0, %c0_i32, %c0_i32_0 : i32, i32, i32
  }
  func.func @transform_1(%arg0: i32) -> (i32, i32) {
    %c0_i32 = arith.constant 0 : i32
    %c0_i32_0 = arith.constant 0 : i32
    %c0_i32_1 = arith.constant 0 : i32
    return %c0_i32, %c0_i32_0 : i32, i32
  }
  func.func @transform_2(%arg0: i32) -> (i32, i32) {
    %c0_i32 = arith.constant 0 : i32
    %c0_i32_0 = arith.constant 0 : i32
    %c0_i32_1 = arith.constant 0 : i32
    return %c0_i32, %c0_i32_0 : i32, i32
  }
  func.func @transform_3(%arg0: i32) -> (i32, i32, i32) {
    %c0_i32 = arith.constant 0 : i32
    %c0_i32_0 = arith.constant 0 : i32
    %c0_i32_1 = arith.constant 0 : i32
    return %arg0, %c0_i32, %c0_i32_0 : i32, i32, i32
  }
}

module attributes {stable_mosaic.version = 11 : i64} {
  func.func @_conv_kernel(%arg0: i32, %arg1: memref<1x90x64xbf16, #tpu.memory_space<vmem>>, %arg2: memref<256x32xbf16, #tpu.memory_space<vmem>>, %arg3: memref<1x32xf32, #tpu.memory_space<vmem>>, %arg4: memref<1x72x32xbf16, #tpu.memory_space<vmem>>) attributes {dimension_semantics = [#tpu.dimension_semantics<parallel>], iteration_bounds = array<i64: 2>, scalar_prefetch = 0 : i64, scratch_operands = 0 : i64, tpu.core_type = #tpu.core_type<tc>, window_params = [{transform_indices = @transform_0, window_bounds = array<i64: 1, 90, 64>}, {pipeline_mode = #tpu.pipeline_mode<synchronous>, transform_indices = @transform_1, window_bounds = array<i64: 256, 32>}, {pipeline_mode = #tpu.pipeline_mode<synchronous>, transform_indices = @transform_2, window_bounds = array<i64: 1, 32>}, {transform_indices = @transform_3, window_bounds = array<i64: 1, 72, 32>}]} {
    %cst = arith.constant 0.000000e+00 : f32
    %0 = vector.broadcast %cst : f32 to vector<72x32xf32>
    %c0 = arith.constant 0 : index
    %c0_0 = arith.constant 0 : index
    %c0_1 = arith.constant 0 : index
    %1 = vector.load %arg1[%c0, %c0_0, %c0_1] : memref<1x90x64xbf16, #tpu.memory_space<vmem>>, vector<1x72x64xbf16>
    %2 = vector.shape_cast %1 : vector<1x72x64xbf16> to vector<72x64xbf16>
    %c0_2 = arith.constant 0 : index
    %c0_3 = arith.constant 0 : index
    %3 = vector.load %arg2[%c0_2, %c0_3] : memref<256x32xbf16, #tpu.memory_space<vmem>>, vector<64x32xbf16>
    %cst_4 = arith.constant dense<0.000000e+00> : vector<72x32xf32>
    %4 = tpu.matmul %2, %3, %cst_4 {dimension_numbers = #tpu.dot_dimension_numbers<[1], [0], [0], [1], [0, 0, 1, 1], [], []>} : vector<72x64xbf16>, vector<64x32xbf16>, vector<72x32xf32> -> vector<72x32xf32>
    %5 = arith.addf %0, %4 : vector<72x32xf32>
    %c0_5 = arith.constant 0 : index
    %c1 = arith.constant 1 : index
    %c0_6 = arith.constant 0 : index
    %6 = vector.load %arg1[%c0_5, %c1, %c0_6] : memref<1x90x64xbf16, #tpu.memory_space<vmem>>, vector<1x72x64xbf16>
    %7 = vector.shape_cast %6 : vector<1x72x64xbf16> to vector<72x64xbf16>
    %c64 = arith.constant 64 : index
    %c0_7 = arith.constant 0 : index
    %8 = vector.load %arg2[%c64, %c0_7] : memref<256x32xbf16, #tpu.memory_space<vmem>>, vector<64x32xbf16>
    %cst_8 = arith.constant dense<0.000000e+00> : vector<72x32xf32>
    %9 = tpu.matmul %7, %8, %cst_8 {dimension_numbers = #tpu.dot_dimension_numbers<[1], [0], [0], [1], [0, 0, 1, 1], [], []>} : vector<72x64xbf16>, vector<64x32xbf16>, vector<72x32xf32> -> vector<72x32xf32>
    %10 = arith.addf %5, %9 : vector<72x32xf32>
    %c0_9 = arith.constant 0 : index
    %c9 = arith.constant 9 : index
    %c0_10 = arith.constant 0 : index
    %11 = vector.load %arg1[%c0_9, %c9, %c0_10] : memref<1x90x64xbf16, #tpu.memory_space<vmem>>, vector<1x72x64xbf16>
    %12 = vector.shape_cast %11 : vector<1x72x64xbf16> to vector<72x64xbf16>
    %c128 = arith.constant 128 : index
    %c0_11 = arith.constant 0 : index
    %13 = vector.load %arg2[%c128, %c0_11] : memref<256x32xbf16, #tpu.memory_space<vmem>>, vector<64x32xbf16>
    %cst_12 = arith.constant dense<0.000000e+00> : vector<72x32xf32>
    %14 = tpu.matmul %12, %13, %cst_12 {dimension_numbers = #tpu.dot_dimension_numbers<[1], [0], [0], [1], [0, 0, 1, 1], [], []>} : vector<72x64xbf16>, vector<64x32xbf16>, vector<72x32xf32> -> vector<72x32xf32>
    %15 = arith.addf %10, %14 : vector<72x32xf32>
    %c0_13 = arith.constant 0 : index
    %c10 = arith.constant 10 : index
    %c0_14 = arith.constant 0 : index
    %16 = vector.load %arg1[%c0_13, %c10, %c0_14] : memref<1x90x64xbf16, #tpu.memory_space<vmem>>, vector<1x72x64xbf16>
    %17 = vector.shape_cast %16 : vector<1x72x64xbf16> to vector<72x64xbf16>
    %c192 = arith.constant 192 : index
    %c0_15 = arith.constant 0 : index
    %18 = vector.load %arg2[%c192, %c0_15] : memref<256x32xbf16, #tpu.memory_space<vmem>>, vector<64x32xbf16>
    %cst_16 = arith.constant dense<0.000000e+00> : vector<72x32xf32>
    %19 = tpu.matmul %17, %18, %cst_16 {dimension_numbers = #tpu.dot_dimension_numbers<[1], [0], [0], [1], [0, 0, 1, 1], [], []>} : vector<72x64xbf16>, vector<64x32xbf16>, vector<72x32xf32> -> vector<72x32xf32>
    %20 = arith.addf %15, %19 : vector<72x32xf32>
    %c0_17 = arith.constant 0 : index
    %c0_18 = arith.constant 0 : index
    %21 = vector.load %arg3[%c0_17, %c0_18] : memref<1x32xf32, #tpu.memory_space<vmem>>, vector<1x32xf32>
    %22 = vector.broadcast %21 : vector<1x32xf32> to vector<72x32xf32>
    %23 = arith.addf %20, %22 : vector<72x32xf32>
    %cst_19 = arith.constant 0.000000e+00 : f32
    %24 = vector.broadcast %cst_19 : f32 to vector<72x32xf32>
    %25 = arith.cmpf oge, %23, %24 : vector<72x32xf32>
    %cst_20 = arith.constant 2.000000e-01 : f32
    %26 = vector.broadcast %cst_20 : f32 to vector<72x32xf32>
    %27 = arith.mulf %26, %23 : vector<72x32xf32>
    %28 = arith.select %25, %23, %27 : vector<72x32xi1>, vector<72x32xf32>
    %29 = arith.truncf %28 : vector<72x32xf32> to vector<72x32xbf16>
    %c0_21 = arith.constant 0 : index
    %c0_22 = arith.constant 0 : index
    %c0_23 = arith.constant 0 : index
    %30 = vector.load %arg4[%c0_21, %c0_22, %c0_23] : memref<1x72x32xbf16, #tpu.memory_space<vmem>>, vector<1x72x32xbf16>
    %31 = vector.shape_cast %30 : vector<1x72x32xbf16> to vector<72x32xbf16>
    %32 = vector.shape_cast %29 : vector<72x32xbf16> to vector<1x72x32xbf16>
    tpu.vector_store %arg4[%c0_21, %c0_22, %c0_23], %32 {strides = array<i32>} : memref<1x72x32xbf16, #tpu.memory_space<vmem>>, vector<1x72x32xbf16>,
    return
  }
  func.func @transform_0(%arg0: i32) -> (i32, i32, i32) {
    %c0_i32 = arith.constant 0 : i32
    %c0_i32_0 = arith.constant 0 : i32
    %c0_i32_1 = arith.constant 0 : i32
    return %arg0, %c0_i32, %c0_i32_0 : i32, i32, i32
  }
  func.func @transform_1(%arg0: i32) -> (i32, i32) {
    %c0_i32 = arith.constant 0 : i32
    %c0_i32_0 = arith.constant 0 : i32
    %c0_i32_1 = arith.constant 0 : i32
    return %c0_i32, %c0_i32_0 : i32, i32
  }
  func.func @transform_2(%arg0: i32) -> (i32, i32) {
    %c0_i32 = arith.constant 0 : i32
    %c0_i32_0 = arith.constant 0 : i32
    %c0_i32_1 = arith.constant 0 : i32
    return %c0_i32, %c0_i32_0 : i32, i32
  }
  func.func @transform_3(%arg0: i32) -> (i32, i32, i32) {
    %c0_i32 = arith.constant 0 : i32
    %c0_i32_0 = arith.constant 0 : i32
    %c0_i32_1 = arith.constant 0 : i32
    return %arg0, %c0_i32, %c0_i32_0 : i32, i32, i32
  }
}

module attributes {stable_mosaic.version = 11 : i64} {
  func.func @_conv_kernel(%arg0: i32, %arg1: memref<1x30x128xbf16, #tpu.memory_space<vmem>>, %arg2: memref<512x64xbf16, #tpu.memory_space<vmem>>, %arg3: memref<1x64xf32, #tpu.memory_space<vmem>>, %arg4: memref<1x20x64xbf16, #tpu.memory_space<vmem>>) attributes {dimension_semantics = [#tpu.dimension_semantics<parallel>], iteration_bounds = array<i64: 2>, scalar_prefetch = 0 : i64, scratch_operands = 0 : i64, tpu.core_type = #tpu.core_type<tc>, window_params = [{transform_indices = @transform_0, window_bounds = array<i64: 1, 30, 128>}, {pipeline_mode = #tpu.pipeline_mode<synchronous>, transform_indices = @transform_1, window_bounds = array<i64: 512, 64>}, {pipeline_mode = #tpu.pipeline_mode<synchronous>, transform_indices = @transform_2, window_bounds = array<i64: 1, 64>}, {transform_indices = @transform_3, window_bounds = array<i64: 1, 20, 64>}]} {
    %cst = arith.constant 0.000000e+00 : f32
    %0 = vector.broadcast %cst : f32 to vector<20x64xf32>
    %c0 = arith.constant 0 : index
    %c0_0 = arith.constant 0 : index
    %c0_1 = arith.constant 0 : index
    %1 = vector.load %arg1[%c0, %c0_0, %c0_1] : memref<1x30x128xbf16, #tpu.memory_space<vmem>>, vector<1x20x128xbf16>
    %2 = vector.shape_cast %1 : vector<1x20x128xbf16> to vector<20x128xbf16>
    %c0_2 = arith.constant 0 : index
    %c0_3 = arith.constant 0 : index
    %3 = vector.load %arg2[%c0_2, %c0_3] : memref<512x64xbf16, #tpu.memory_space<vmem>>, vector<128x64xbf16>
    %cst_4 = arith.constant dense<0.000000e+00> : vector<20x64xf32>
    %4 = tpu.matmul %2, %3, %cst_4 {dimension_numbers = #tpu.dot_dimension_numbers<[1], [0], [0], [1], [0, 0, 1, 1], [], []>} : vector<20x128xbf16>, vector<128x64xbf16>, vector<20x64xf32> -> vector<20x64xf32>
    %5 = arith.addf %0, %4 : vector<20x64xf32>
    %c0_5 = arith.constant 0 : index
    %c1 = arith.constant 1 : index
    %c0_6 = arith.constant 0 : index
    %6 = vector.load %arg1[%c0_5, %c1, %c0_6] : memref<1x30x128xbf16, #tpu.memory_space<vmem>>, vector<1x20x128xbf16>
    %7 = vector.shape_cast %6 : vector<1x20x128xbf16> to vector<20x128xbf16>
    %c128 = arith.constant 128 : index
    %c0_7 = arith.constant 0 : index
    %8 = vector.load %arg2[%c128, %c0_7] : memref<512x64xbf16, #tpu.memory_space<vmem>>, vector<128x64xbf16>
    %cst_8 = arith.constant dense<0.000000e+00> : vector<20x64xf32>
    %9 = tpu.matmul %7, %8, %cst_8 {dimension_numbers = #tpu.dot_dimension_numbers<[1], [0], [0], [1], [0, 0, 1, 1], [], []>} : vector<20x128xbf16>, vector<128x64xbf16>, vector<20x64xf32> -> vector<20x64xf32>
    %10 = arith.addf %5, %9 : vector<20x64xf32>
    %c0_9 = arith.constant 0 : index
    %c5 = arith.constant 5 : index
    %c0_10 = arith.constant 0 : index
    %11 = vector.load %arg1[%c0_9, %c5, %c0_10] : memref<1x30x128xbf16, #tpu.memory_space<vmem>>, vector<1x20x128xbf16>
    %12 = vector.shape_cast %11 : vector<1x20x128xbf16> to vector<20x128xbf16>
    %c256 = arith.constant 256 : index
    %c0_11 = arith.constant 0 : index
    %13 = vector.load %arg2[%c256, %c0_11] : memref<512x64xbf16, #tpu.memory_space<vmem>>, vector<128x64xbf16>
    %cst_12 = arith.constant dense<0.000000e+00> : vector<20x64xf32>
    %14 = tpu.matmul %12, %13, %cst_12 {dimension_numbers = #tpu.dot_dimension_numbers<[1], [0], [0], [1], [0, 0, 1, 1], [], []>} : vector<20x128xbf16>, vector<128x64xbf16>, vector<20x64xf32> -> vector<20x64xf32>
    %15 = arith.addf %10, %14 : vector<20x64xf32>
    %c0_13 = arith.constant 0 : index
    %c6 = arith.constant 6 : index
    %c0_14 = arith.constant 0 : index
    %16 = vector.load %arg1[%c0_13, %c6, %c0_14] : memref<1x30x128xbf16, #tpu.memory_space<vmem>>, vector<1x20x128xbf16>
    %17 = vector.shape_cast %16 : vector<1x20x128xbf16> to vector<20x128xbf16>
    %c384 = arith.constant 384 : index
    %c0_15 = arith.constant 0 : index
    %18 = vector.load %arg2[%c384, %c0_15] : memref<512x64xbf16, #tpu.memory_space<vmem>>, vector<128x64xbf16>
    %cst_16 = arith.constant dense<0.000000e+00> : vector<20x64xf32>
    %19 = tpu.matmul %17, %18, %cst_16 {dimension_numbers = #tpu.dot_dimension_numbers<[1], [0], [0], [1], [0, 0, 1, 1], [], []>} : vector<20x128xbf16>, vector<128x64xbf16>, vector<20x64xf32> -> vector<20x64xf32>
    %20 = arith.addf %15, %19 : vector<20x64xf32>
    %c0_17 = arith.constant 0 : index
    %c0_18 = arith.constant 0 : index
    %21 = vector.load %arg3[%c0_17, %c0_18] : memref<1x64xf32, #tpu.memory_space<vmem>>, vector<1x64xf32>
    %22 = vector.broadcast %21 : vector<1x64xf32> to vector<20x64xf32>
    %23 = arith.addf %20, %22 : vector<20x64xf32>
    %cst_19 = arith.constant 0.000000e+00 : f32
    %24 = vector.broadcast %cst_19 : f32 to vector<20x64xf32>
    %25 = arith.cmpf oge, %23, %24 : vector<20x64xf32>
    %cst_20 = arith.constant 2.000000e-01 : f32
    %26 = vector.broadcast %cst_20 : f32 to vector<20x64xf32>
    %27 = arith.mulf %26, %23 : vector<20x64xf32>
    %28 = arith.select %25, %23, %27 : vector<20x64xi1>, vector<20x64xf32>
    %29 = arith.truncf %28 : vector<20x64xf32> to vector<20x64xbf16>
    %c0_21 = arith.constant 0 : index
    %c0_22 = arith.constant 0 : index
    %c0_23 = arith.constant 0 : index
    %30 = vector.load %arg4[%c0_21, %c0_22, %c0_23] : memref<1x20x64xbf16, #tpu.memory_space<vmem>>, vector<1x20x64xbf16>
    %31 = vector.shape_cast %30 : vector<1x20x64xbf16> to vector<20x64xbf16>
    %32 = vector.shape_cast %29 : vector<20x64xbf16> to vector<1x20x64xbf16>
    tpu.vector_store %arg4[%c0_21, %c0_22, %c0_23], %32 {strides = array<i32>} : memref<1x20x64xbf16, #tpu.memory_space<vmem>>, vector<1x20x64xbf16>,
    return
  }
  func.func @transform_0(%arg0: i32) -> (i32, i32, i32) {
    %c0_i32 = arith.constant 0 : i32
    %c0_i32_0 = arith.constant 0 : i32
    %c0_i32_1 = arith.constant 0 : i32
    return %arg0, %c0_i32, %c0_i32_0 : i32, i32, i32
  }
  func.func @transform_1(%arg0: i32) -> (i32, i32) {
    %c0_i32 = arith.constant 0 : i32
    %c0_i32_0 = arith.constant 0 : i32
    %c0_i32_1 = arith.constant 0 : i32
    return %c0_i32, %c0_i32_0 : i32, i32
  }
  func.func @transform_2(%arg0: i32) -> (i32, i32) {
    %c0_i32 = arith.constant 0 : i32
    %c0_i32_0 = arith.constant 0 : i32
    %c0_i32_1 = arith.constant 0 : i32
    return %c0_i32, %c0_i32_0 : i32, i32
  }
  func.func @transform_3(%arg0: i32) -> (i32, i32, i32) {
    %c0_i32 = arith.constant 0 : i32
    %c0_i32_0 = arith.constant 0 : i32
    %c0_i32_1 = arith.constant 0 : i32
    return %arg0, %c0_i32, %c0_i32_0 : i32, i32, i32
  }
}

module attributes {stable_mosaic.version = 11 : i64} {
  func.func @_conv_kernel(%arg0: i32, %arg1: memref<1x42x64xbf16, #tpu.memory_space<vmem>>, %arg2: memref<1024x128xbf16, #tpu.memory_space<vmem>>, %arg3: memref<1x128xf32, #tpu.memory_space<vmem>>, %arg4: memref<1x18x128xbf16, #tpu.memory_space<vmem>>) attributes {dimension_semantics = [#tpu.dimension_semantics<parallel>], iteration_bounds = array<i64: 2>, scalar_prefetch = 0 : i64, scratch_operands = 0 : i64, tpu.core_type = #tpu.core_type<tc>, window_params = [{transform_indices = @transform_0, window_bounds = array<i64: 1, 42, 64>}, {pipeline_mode = #tpu.pipeline_mode<synchronous>, transform_indices = @transform_1, window_bounds = array<i64: 1024, 128>}, {pipeline_mode = #tpu.pipeline_mode<synchronous>, transform_indices = @transform_2, window_bounds = array<i64: 1, 128>}, {transform_indices = @transform_3, window_bounds = array<i64: 1, 18, 128>}]} {
    %cst = arith.constant 0.000000e+00 : f32
    %0 = vector.broadcast %cst : f32 to vector<18x128xf32>
    %c0 = arith.constant 0 : index
    %c0_0 = arith.constant 0 : index
    %c0_1 = arith.constant 0 : index
    %1 = vector.load %arg1[%c0, %c0_0, %c0_1] : memref<1x42x64xbf16, #tpu.memory_space<vmem>>, vector<1x18x64xbf16>
    %2 = vector.shape_cast %1 : vector<1x18x64xbf16> to vector<18x64xbf16>
    %c0_2 = arith.constant 0 : index
    %c0_3 = arith.constant 0 : index
    %3 = vector.load %arg2[%c0_2, %c0_3] : memref<1024x128xbf16, #tpu.memory_space<vmem>>, vector<64x128xbf16>
    %cst_4 = arith.constant dense<0.000000e+00> : vector<18x128xf32>
    %4 = tpu.matmul %2, %3, %cst_4 {dimension_numbers = #tpu.dot_dimension_numbers<[1], [0], [0], [1], [0, 0, 1, 1], [], []>} : vector<18x64xbf16>, vector<64x128xbf16>, vector<18x128xf32> -> vector<18x128xf32>
    %5 = arith.addf %0, %4 : vector<18x128xf32>
    %c0_5 = arith.constant 0 : index
    %c1 = arith.constant 1 : index
    %c0_6 = arith.constant 0 : index
    %6 = vector.load %arg1[%c0_5, %c1, %c0_6] : memref<1x42x64xbf16, #tpu.memory_space<vmem>>, vector<1x18x64xbf16>
    %7 = vector.shape_cast %6 : vector<1x18x64xbf16> to vector<18x64xbf16>
    %c64 = arith.constant 64 : index
    %c0_7 = arith.constant 0 : index
    %8 = vector.load %arg2[%c64, %c0_7] : memref<1024x128xbf16, #tpu.memory_space<vmem>>, vector<64x128xbf16>
    %cst_8 = arith.constant dense<0.000000e+00> : vector<18x128xf32>
    %9 = tpu.matmul %7, %8, %cst_8 {dimension_numbers = #tpu.dot_dimension_numbers<[1], [0], [0], [1], [0, 0, 1, 1], [], []>} : vector<18x64xbf16>, vector<64x128xbf16>, vector<18x128xf32> -> vector<18x128xf32>
    %10 = arith.addf %5, %9 : vector<18x128xf32>
    %c0_9 = arith.constant 0 : index
    %c2 = arith.constant 2 : index
    %c0_10 = arith.constant 0 : index
    %11 = vector.load %arg1[%c0_9, %c2, %c0_10] : memref<1x42x64xbf16, #tpu.memory_space<vmem>>, vector<1x18x64xbf16>
    %12 = vector.shape_cast %11 : vector<1x18x64xbf16> to vector<18x64xbf16>
    %c128 = arith.constant 128 : index
    %c0_11 = arith.constant 0 : index
    %13 = vector.load %arg2[%c128, %c0_11] : memref<1024x128xbf16, #tpu.memory_space<vmem>>, vector<64x128xbf16>
    %cst_12 = arith.constant dense<0.000000e+00> : vector<18x128xf32>
    %14 = tpu.matmul %12, %13, %cst_12 {dimension_numbers = #tpu.dot_dimension_numbers<[1], [0], [0], [1], [0, 0, 1, 1], [], []>} : vector<18x64xbf16>, vector<64x128xbf16>, vector<18x128xf32> -> vector<18x128xf32>
    %15 = arith.addf %10, %14 : vector<18x128xf32>
    %c0_13 = arith.constant 0 : index
    %c3 = arith.constant 3 : index
    %c0_14 = arith.constant 0 : index
    %16 = vector.load %arg1[%c0_13, %c3, %c0_14] : memref<1x42x64xbf16, #tpu.memory_space<vmem>>, vector<1x18x64xbf16>
    %17 = vector.shape_cast %16 : vector<1x18x64xbf16> to vector<18x64xbf16>
    %c192 = arith.constant 192 : index
    %c0_15 = arith.constant 0 : index
    %18 = vector.load %arg2[%c192, %c0_15] : memref<1024x128xbf16, #tpu.memory_space<vmem>>, vector<64x128xbf16>
    %cst_16 = arith.constant dense<0.000000e+00> : vector<18x128xf32>
    %19 = tpu.matmul %17, %18, %cst_16 {dimension_numbers = #tpu.dot_dimension_numbers<[1], [0], [0], [1], [0, 0, 1, 1], [], []>} : vector<18x64xbf16>, vector<64x128xbf16>, vector<18x128xf32> -> vector<18x128xf32>
    %20 = arith.addf %15, %19 : vector<18x128xf32>
    %c0_17 = arith.constant 0 : index
    %c6 = arith.constant 6 : index
    %c0_18 = arith.constant 0 : index
    %21 = vector.load %arg1[%c0_17, %c6, %c0_18] : memref<1x42x64xbf16, #tpu.memory_space<vmem>>, vector<1x18x64xbf16>
    %22 = vector.shape_cast %21 : vector<1x18x64xbf16> to vector<18x64xbf16>
    %c256 = arith.constant 256 : index
    %c0_19 = arith.constant 0 : index
    %23 = vector.load %arg2[%c256, %c0_19] : memref<1024x128xbf16, #tpu.memory_space<vmem>>, vector<64x128xbf16>
    %cst_20 = arith.constant dense<0.000000e+00> : vector<18x128xf32>
    %24 = tpu.matmul %22, %23, %cst_20 {dimension_numbers = #tpu.dot_dimension_numbers<[1], [0], [0], [1], [0, 0, 1, 1], [], []>} : vector<18x64xbf16>, vector<64x128xbf16>, vector<18x128xf32> -> vector<18x128xf32>
    %25 = arith.addf %20, %24 : vector<18x128xf32>
    %c0_21 = arith.constant 0 : index
    %c7 = arith.constant 7 : index
    %c0_22 = arith.constant 0 : index
    %26 = vector.load %arg1[%c0_21, %c7, %c0_22] : memref<1x42x64xbf16, #tpu.memory_space<vmem>>, vector<1x18x64xbf16>
    %27 = vector.shape_cast %26 : vector<1x18x64xbf16> to vector<18x64xbf16>
    %c320 = arith.constant 320 : index
    %c0_23 = arith.constant 0 : index
    %28 = vector.load %arg2[%c320, %c0_23] : memref<1024x128xbf16, #tpu.memory_space<vmem>>, vector<64x128xbf16>
    %cst_24 = arith.constant dense<0.000000e+00> : vector<18x128xf32>
    %29 = tpu.matmul %27, %28, %cst_24 {dimension_numbers = #tpu.dot_dimension_numbers<[1], [0], [0], [1], [0, 0, 1, 1], [], []>} : vector<18x64xbf16>, vector<64x128xbf16>, vector<18x128xf32> -> vector<18x128xf32>
    %30 = arith.addf %25, %29 : vector<18x128xf32>
    %c0_25 = arith.constant 0 : index
    %c8 = arith.constant 8 : index
    %c0_26 = arith.constant 0 : index
    %31 = vector.load %arg1[%c0_25, %c8, %c0_26] : memref<1x42x64xbf16, #tpu.memory_space<vmem>>, vector<1x18x64xbf16>
    %32 = vector.shape_cast %31 : vector<1x18x64xbf16> to vector<18x64xbf16>
    %c384 = arith.constant 384 : index
    %c0_27 = arith.constant 0 : index
    %33 = vector.load %arg2[%c384, %c0_27] : memref<1024x128xbf16, #tpu.memory_space<vmem>>, vector<64x128xbf16>
    %cst_28 = arith.constant dense<0.000000e+00> : vector<18x128xf32>
    %34 = tpu.matmul %32, %33, %cst_28 {dimension_numbers = #tpu.dot_dimension_numbers<[1], [0], [0], [1], [0, 0, 1, 1], [], []>} : vector<18x64xbf16>, vector<64x128xbf16>, vector<18x128xf32> -> vector<18x128xf32>
    %35 = arith.addf %30, %34 : vector<18x128xf32>
    %c0_29 = arith.constant 0 : index
    %c9 = arith.constant 9 : index
    %c0_30 = arith.constant 0 : index
    %36 = vector.load %arg1[%c0_29, %c9, %c0_30] : memref<1x42x64xbf16, #tpu.memory_space<vmem>>, vector<1x18x64xbf16>
    %37 = vector.shape_cast %36 : vector<1x18x64xbf16> to vector<18x64xbf16>
    %c448 = arith.constant 448 : index
    %c0_31 = arith.constant 0 : index
    %38 = vector.load %arg2[%c448, %c0_31] : memref<1024x128xbf16, #tpu.memory_space<vmem>>, vector<64x128xbf16>
    %cst_32 = arith.constant dense<0.000000e+00> : vector<18x128xf32>
    %39 = tpu.matmul %37, %38, %cst_32 {dimension_numbers = #tpu.dot_dimension_numbers<[1], [0], [0], [1], [0, 0, 1, 1], [], []>} : vector<18x64xbf16>, vector<64x128xbf16>, vector<18x128xf32> -> vector<18x128xf32>
    %40 = arith.addf %35, %39 : vector<18x128xf32>
    %c0_33 = arith.constant 0 : index
    %c12 = arith.constant 12 : index
    %c0_34 = arith.constant 0 : index
    %41 = vector.load %arg1[%c0_33, %c12, %c0_34] : memref<1x42x64xbf16, #tpu.memory_space<vmem>>, vector<1x18x64xbf16>
    %42 = vector.shape_cast %41 : vector<1x18x64xbf16> to vector<18x64xbf16>
    %c512 = arith.constant 512 : index
    %c0_35 = arith.constant 0 : index
    %43 = vector.load %arg2[%c512, %c0_35] : memref<1024x128xbf16, #tpu.memory_space<vmem>>, vector<64x128xbf16>
    %cst_36 = arith.constant dense<0.000000e+00> : vector<18x128xf32>
    %44 = tpu.matmul %42, %43, %cst_36 {dimension_numbers = #tpu.dot_dimension_numbers<[1], [0], [0], [1], [0, 0, 1, 1], [], []>} : vector<18x64xbf16>, vector<64x128xbf16>, vector<18x128xf32> -> vector<18x128xf32>
    %45 = arith.addf %40, %44 : vector<18x128xf32>
    %c0_37 = arith.constant 0 : index
    %c13 = arith.constant 13 : index
    %c0_38 = arith.constant 0 : index
    %46 = vector.load %arg1[%c0_37, %c13, %c0_38] : memref<1x42x64xbf16, #tpu.memory_space<vmem>>, vector<1x18x64xbf16>
    %47 = vector.shape_cast %46 : vector<1x18x64xbf16> to vector<18x64xbf16>
    %c576 = arith.constant 576 : index
    %c0_39 = arith.constant 0 : index
    %48 = vector.load %arg2[%c576, %c0_39] : memref<1024x128xbf16, #tpu.memory_space<vmem>>, vector<64x128xbf16>
    %cst_40 = arith.constant dense<0.000000e+00> : vector<18x128xf32>
    %49 = tpu.matmul %47, %48, %cst_40 {dimension_numbers = #tpu.dot_dimension_numbers<[1], [0], [0], [1], [0, 0, 1, 1], [], []>} : vector<18x64xbf16>, vector<64x128xbf16>, vector<18x128xf32> -> vector<18x128xf32>
    %50 = arith.addf %45, %49 : vector<18x128xf32>
    %c0_41 = arith.constant 0 : index
    %c14 = arith.constant 14 : index
    %c0_42 = arith.constant 0 : index
    %51 = vector.load %arg1[%c0_41, %c14, %c0_42] : memref<1x42x64xbf16, #tpu.memory_space<vmem>>, vector<1x18x64xbf16>
    %52 = vector.shape_cast %51 : vector<1x18x64xbf16> to vector<18x64xbf16>
    %c640 = arith.constant 640 : index
    %c0_43 = arith.constant 0 : index
    %53 = vector.load %arg2[%c640, %c0_43] : memref<1024x128xbf16, #tpu.memory_space<vmem>>, vector<64x128xbf16>
    %cst_44 = arith.constant dense<0.000000e+00> : vector<18x128xf32>
    %54 = tpu.matmul %52, %53, %cst_44 {dimension_numbers = #tpu.dot_dimension_numbers<[1], [0], [0], [1], [0, 0, 1, 1], [], []>} : vector<18x64xbf16>, vector<64x128xbf16>, vector<18x128xf32> -> vector<18x128xf32>
    %55 = arith.addf %50, %54 : vector<18x128xf32>
    %c0_45 = arith.constant 0 : index
    %c15 = arith.constant 15 : index
    %c0_46 = arith.constant 0 : index
    %56 = vector.load %arg1[%c0_45, %c15, %c0_46] : memref<1x42x64xbf16, #tpu.memory_space<vmem>>, vector<1x18x64xbf16>
    %57 = vector.shape_cast %56 : vector<1x18x64xbf16> to vector<18x64xbf16>
    %c704 = arith.constant 704 : index
    %c0_47 = arith.constant 0 : index
    %58 = vector.load %arg2[%c704, %c0_47] : memref<1024x128xbf16, #tpu.memory_space<vmem>>, vector<64x128xbf16>
    %cst_48 = arith.constant dense<0.000000e+00> : vector<18x128xf32>
    %59 = tpu.matmul %57, %58, %cst_48 {dimension_numbers = #tpu.dot_dimension_numbers<[1], [0], [0], [1], [0, 0, 1, 1], [], []>} : vector<18x64xbf16>, vector<64x128xbf16>, vector<18x128xf32> -> vector<18x128xf32>
    %60 = arith.addf %55, %59 : vector<18x128xf32>
    %c0_49 = arith.constant 0 : index
    %c18 = arith.constant 18 : index
    %c0_50 = arith.constant 0 : index
    %61 = vector.load %arg1[%c0_49, %c18, %c0_50] : memref<1x42x64xbf16, #tpu.memory_space<vmem>>, vector<1x18x64xbf16>
    %62 = vector.shape_cast %61 : vector<1x18x64xbf16> to vector<18x64xbf16>
    %c768 = arith.constant 768 : index
    %c0_51 = arith.constant 0 : index
    %63 = vector.load %arg2[%c768, %c0_51] : memref<1024x128xbf16, #tpu.memory_space<vmem>>, vector<64x128xbf16>
    %cst_52 = arith.constant dense<0.000000e+00> : vector<18x128xf32>
    %64 = tpu.matmul %62, %63, %cst_52 {dimension_numbers = #tpu.dot_dimension_numbers<[1], [0], [0], [1], [0, 0, 1, 1], [], []>} : vector<18x64xbf16>, vector<64x128xbf16>, vector<18x128xf32> -> vector<18x128xf32>
    %65 = arith.addf %60, %64 : vector<18x128xf32>
    %c0_53 = arith.constant 0 : index
    %c19 = arith.constant 19 : index
    %c0_54 = arith.constant 0 : index
    %66 = vector.load %arg1[%c0_53, %c19, %c0_54] : memref<1x42x64xbf16, #tpu.memory_space<vmem>>, vector<1x18x64xbf16>
    %67 = vector.shape_cast %66 : vector<1x18x64xbf16> to vector<18x64xbf16>
    %c832 = arith.constant 832 : index
    %c0_55 = arith.constant 0 : index
    %68 = vector.load %arg2[%c832, %c0_55] : memref<1024x128xbf16, #tpu.memory_space<vmem>>, vector<64x128xbf16>
    %cst_56 = arith.constant dense<0.000000e+00> : vector<18x128xf32>
    %69 = tpu.matmul %67, %68, %cst_56 {dimension_numbers = #tpu.dot_dimension_numbers<[1], [0], [0], [1], [0, 0, 1, 1], [], []>} : vector<18x64xbf16>, vector<64x128xbf16>, vector<18x128xf32> -> vector<18x128xf32>
    %70 = arith.addf %65, %69 : vector<18x128xf32>
    %c0_57 = arith.constant 0 : index
    %c20 = arith.constant 20 : index
    %c0_58 = arith.constant 0 : index
    %71 = vector.load %arg1[%c0_57, %c20, %c0_58] : memref<1x42x64xbf16, #tpu.memory_space<vmem>>, vector<1x18x64xbf16>
    %72 = vector.shape_cast %71 : vector<1x18x64xbf16> to vector<18x64xbf16>
    %c896 = arith.constant 896 : index
    %c0_59 = arith.constant 0 : index
    %73 = vector.load %arg2[%c896, %c0_59] : memref<1024x128xbf16, #tpu.memory_space<vmem>>, vector<64x128xbf16>
    %cst_60 = arith.constant dense<0.000000e+00> : vector<18x128xf32>
    %74 = tpu.matmul %72, %73, %cst_60 {dimension_numbers = #tpu.dot_dimension_numbers<[1], [0], [0], [1], [0, 0, 1, 1], [], []>} : vector<18x64xbf16>, vector<64x128xbf16>, vector<18x128xf32> -> vector<18x128xf32>
    %75 = arith.addf %70, %74 : vector<18x128xf32>
    %c0_61 = arith.constant 0 : index
    %c21 = arith.constant 21 : index
    %c0_62 = arith.constant 0 : index
    %76 = vector.load %arg1[%c0_61, %c21, %c0_62] : memref<1x42x64xbf16, #tpu.memory_space<vmem>>, vector<1x18x64xbf16>
    %77 = vector.shape_cast %76 : vector<1x18x64xbf16> to vector<18x64xbf16>
    %c960 = arith.constant 960 : index
    %c0_63 = arith.constant 0 : index
    %78 = vector.load %arg2[%c960, %c0_63] : memref<1024x128xbf16, #tpu.memory_space<vmem>>, vector<64x128xbf16>
    %cst_64 = arith.constant dense<0.000000e+00> : vector<18x128xf32>
    %79 = tpu.matmul %77, %78, %cst_64 {dimension_numbers = #tpu.dot_dimension_numbers<[1], [0], [0], [1], [0, 0, 1, 1], [], []>} : vector<18x64xbf16>, vector<64x128xbf16>, vector<18x128xf32> -> vector<18x128xf32>
    %80 = arith.addf %75, %79 : vector<18x128xf32>
    %c0_65 = arith.constant 0 : index
    %c0_66 = arith.constant 0 : index
    %81 = vector.load %arg3[%c0_65, %c0_66] : memref<1x128xf32, #tpu.memory_space<vmem>>, vector<1x128xf32>
    %82 = vector.broadcast %81 : vector<1x128xf32> to vector<18x128xf32>
    %83 = arith.addf %80, %82 : vector<18x128xf32>
    %cst_67 = arith.constant 0.000000e+00 : f32
    %84 = vector.broadcast %cst_67 : f32 to vector<18x128xf32>
    %85 = arith.cmpf oge, %83, %84 : vector<18x128xf32>
    %cst_68 = arith.constant 2.000000e-01 : f32
    %86 = vector.broadcast %cst_68 : f32 to vector<18x128xf32>
    %87 = arith.mulf %86, %83 : vector<18x128xf32>
    %88 = arith.select %85, %83, %87 : vector<18x128xi1>, vector<18x128xf32>
    %89 = arith.truncf %88 : vector<18x128xf32> to vector<18x128xbf16>
    %c0_69 = arith.constant 0 : index
    %c0_70 = arith.constant 0 : index
    %c0_71 = arith.constant 0 : index
    %90 = vector.load %arg4[%c0_69, %c0_70, %c0_71] : memref<1x18x128xbf16, #tpu.memory_space<vmem>>, vector<1x18x128xbf16>
    %91 = vector.shape_cast %90 : vector<1x18x128xbf16> to vector<18x128xbf16>
    %92 = vector.shape_cast %89 : vector<18x128xbf16> to vector<1x18x128xbf16>
    tpu.vector_store %arg4[%c0_69, %c0_70, %c0_71], %92 {strides = array<i32>} : memref<1x18x128xbf16, #tpu.memory_space<vmem>>, vector<1x18x128xbf16>,
    return
  }
  func.func @transform_0(%arg0: i32) -> (i32, i32, i32) {
    %c0_i32 = arith.constant 0 : i32
    %c0_i32_0 = arith.constant 0 : i32
    %c0_i32_1 = arith.constant 0 : i32
    return %arg0, %c0_i32, %c0_i32_0 : i32, i32, i32
  }
  func.func @transform_1(%arg0: i32) -> (i32, i32) {
    %c0_i32 = arith.constant 0 : i32
    %c0_i32_0 = arith.constant 0 : i32
    %c0_i32_1 = arith.constant 0 : i32
    return %c0_i32, %c0_i32_0 : i32, i32
  }
  func.func @transform_2(%arg0: i32) -> (i32, i32) {
    %c0_i32 = arith.constant 0 : i32
    %c0_i32_0 = arith.constant 0 : i32
    %c0_i32_1 = arith.constant 0 : i32
    return %c0_i32, %c0_i32_0 : i32, i32
  }
  func.func @transform_3(%arg0: i32) -> (i32, i32, i32) {
    %c0_i32 = arith.constant 0 : i32
    %c0_i32_0 = arith.constant 0 : i32
    %c0_i32_1 = arith.constant 0 : i32
    return %arg0, %c0_i32, %c0_i32_0 : i32, i32, i32
  }
}

module attributes {stable_mosaic.version = 11 : i64} {
  func.func @_conv_kernel(%arg0: i32, %arg1: memref<1x30x128xbf16, #tpu.memory_space<vmem>>, %arg2: memref<1x2048xbf16, #tpu.memory_space<vmem>>, %arg3: memref<1x1xf32, #tpu.memory_space<vmem>>, %arg4: memref<1x10x1xf32, #tpu.memory_space<vmem>>) attributes {dimension_semantics = [#tpu.dimension_semantics<parallel>], iteration_bounds = array<i64: 2>, scalar_prefetch = 0 : i64, scratch_operands = 0 : i64, tpu.core_type = #tpu.core_type<tc>, window_params = [{transform_indices = @transform_0, window_bounds = array<i64: 1, 30, 128>}, {pipeline_mode = #tpu.pipeline_mode<synchronous>, transform_indices = @transform_1, window_bounds = array<i64: 1, 2048>}, {pipeline_mode = #tpu.pipeline_mode<synchronous>, transform_indices = @transform_2, window_bounds = array<i64: 1, 1>}, {transform_indices = @transform_3, window_bounds = array<i64: 1, 10, 1>}]} {
    %cst = arith.constant 0.000000e+00 : f32
    %0 = vector.broadcast %cst : f32 to vector<10x1xf32>
    %c0 = arith.constant 0 : index
    %c0_0 = arith.constant 0 : index
    %c0_1 = arith.constant 0 : index
    %1 = vector.load %arg1[%c0, %c0_0, %c0_1] : memref<1x30x128xbf16, #tpu.memory_space<vmem>>, vector<1x10x128xbf16>
    %2 = vector.shape_cast %1 : vector<1x10x128xbf16> to vector<10x128xbf16>
    %c0_2 = arith.constant 0 : index
    %c0_3 = arith.constant 0 : index
    %3 = vector.load %arg2[%c0_2, %c0_3] : memref<1x2048xbf16, #tpu.memory_space<vmem>>, vector<1x128xbf16>
    %4 = arith.extf %3 : vector<1x128xbf16> to vector<1x128xf32>
    %5 = arith.extf %2 : vector<10x128xbf16> to vector<10x128xf32>
    %6 = vector.broadcast %4 : vector<1x128xf32> to vector<10x128xf32>
    %7 = arith.mulf %5, %6 : vector<10x128xf32>
    %cst_4 = arith.constant dense<0.000000e+00> : vector<10xf32>
    %8 = vector.multi_reduction <add>, %7, %cst_4 [1] : vector<10x128xf32> to vector<10xf32>
    %9 = vector.shape_cast %8 : vector<10xf32> to vector<10x1xf32>
    %10 = arith.addf %0, %9 : vector<10x1xf32>
    %c0_5 = arith.constant 0 : index
    %c1 = arith.constant 1 : index
    %c0_6 = arith.constant 0 : index
    %11 = vector.load %arg1[%c0_5, %c1, %c0_6] : memref<1x30x128xbf16, #tpu.memory_space<vmem>>, vector<1x10x128xbf16>
    %12 = vector.shape_cast %11 : vector<1x10x128xbf16> to vector<10x128xbf16>
    %c0_7 = arith.constant 0 : index
    %c128 = arith.constant 128 : index
    %13 = vector.load %arg2[%c0_7, %c128] : memref<1x2048xbf16, #tpu.memory_space<vmem>>, vector<1x128xbf16>
    %14 = arith.extf %13 : vector<1x128xbf16> to vector<1x128xf32>
    %15 = arith.extf %12 : vector<10x128xbf16> to vector<10x128xf32>
    %16 = vector.broadcast %14 : vector<1x128xf32> to vector<10x128xf32>
    %17 = arith.mulf %15, %16 : vector<10x128xf32>
    %cst_8 = arith.constant dense<0.000000e+00> : vector<10xf32>
    %18 = vector.multi_reduction <add>, %17, %cst_8 [1] : vector<10x128xf32> to vector<10xf32>
    %19 = vector.shape_cast %18 : vector<10xf32> to vector<10x1xf32>
    %20 = arith.addf %10, %19 : vector<10x1xf32>
    %c0_9 = arith.constant 0 : index
    %c2 = arith.constant 2 : index
    %c0_10 = arith.constant 0 : index
    %21 = vector.load %arg1[%c0_9, %c2, %c0_10] : memref<1x30x128xbf16, #tpu.memory_space<vmem>>, vector<1x10x128xbf16>
    %22 = vector.shape_cast %21 : vector<1x10x128xbf16> to vector<10x128xbf16>
    %c0_11 = arith.constant 0 : index
    %c256 = arith.constant 256 : index
    %23 = vector.load %arg2[%c0_11, %c256] : memref<1x2048xbf16, #tpu.memory_space<vmem>>, vector<1x128xbf16>
    %24 = arith.extf %23 : vector<1x128xbf16> to vector<1x128xf32>
    %25 = arith.extf %22 : vector<10x128xbf16> to vector<10x128xf32>
    %26 = vector.broadcast %24 : vector<1x128xf32> to vector<10x128xf32>
    %27 = arith.mulf %25, %26 : vector<10x128xf32>
    %cst_12 = arith.constant dense<0.000000e+00> : vector<10xf32>
    %28 = vector.multi_reduction <add>, %27, %cst_12 [1] : vector<10x128xf32> to vector<10xf32>
    %29 = vector.shape_cast %28 : vector<10xf32> to vector<10x1xf32>
    %30 = arith.addf %20, %29 : vector<10x1xf32>
    %c0_13 = arith.constant 0 : index
    %c3 = arith.constant 3 : index
    %c0_14 = arith.constant 0 : index
    %31 = vector.load %arg1[%c0_13, %c3, %c0_14] : memref<1x30x128xbf16, #tpu.memory_space<vmem>>, vector<1x10x128xbf16>
    %32 = vector.shape_cast %31 : vector<1x10x128xbf16> to vector<10x128xbf16>
    %c0_15 = arith.constant 0 : index
    %c384 = arith.constant 384 : index
    %33 = vector.load %arg2[%c0_15, %c384] : memref<1x2048xbf16, #tpu.memory_space<vmem>>, vector<1x128xbf16>
    %34 = arith.extf %33 : vector<1x128xbf16> to vector<1x128xf32>
    %35 = arith.extf %32 : vector<10x128xbf16> to vector<10x128xf32>
    %36 = vector.broadcast %34 : vector<1x128xf32> to vector<10x128xf32>
    %37 = arith.mulf %35, %36 : vector<10x128xf32>
    %cst_16 = arith.constant dense<0.000000e+00> : vector<10xf32>
    %38 = vector.multi_reduction <add>, %37, %cst_16 [1] : vector<10x128xf32> to vector<10xf32>
    %39 = vector.shape_cast %38 : vector<10xf32> to vector<10x1xf32>
    %40 = arith.addf %30, %39 : vector<10x1xf32>
    %c0_17 = arith.constant 0 : index
    %c5 = arith.constant 5 : index
    %c0_18 = arith.constant 0 : index
    %41 = vector.load %arg1[%c0_17, %c5, %c0_18] : memref<1x30x128xbf16, #tpu.memory_space<vmem>>, vector<1x10x128xbf16>
    %42 = vector.shape_cast %41 : vector<1x10x128xbf16> to vector<10x128xbf16>
    %c0_19 = arith.constant 0 : index
    %c512 = arith.constant 512 : index
    %43 = vector.load %arg2[%c0_19, %c512] : memref<1x2048xbf16, #tpu.memory_space<vmem>>, vector<1x128xbf16>
    %44 = arith.extf %43 : vector<1x128xbf16> to vector<1x128xf32>
    %45 = arith.extf %42 : vector<10x128xbf16> to vector<10x128xf32>
    %46 = vector.broadcast %44 : vector<1x128xf32> to vector<10x128xf32>
    %47 = arith.mulf %45, %46 : vector<10x128xf32>
    %cst_20 = arith.constant dense<0.000000e+00> : vector<10xf32>
    %48 = vector.multi_reduction <add>, %47, %cst_20 [1] : vector<10x128xf32> to vector<10xf32>
    %49 = vector.shape_cast %48 : vector<10xf32> to vector<10x1xf32>
    %50 = arith.addf %40, %49 : vector<10x1xf32>
    %c0_21 = arith.constant 0 : index
    %c6 = arith.constant 6 : index
    %c0_22 = arith.constant 0 : index
    %51 = vector.load %arg1[%c0_21, %c6, %c0_22] : memref<1x30x128xbf16, #tpu.memory_space<vmem>>, vector<1x10x128xbf16>
    %52 = vector.shape_cast %51 : vector<1x10x128xbf16> to vector<10x128xbf16>
    %c0_23 = arith.constant 0 : index
    %c640 = arith.constant 640 : index
    %53 = vector.load %arg2[%c0_23, %c640] : memref<1x2048xbf16, #tpu.memory_space<vmem>>, vector<1x128xbf16>
    %54 = arith.extf %53 : vector<1x128xbf16> to vector<1x128xf32>
    %55 = arith.extf %52 : vector<10x128xbf16> to vector<10x128xf32>
    %56 = vector.broadcast %54 : vector<1x128xf32> to vector<10x128xf32>
    %57 = arith.mulf %55, %56 : vector<10x128xf32>
    %cst_24 = arith.constant dense<0.000000e+00> : vector<10xf32>
    %58 = vector.multi_reduction <add>, %57, %cst_24 [1] : vector<10x128xf32> to vector<10xf32>
    %59 = vector.shape_cast %58 : vector<10xf32> to vector<10x1xf32>
    %60 = arith.addf %50, %59 : vector<10x1xf32>
    %c0_25 = arith.constant 0 : index
    %c7 = arith.constant 7 : index
    %c0_26 = arith.constant 0 : index
    %61 = vector.load %arg1[%c0_25, %c7, %c0_26] : memref<1x30x128xbf16, #tpu.memory_space<vmem>>, vector<1x10x128xbf16>
    %62 = vector.shape_cast %61 : vector<1x10x128xbf16> to vector<10x128xbf16>
    %c0_27 = arith.constant 0 : index
    %c768 = arith.constant 768 : index
    %63 = vector.load %arg2[%c0_27, %c768] : memref<1x2048xbf16, #tpu.memory_space<vmem>>, vector<1x128xbf16>
    %64 = arith.extf %63 : vector<1x128xbf16> to vector<1x128xf32>
    %65 = arith.extf %62 : vector<10x128xbf16> to vector<10x128xf32>
    %66 = vector.broadcast %64 : vector<1x128xf32> to vector<10x128xf32>
    %67 = arith.mulf %65, %66 : vector<10x128xf32>
    %cst_28 = arith.constant dense<0.000000e+00> : vector<10xf32>
    %68 = vector.multi_reduction <add>, %67, %cst_28 [1] : vector<10x128xf32> to vector<10xf32>
    %69 = vector.shape_cast %68 : vector<10xf32> to vector<10x1xf32>
    %70 = arith.addf %60, %69 : vector<10x1xf32>
    %c0_29 = arith.constant 0 : index
    %c8 = arith.constant 8 : index
    %c0_30 = arith.constant 0 : index
    %71 = vector.load %arg1[%c0_29, %c8, %c0_30] : memref<1x30x128xbf16, #tpu.memory_space<vmem>>, vector<1x10x128xbf16>
    %72 = vector.shape_cast %71 : vector<1x10x128xbf16> to vector<10x128xbf16>
    %c0_31 = arith.constant 0 : index
    %c896 = arith.constant 896 : index
    %73 = vector.load %arg2[%c0_31, %c896] : memref<1x2048xbf16, #tpu.memory_space<vmem>>, vector<1x128xbf16>
    %74 = arith.extf %73 : vector<1x128xbf16> to vector<1x128xf32>
    %75 = arith.extf %72 : vector<10x128xbf16> to vector<10x128xf32>
    %76 = vector.broadcast %74 : vector<1x128xf32> to vector<10x128xf32>
    %77 = arith.mulf %75, %76 : vector<10x128xf32>
    %cst_32 = arith.constant dense<0.000000e+00> : vector<10xf32>
    %78 = vector.multi_reduction <add>, %77, %cst_32 [1] : vector<10x128xf32> to vector<10xf32>
    %79 = vector.shape_cast %78 : vector<10xf32> to vector<10x1xf32>
    %80 = arith.addf %70, %79 : vector<10x1xf32>
    %c0_33 = arith.constant 0 : index
    %c10 = arith.constant 10 : index
    %c0_34 = arith.constant 0 : index
    %81 = vector.load %arg1[%c0_33, %c10, %c0_34] : memref<1x30x128xbf16, #tpu.memory_space<vmem>>, vector<1x10x128xbf16>
    %82 = vector.shape_cast %81 : vector<1x10x128xbf16> to vector<10x128xbf16>
    %c0_35 = arith.constant 0 : index
    %c1024 = arith.constant 1024 : index
    %83 = vector.load %arg2[%c0_35, %c1024] : memref<1x2048xbf16, #tpu.memory_space<vmem>>, vector<1x128xbf16>
    %84 = arith.extf %83 : vector<1x128xbf16> to vector<1x128xf32>
    %85 = arith.extf %82 : vector<10x128xbf16> to vector<10x128xf32>
    %86 = vector.broadcast %84 : vector<1x128xf32> to vector<10x128xf32>
    %87 = arith.mulf %85, %86 : vector<10x128xf32>
    %cst_36 = arith.constant dense<0.000000e+00> : vector<10xf32>
    %88 = vector.multi_reduction <add>, %87, %cst_36 [1] : vector<10x128xf32> to vector<10xf32>
    %89 = vector.shape_cast %88 : vector<10xf32> to vector<10x1xf32>
    %90 = arith.addf %80, %89 : vector<10x1xf32>
    %c0_37 = arith.constant 0 : index
    %c11 = arith.constant 11 : index
    %c0_38 = arith.constant 0 : index
    %91 = vector.load %arg1[%c0_37, %c11, %c0_38] : memref<1x30x128xbf16, #tpu.memory_space<vmem>>, vector<1x10x128xbf16>
    %92 = vector.shape_cast %91 : vector<1x10x128xbf16> to vector<10x128xbf16>
    %c0_39 = arith.constant 0 : index
    %c1152 = arith.constant 1152 : index
    %93 = vector.load %arg2[%c0_39, %c1152] : memref<1x2048xbf16, #tpu.memory_space<vmem>>, vector<1x128xbf16>
    %94 = arith.extf %93 : vector<1x128xbf16> to vector<1x128xf32>
    %95 = arith.extf %92 : vector<10x128xbf16> to vector<10x128xf32>
    %96 = vector.broadcast %94 : vector<1x128xf32> to vector<10x128xf32>
    %97 = arith.mulf %95, %96 : vector<10x128xf32>
    %cst_40 = arith.constant dense<0.000000e+00> : vector<10xf32>
    %98 = vector.multi_reduction <add>, %97, %cst_40 [1] : vector<10x128xf32> to vector<10xf32>
    %99 = vector.shape_cast %98 : vector<10xf32> to vector<10x1xf32>
    %100 = arith.addf %90, %99 : vector<10x1xf32>
    %c0_41 = arith.constant 0 : index
    %c12 = arith.constant 12 : index
    %c0_42 = arith.constant 0 : index
    %101 = vector.load %arg1[%c0_41, %c12, %c0_42] : memref<1x30x128xbf16, #tpu.memory_space<vmem>>, vector<1x10x128xbf16>
    %102 = vector.shape_cast %101 : vector<1x10x128xbf16> to vector<10x128xbf16>
    %c0_43 = arith.constant 0 : index
    %c1280 = arith.constant 1280 : index
    %103 = vector.load %arg2[%c0_43, %c1280] : memref<1x2048xbf16, #tpu.memory_space<vmem>>, vector<1x128xbf16>
    %104 = arith.extf %103 : vector<1x128xbf16> to vector<1x128xf32>
    %105 = arith.extf %102 : vector<10x128xbf16> to vector<10x128xf32>
    %106 = vector.broadcast %104 : vector<1x128xf32> to vector<10x128xf32>
    %107 = arith.mulf %105, %106 : vector<10x128xf32>
    %cst_44 = arith.constant dense<0.000000e+00> : vector<10xf32>
    %108 = vector.multi_reduction <add>, %107, %cst_44 [1] : vector<10x128xf32> to vector<10xf32>
    %109 = vector.shape_cast %108 : vector<10xf32> to vector<10x1xf32>
    %110 = arith.addf %100, %109 : vector<10x1xf32>
    %c0_45 = arith.constant 0 : index
    %c13 = arith.constant 13 : index
    %c0_46 = arith.constant 0 : index
    %111 = vector.load %arg1[%c0_45, %c13, %c0_46] : memref<1x30x128xbf16, #tpu.memory_space<vmem>>, vector<1x10x128xbf16>
    %112 = vector.shape_cast %111 : vector<1x10x128xbf16> to vector<10x128xbf16>
    %c0_47 = arith.constant 0 : index
    %c1408 = arith.constant 1408 : index
    %113 = vector.load %arg2[%c0_47, %c1408] : memref<1x2048xbf16, #tpu.memory_space<vmem>>, vector<1x128xbf16>
    %114 = arith.extf %113 : vector<1x128xbf16> to vector<1x128xf32>
    %115 = arith.extf %112 : vector<10x128xbf16> to vector<10x128xf32>
    %116 = vector.broadcast %114 : vector<1x128xf32> to vector<10x128xf32>
    %117 = arith.mulf %115, %116 : vector<10x128xf32>
    %cst_48 = arith.constant dense<0.000000e+00> : vector<10xf32>
    %118 = vector.multi_reduction <add>, %117, %cst_48 [1] : vector<10x128xf32> to vector<10xf32>
    %119 = vector.shape_cast %118 : vector<10xf32> to vector<10x1xf32>
    %120 = arith.addf %110, %119 : vector<10x1xf32>
    %c0_49 = arith.constant 0 : index
    %c15 = arith.constant 15 : index
    %c0_50 = arith.constant 0 : index
    %121 = vector.load %arg1[%c0_49, %c15, %c0_50] : memref<1x30x128xbf16, #tpu.memory_space<vmem>>, vector<1x10x128xbf16>
    %122 = vector.shape_cast %121 : vector<1x10x128xbf16> to vector<10x128xbf16>
    %c0_51 = arith.constant 0 : index
    %c1536 = arith.constant 1536 : index
    %123 = vector.load %arg2[%c0_51, %c1536] : memref<1x2048xbf16, #tpu.memory_space<vmem>>, vector<1x128xbf16>
    %124 = arith.extf %123 : vector<1x128xbf16> to vector<1x128xf32>
    %125 = arith.extf %122 : vector<10x128xbf16> to vector<10x128xf32>
    %126 = vector.broadcast %124 : vector<1x128xf32> to vector<10x128xf32>
    %127 = arith.mulf %125, %126 : vector<10x128xf32>
    %cst_52 = arith.constant dense<0.000000e+00> : vector<10xf32>
    %128 = vector.multi_reduction <add>, %127, %cst_52 [1] : vector<10x128xf32> to vector<10xf32>
    %129 = vector.shape_cast %128 : vector<10xf32> to vector<10x1xf32>
    %130 = arith.addf %120, %129 : vector<10x1xf32>
    %c0_53 = arith.constant 0 : index
    %c16 = arith.constant 16 : index
    %c0_54 = arith.constant 0 : index
    %131 = vector.load %arg1[%c0_53, %c16, %c0_54] : memref<1x30x128xbf16, #tpu.memory_space<vmem>>, vector<1x10x128xbf16>
    %132 = vector.shape_cast %131 : vector<1x10x128xbf16> to vector<10x128xbf16>
    %c0_55 = arith.constant 0 : index
    %c1664 = arith.constant 1664 : index
    %133 = vector.load %arg2[%c0_55, %c1664] : memref<1x2048xbf16, #tpu.memory_space<vmem>>, vector<1x128xbf16>
    %134 = arith.extf %133 : vector<1x128xbf16> to vector<1x128xf32>
    %135 = arith.extf %132 : vector<10x128xbf16> to vector<10x128xf32>
    %136 = vector.broadcast %134 : vector<1x128xf32> to vector<10x128xf32>
    %137 = arith.mulf %135, %136 : vector<10x128xf32>
    %cst_56 = arith.constant dense<0.000000e+00> : vector<10xf32>
    %138 = vector.multi_reduction <add>, %137, %cst_56 [1] : vector<10x128xf32> to vector<10xf32>
    %139 = vector.shape_cast %138 : vector<10xf32> to vector<10x1xf32>
    %140 = arith.addf %130, %139 : vector<10x1xf32>
    %c0_57 = arith.constant 0 : index
    %c17 = arith.constant 17 : index
    %c0_58 = arith.constant 0 : index
    %141 = vector.load %arg1[%c0_57, %c17, %c0_58] : memref<1x30x128xbf16, #tpu.memory_space<vmem>>, vector<1x10x128xbf16>
    %142 = vector.shape_cast %141 : vector<1x10x128xbf16> to vector<10x128xbf16>
    %c0_59 = arith.constant 0 : index
    %c1792 = arith.constant 1792 : index
    %143 = vector.load %arg2[%c0_59, %c1792] : memref<1x2048xbf16, #tpu.memory_space<vmem>>, vector<1x128xbf16>
    %144 = arith.extf %143 : vector<1x128xbf16> to vector<1x128xf32>
    %145 = arith.extf %142 : vector<10x128xbf16> to vector<10x128xf32>
    %146 = vector.broadcast %144 : vector<1x128xf32> to vector<10x128xf32>
    %147 = arith.mulf %145, %146 : vector<10x128xf32>
    %cst_60 = arith.constant dense<0.000000e+00> : vector<10xf32>
    %148 = vector.multi_reduction <add>, %147, %cst_60 [1] : vector<10x128xf32> to vector<10xf32>
    %149 = vector.shape_cast %148 : vector<10xf32> to vector<10x1xf32>
    %150 = arith.addf %140, %149 : vector<10x1xf32>
    %c0_61 = arith.constant 0 : index
    %c18 = arith.constant 18 : index
    %c0_62 = arith.constant 0 : index
    %151 = vector.load %arg1[%c0_61, %c18, %c0_62] : memref<1x30x128xbf16, #tpu.memory_space<vmem>>, vector<1x10x128xbf16>
    %152 = vector.shape_cast %151 : vector<1x10x128xbf16> to vector<10x128xbf16>
    %c0_63 = arith.constant 0 : index
    %c1920 = arith.constant 1920 : index
    %153 = vector.load %arg2[%c0_63, %c1920] : memref<1x2048xbf16, #tpu.memory_space<vmem>>, vector<1x128xbf16>
    %154 = arith.extf %153 : vector<1x128xbf16> to vector<1x128xf32>
    %155 = arith.extf %152 : vector<10x128xbf16> to vector<10x128xf32>
    %156 = vector.broadcast %154 : vector<1x128xf32> to vector<10x128xf32>
    %157 = arith.mulf %155, %156 : vector<10x128xf32>
    %cst_64 = arith.constant dense<0.000000e+00> : vector<10xf32>
    %158 = vector.multi_reduction <add>, %157, %cst_64 [1] : vector<10x128xf32> to vector<10xf32>
    %159 = vector.shape_cast %158 : vector<10xf32> to vector<10x1xf32>
    %160 = arith.addf %150, %159 : vector<10x1xf32>
    %c0_65 = arith.constant 0 : index
    %c0_66 = arith.constant 0 : index
    %161 = vector.load %arg3[%c0_65, %c0_66] : memref<1x1xf32, #tpu.memory_space<vmem>>, vector<1x1xf32>
    %162 = vector.broadcast %161 : vector<1x1xf32> to vector<10x1xf32>
    %163 = arith.addf %160, %162 : vector<10x1xf32>
    %c0_67 = arith.constant 0 : index
    %c0_68 = arith.constant 0 : index
    %c0_69 = arith.constant 0 : index
    %164 = vector.load %arg4[%c0_67, %c0_68, %c0_69] : memref<1x10x1xf32, #tpu.memory_space<vmem>>, vector<1x10x1xf32>
    %165 = vector.shape_cast %164 : vector<1x10x1xf32> to vector<10x1xf32>
    %166 = vector.shape_cast %163 : vector<10x1xf32> to vector<1x10x1xf32>
    tpu.vector_store %arg4[%c0_67, %c0_68, %c0_69], %166 {strides = array<i32>} : memref<1x10x1xf32, #tpu.memory_space<vmem>>, vector<1x10x1xf32>,
    return
  }
  func.func @transform_0(%arg0: i32) -> (i32, i32, i32) {
    %c0_i32 = arith.constant 0 : i32
    %c0_i32_0 = arith.constant 0 : i32
    %c0_i32_1 = arith.constant 0 : i32
    return %arg0, %c0_i32, %c0_i32_0 : i32, i32, i32
  }
  func.func @transform_1(%arg0: i32) -> (i32, i32) {
    %c0_i32 = arith.constant 0 : i32
    %c0_i32_0 = arith.constant 0 : i32
    %c0_i32_1 = arith.constant 0 : i32
    return %c0_i32, %c0_i32_0 : i32, i32
  }
  func.func @transform_2(%arg0: i32) -> (i32, i32) {
    %c0_i32 = arith.constant 0 : i32
    %c0_i32_0 = arith.constant 0 : i32
    %c0_i32_1 = arith.constant 0 : i32
    return %c0_i32, %c0_i32_0 : i32, i32
  }
  func.func @transform_3(%arg0: i32) -> (i32, i32, i32) {
    %c0_i32 = arith.constant 0 : i32
    %c0_i32_0 = arith.constant 0 : i32
    %c0_i32_1 = arith.constant 0 : i32
    return %arg0, %c0_i32, %c0_i32_0 : i32, i32, i32
  }
}

</mosaic_0001>

<bundles_post_ra>
// kernel: _lambda_.5
= control target key start
LH: loop header
LB: loop body
LE: loop exit
PB: predicated region body
PF: predicated region fallthrough
CT: control target
= control target key end

     0   :  { %s2694_s12 = smov 0   ;;  %s3237_s0 = inlined_call_operand.vmem [shape: bf16[2,306,16], index: 0, kind: input, shape index: {}]   ;;  %s3238_s1 = inlined_call_operand.vmem [shape: bf16[64,16], index: 1, kind: input, shape index: {}]   ;;  %s3239_s2 = inlined_call_operand.vmem [shape: f32[1,16], index: 2, kind: input, shape index: {}]   ;;  %s3240_s3 = inlined_call_operand.vmem [shape: bf16[2,272,16], index: 3, kind: output, shape index: {}]  }
   0x1 LB: > { %s2072_s13 = sadd.s32 4294967295, %s2670_s12   ;;  %p2076_p0 = scmp.ge.s32.totalorder %s2670_s12, 1  ;;  %s2670_s12 = sphi %s2694_s12, %s13_s12  }
   0x2   : > { %p137_p1 = scmp.lt.s32.totalorder %s2670_s12, 3 }
   0x4   : > { %p138_p2 = pnand %p2076_p0, %p137_p1 }
   0x5   : > { %v2623_v0 = vld [vmem:[%s3238_s1 + $0x8] sm:$0xff] (!%p138_p2)   ;;  %v2672_v1 = vmov (!%p138_p2), 0.0   ;;  %v2624_v2 = vld [vmem:[%s3238_s1] sm:$0xff] (!%p138_p2)   ;;  %vm2673_vm0 = vmmov (!%p138_p2), 0   ;;  %p161_p3 = scmp.lt.s32.totalorder (!%p138_p2), %s2072_s13, 1  ;;  %vm446_vm1 = vcmask (!%p138_p2), 130048  }
   0x6   : > { %141 = sbr.rel (%p138_p2) target bundleno = 515 (0x203), region = 32  ;;  %2331 = vmatprep.subr.bf16.mxu0 (!%p138_p2), %v2672_v1  ;;  %2401 = vmatprep.subr.bf16.mxu1 (!%p138_p2), %v2672_v1  ;;  %v2628_v3 = vld [vmem:[%s3238_s1 + $0x18] sm:$0xff] (!%p138_p2)   ;;  %vm299_vm2 = vsmask.f32 (!%p138_p2), 7424  ;;  %v2627_v12 = vld [vmem:[%s3238_s1 + $0x10] sm:$0xff] (!%p138_p2)   ;;  %vm1407_vm3 = vcmask (!%p138_p2), 1046528  }
   0x7   : > { %2332 = vmatpush3.bf16.msra.mxu0 (!%p138_p2), %v2623_v0  ;;  %2403 = vmatprep.mubr.msk.bf16.mxu1 (!%p138_p2), %vm2673_vm0, %v2672_v1  ;;  %vm1982_vm5 = vcmask (!%p138_p2), 125952  }
   0x8   : > { %2402 = vmatpush3.bf16.msra.mxu1 (!%p138_p2), %v2624_v2  ;;  %2333 = vmatprep.mubr.msk.bf16.mxu0 (!%p138_p2), %vm2673_vm0, %v2672_v1 }
   0x9   : > { %2471 = vmatprep.subr.bf16.mxu0 (!%p138_p2), %v2672_v1  ;;  %2541 = vmatprep.subr.bf16.mxu1 (!%p138_p2), %v2672_v1 }
   0xd   : > { %s3242_s13 = smov (!%p161_p3, %s2072_s13), 1 }
   0xe   : > { %s2611_s18 = smul.u32 156, %s3242_s13 }
   0xf   : > { %s2612_s28 = smul.u32 136, %s3242_s13 }
  0x10   : > { %s2722_s21 = scalar_lea.vmem %s3237_s0, %s2611_s18 }
  0x11   : > { %v2625_v4 = vld [vmem:[%s2722_s21] sm:$0xff]   ;;  %v2626_v5 = vld [vmem:[%s2722_s21 + $0x8] sm:$0xff]   ;;  %v2629_v9 = vld [vmem:[%s2722_s21 + $0x10] sm:$0xff]   ;;  %s3100_s4 = scalar_lea.vmem %s3240_s3, %s2612_s28 }
  0x12   : > { %2404 = vmatmul.mubr.msk.bf16.vlgmr.msra.gmra.mrb[0].mxu1 %vm446_vm1, %v2625_v4  ;;  %v301_v6 = vshrl.u32 %v2625_v4, 16  ;;  %v303_v7 = vshll.u32 %v2625_v4, 16  ;;  %v308_v8 = vshll.u32 %v2626_v5, 16  ;;  %v312_v14 = vshrl.u32 %v2626_v5, 16  ;;  %v2630_v19 = vld [vmem:[%s2722_s21 + $0x18] sm:$0xff]   ;;  %v2631_v25 = vld [vmem:[%s2722_s21 + $0x20] sm:$0xff]  }
  0x13   : > { %2542 = vmatpush3.bf16.msra.mxu1 %v2628_v3  ;;  %2407 = vmatprep.mubr.msk.bf16.mxu1 %vm2673_vm0, %v2672_v1  ;;  %v316_v15 = vshll.u32 %v2629_v9, 16  ;;  %v320_v21 = vshrl.u32 %v2629_v9, 16  ;;  %v324_v22 = vshll.u32 %v2630_v19, 16  ;;  %v328_v27 = vshrl.u32 %v2630_v19, 16  ;;  %v2632_v31 = vld [vmem:[%s2722_s21 + $0x28] sm:$0xff]   ;;  %v2633_v37 = vld [vmem:[%s2722_s21 + $0x30] sm:$0xff]  }
  0x14   : > { %v305_v10 = vrot.slane %v303_v7, 1  ;;  %v310_v11 = vrot.slane %v308_v8, 1  ;;  %v332_v28 = vshll.u32 %v2631_v25, 16  ;;  %v336_v33 = vshrl.u32 %v2631_v25, 16  ;;  %v2634_v43 = vld [vmem:[%s2722_s21 + $0x38] sm:$0xff]   ;;  %v2635_v49 = vld [vmem:[%s2722_s21 + $0x40] sm:$0xff]  }
  0x15   : > { %v318_v18 = vrot.slane %v316_v15, 1  ;;  %v326_v24 = vrot.slane %v324_v22, 1  ;;  %v340_v34 = vshll.u32 %v2632_v31, 16  ;;  %v344_v39 = vshrl.u32 %v2632_v31, 16  ;;  %v2636_v55 = vld [vmem:[%s2722_s21 + $0x48] sm:$0xff]   ;;  %v2637_v61 = vld [vmem:[%s2722_s21 + $0x50] sm:$0xff]  }
  0x16   : > { %v306_v13 = vor.u32 %v305_v10, %v301_v6  ;;  %v314_v17 = vor.u32 %v312_v14, %v310_v11  ;;  %v334_v30 = vrot.slane %v332_v28, 1  ;;  %v348_v40 = vshll.u32 %v2633_v37, 16  ;;  %v2638_v4 = vld [vmem:[%s2722_s21 + $0x58] sm:$0xff]   ;;  %v2639_v10 = vld [vmem:[%s2722_s21 + $0x60] sm:$0xff]   ;;  %v2641_v22 = vld [vmem:[%s2722_s21 + $0x70] sm:$0xff]  }
  0x17   : > { %v322_v23 = vor.u32 %v320_v21, %v318_v18  ;;  %v330_v29 = vor.u32 %v328_v27, %v326_v24  ;;  %v342_v36 = vrot.slane %v340_v34, 1  ;;  %v352_v45 = vshrl.u32 %v2633_v37, 16  ;;  %v2642_v28 = vld [vmem:[%s2722_s21 + $0x78] sm:$0xff]   ;;  %v2643_v34 = vld [vmem:[%s2722_s21 + $0x80] sm:$0xff]  }
  0x18   : > { %v311_v16 = vsel %vm299_vm2, %v306_v13, %v310_v11  ;;  %v319_v20 = vsel %vm299_vm2, %v314_v17, %v318_v18  ;;  %v338_v35 = vor.u32 %v336_v33, %v334_v30  ;;  %v350_v42 = vrot.slane %v348_v40, 1  ;;  %v2644_v40 = vld [vmem:[%s2722_s21 + $0x88] ss:$0 sps:$4 sm:$0x11]  }
  0x19   : > { %2334 = vmatmul.mubr.msk.bf16.vlgmr.msra.gmra.mrb[0].mxu0 %vm446_vm1, %v311_v16  ;;  %v327_v26 = vsel %vm299_vm2, %v322_v23, %v326_v24  ;;  %v335_v32 = vsel %vm299_vm2, %v330_v29, %v334_v30  ;;  %v346_v41 = vor.u32 %v344_v39, %v342_v36  ;;  %v356_v46 = vshll.u32 %v2634_v43, 16  ;;  %v2640_v16 = vld [vmem:[%s2722_s21 + $0x68] sm:$0xff]  }
  0x1a   : > { %2472 = vmatpush3.bf16.msra.mxu0 %v2627_v12  ;;  %2337 = vmatprep.mubr.msk.bf16.mxu0 %vm2673_vm0, %v2672_v1  ;;  %v343_v38 = vsel %vm299_vm2, %v338_v35, %v342_v36  ;;  %v354_v47 = vor.u32 %v352_v45, %v350_v42  ;;  %v360_v51 = vshrl.u32 %v2634_v43, 16  ;;  %v364_v52 = vshll.u32 %v2635_v49, 16 }
  0x1b   : > { %2408 = vmatmul.mubr.msk.bf16.gmra.mrb[4].mxu1 %vm446_vm1, %v2626_v5  ;;  %v351_v44 = vsel %vm299_vm2, %v346_v41, %v350_v42  ;;  %v358_v48 = vrot.slane %v356_v46, 1  ;;  %v368_v57 = vshrl.u32 %v2635_v49, 16  ;;  %v372_v58 = vshll.u32 %v2636_v55, 16  ;;  %v876_v41 = vld [vmem:[%s2722_s21 + $0x8] sm:$0xf] }
  0x1c   : > { %2411 = vmatprep.mubr.msk.bf16.mxu1 %vm2673_vm0, %v2672_v1  ;;  %v366_v54 = vrot.slane %v364_v52, 1  ;;  %v376_v63 = vshrl.u32 %v2636_v55, 16  ;;  %v380_v0 = vshll.u32 %v2637_v61, 16  ;;  %v384_v6 = vshrl.u32 %v2637_v61, 16  ;;  %v877_v42 = vld [vmem:[%s2722_s21 + $0xc] sm:$0xf] }
  0x1d   : > { %v359_v50 = vsel %vm299_vm2, %v354_v47, %v358_v48  ;;  %v362_v53 = vor.u32 %v360_v51, %v358_v48  ;;  %v374_v60 = vrot.slane %v372_v58, 1  ;;  %v388_v7 = vshll.u32 %v2638_v4, 16  ;;  %v2646_v48 = vld [vmem:[%s2722_s21 + $0x10] sm:$0xff]  }
  0x1e   : > { %v370_v59 = vor.u32 %v368_v57, %v366_v54  ;;  %v382_v3 = vrot.slane %v380_v0, 1  ;;  %v392_v12 = vshrl.u32 %v2638_v4, 16  ;;  %v396_v13 = vshll.u32 %v2639_v10, 16 }
  0x1f   : > { %v367_v56 = vsel %vm299_vm2, %v362_v53, %v366_v54  ;;  %v378_v2 = vor.u32 %v376_v63, %v374_v60  ;;  %v400_v18 = vshrl.u32 %v2639_v10, 16  ;;  %v408_v24 = vshrl.u32 %v2640_v16, 16 }
  0x20   : > { %v375_v62 = vsel %vm299_vm2, %v370_v59, %v374_v60  ;;  %v386_v8 = vor.u32 %v384_v6, %v382_v3  ;;  %v398_v15 = vrot.slane %v396_v13, 1  ;;  %v416_v30 = vshrl.u32 %v2641_v22, 16  ;;  %v2648_v60 = vld [vmem:[%s2722_s21 + $0x18] sm:$0xff]   ;;  %v2650_v13 = vld [vmem:[%s2722_s21 + $0x28] sm:$0xff]  }
  0x21   : > { %2338 = vmatmul.mubr.msk.bf16.gmra.mrb[4].mxu0 %vm446_vm1, %v319_v20  ;;  %v383_v5 = vsel %vm299_vm2, %v378_v2, %v382_v3  ;;  %v424_v36 = vshrl.u32 %v2642_v28, 16  ;;  %v432_v45 = vshrl.u32 %v2643_v34, 16  ;;  %v436_v46 = vshll.u32 %v2644_v40, 16 }
  0x22   : > { %2341 = vmatprep.mubr.msk.bf16.mxu0 %vm2673_vm0, %v2672_v1  ;;  %v402_v20 = vor.u32 %v400_v18, %v398_v15  ;;  %v2133_v47 = vcombine.low %v876_v41, %v877_v42  ;;  %v1409_v54 = vrot.slane %v2646_v48, 1  ;;  %v1009_v58 = vshll.u32 %v2646_v48, 16 }
  0x23   : > { %2412 = vmatmul.mubr.msk.bf16.gmra.mrb[8].mxu1 %vm446_vm1, %v2629_v9  ;;  %v390_v9 = vrot.slane %v388_v7, 1  ;;  %v438_v51 = vrot.slane %v436_v46, 1  ;;  %v1411_v63 = vrot.slane %v2648_v60, 1  ;;  %v1013_v2 = vshrl.u32 %v2646_v48, 16 }
  0x24   : > { %2415 = vmatprep.mubr.msk.bf16.mxu1 %vm2673_vm0, %v2672_v1  ;;  %v1004_v52 = vshll.u32 %v2133_v47, 16  ;;  %v1017_v3 = vshll.u32 %v2648_v60, 16 }
  0x25   : > { %v391_v11 = vsel %vm299_vm2, %v386_v8, %v390_v9  ;;  %v394_v14 = vor.u32 %v392_v12, %v390_v9 }
  0x26   : > { %v1006_v57 = vrot.slane %v1004_v52, 1  ;;  %v1019_v7 = vrot.slane %v1017_v3, 1 }
  0x27   : > { %v399_v17 = vsel %vm299_vm2, %v394_v14, %v398_v15 }
  0x29   : > { %2342 = vmatmul.mubr.msk.bf16.gmra.mrb[8].mxu0 %vm446_vm1, %v327_v26 }
  0x2a   : > { %2345 = vmatprep.mubr.msk.bf16.mxu0 %vm2673_vm0, %v2672_v1 }
  0x2b   : > { %2416 = vmatmul.mubr.msk.bf16.gmra.mrb[12].mxu1 %vm446_vm1, %v2630_v19  ;;  %v404_v19 = vshll.u32 %v2640_v16, 16 }
  0x2c   : > { %2419 = vmatprep.mubr.msk.bf16.mxu1 %vm2673_vm0, %v2672_v1 }
  0x2d   : > { %v406_v21 = vrot.slane %v404_v19, 1  ;;  %v1033_v19 = vshll.u32 %v2650_v13, 16 }
  0x2f   : > { %v407_v23 = vsel %vm299_vm2, %v402_v20, %v406_v21  ;;  %v410_v26 = vor.u32 %v408_v24, %v406_v21  ;;  %v2651_v21 = vld [vmem:[%s2722_s21 + $0x30] sm:$0xff]  }
  0x30   : > { %v1417_v24 = vrot.slane %v2651_v21, 1 }
  0x31   : > { %2346 = vmatmul.mubr.msk.bf16.gmra.mrb[12].mxu0 %vm446_vm1, %v335_v32 }
  0x32   : > { %2349 = vmatprep.mubr.msk.bf16.mxu0 %vm2673_vm0, %v2672_v1 }
  0x33   : > { %2420 = vmatmul.mubr.msk.bf16.gmra.mrb[16].mxu1 %vm446_vm1, %v2631_v25  ;;  %v412_v25 = vshll.u32 %v2641_v22, 16 }
  0x34   : > { %2423 = vmatprep.mubr.msk.bf16.mxu1 %vm2673_vm0, %v2672_v1 }
  0x35   : > { %v414_v27 = vrot.slane %v412_v25, 1 }
  0x37   : > { %v415_v29 = vsel %vm299_vm2, %v410_v26, %v414_v27  ;;  %v418_v32 = vor.u32 %v416_v30, %v414_v27  ;;  %v1037_v26 = vshrl.u32 %v2650_v13, 16  ;;  %v1041_v27 = vshll.u32 %v2651_v21, 16 }
  0x39   : > { %2350 = vmatmul.mubr.msk.bf16.gmra.mrb[16].mxu0 %vm446_vm1, %v343_v38 }
  0x3a   : > { %2353 = vmatprep.mubr.msk.bf16.mxu0 %vm2673_vm0, %v2672_v1 }
  0x3b   : > { %2424 = vmatmul.mubr.msk.bf16.gmra.mrb[20].mxu1 %vm446_vm1, %v2632_v31  ;;  %v420_v31 = vshll.u32 %v2642_v28, 16 }
  0x3c   : > { %2427 = vmatprep.mubr.msk.bf16.mxu1 %vm2673_vm0, %v2672_v1 }
  0x3d   : > { %v422_v33 = vrot.slane %v420_v31, 1  ;;  %v1043_v31 = vrot.slane %v1041_v27, 1 }
  0x3f   : > { %v423_v35 = vsel %vm299_vm2, %v418_v32, %v422_v33  ;;  %v426_v38 = vor.u32 %v424_v36, %v422_v33 }
  0x41   : > { %2354 = vmatmul.mubr.msk.bf16.gmra.mrb[20].mxu0 %vm446_vm1, %v351_v44 }
  0x42   : > { %2357 = vmatprep.mubr.msk.bf16.mxu0 %vm2673_vm0, %v2672_v1 }
  0x43   : > { %2428 = vmatmul.mubr.msk.bf16.gmra.mrb[24].mxu1 %vm446_vm1, %v2633_v37  ;;  %v428_v37 = vshll.u32 %v2643_v34, 16 }
  0x44   : > { %2431 = vmatprep.mubr.msk.bf16.mxu1 %vm2673_vm0, %v2672_v1 }
  0x45   : > { %v430_v39 = vrot.slane %v428_v37, 1  ;;  %v2653_v37 = vld [vmem:[%s2722_s21 + $0x40] sm:$0xff]  }
  0x46   : > { %v1421_v40 = vrot.slane %v2653_v37, 1 }
  0x47   : > { %v431_v44 = vsel %vm299_vm2, %v426_v38, %v430_v39 }
  0x49   : > { %2358 = vmatmul.mubr.msk.bf16.gmra.mrb[24].mxu0 %vm446_vm1, %v359_v50  ;;  %v434_v50 = vor.u32 %v432_v45, %v430_v39  ;;  %v2654_v45 = vld [vmem:[%s2722_s21 + $0x48] sm:$0xff]  }
  0x4a   : > { %2361 = vmatprep.mubr.msk.bf16.mxu0 %vm2673_vm0, %v2672_v1  ;;  %v1423_v48 = vrot.slane %v2654_v45, 1 }
  0x4b   : > { %2432 = vmatmul.mubr.msk.bf16.gmra.mrb[28].mxu1 %vm446_vm1, %v2634_v43  ;;  %v1401_v43 = vld [vmem:[%s2722_s21 + $0x8] sm:$0xe] }
  0x4c   : > { %2435 = vmatprep.mubr.msk.bf16.mxu1 %vm2673_vm0, %v2672_v1  ;;  %v1424_v52 = vsel %vm1407_vm3, %v1421_v40, %v1423_v48 }
  0x51   : > { %2362 = vmatmul.mubr.msk.bf16.gmra.mrb[28].mxu0 %vm446_vm1, %v367_v56  ;;  %v1002_v56 = vshrl.u32 %v2133_v47, 16 }
  0x52   : > { %2365 = vmatprep.mubr.msk.bf16.mxu0 %vm2673_vm0, %v2672_v1 }
  0x53   : > { %2436 = vmatmul.mubr.msk.bf16.gmra.mrb[32].mxu1 %vm446_vm1, %v2635_v49  ;;  %v2169_v49 = vcombine.low %v1401_v43, %v877_v42  ;;  %v1057_v43 = vshll.u32 %v2653_v37, 16 }
  0x54   : > { %2439 = vmatprep.mubr.msk.bf16.mxu1 %vm2673_vm0, %v2672_v1 }
  0x55   : > { %v1408_v53 = vrot.slane %v2169_v49, 1  ;;  %v1059_v47 = vrot.slane %v1057_v43, 1 }
  0x57   : > { %v1410_v59 = vsel %vm1407_vm3, %v1408_v53, %v1409_v54  ;;  %v2655_v53 = vld [vmem:[%s2722_s21 + $0x50] sm:$0xff]  }
  0x58   : > { %v1077_v3 = vshrl.u32 %v2655_v53, 16 }
  0x59   : > { %2366 = vmatmul.mubr.msk.bf16.gmra.mrb[32].mxu0 %vm446_vm1, %v375_v62  ;;  %v1011_v62 = vrot.slane %v1009_v58, 1  ;;  %v1069_v58 = vshrl.u32 %v2654_v45, 16 }
  0x5a   : > { %2369 = vmatprep.mubr.msk.bf16.mxu0 %vm2673_vm0, %v2672_v1 }
  0x5b   : > { %2440 = vmatmul.mubr.msk.bf16.gmra.mrb[36].mxu1 %vm446_vm1, %v2636_v55  ;;  %v439_v55 = vsel %vm299_vm2, %v434_v50, %v438_v51  ;;  %v1015_v6 = vor.u32 %v1013_v2, %v1011_v62  ;;  %v1061_v50 = vshrl.u32 %v2653_v37, 16  ;;  %v1065_v51 = vshll.u32 %v2654_v45, 16 }
  0x5c   : > { %2443 = vmatprep.mubr.msk.bf16.mxu1 %vm2673_vm0, %v2672_v1 }
  0x5d   : > { %v1020_v9 = vsel %vm299_vm2, %v1015_v6, %v1019_v7  ;;  %v2657_v6 = vld [vmem:[%s2722_s21 + $0x60] sm:$0xff]  }
  0x61   : > { %2370 = vmatmul.mubr.msk.bf16.gmra.mrb[36].mxu0 %vm446_vm1, %v383_v5  ;;  %v2649_v5 = vld [vmem:[%s2722_s21 + $0x20] sm:$0xff]  }
  0x62   : > { %2373 = vmatprep.mubr.msk.bf16.mxu0 %vm2673_vm0, %v2672_v1  ;;  %v1413_v8 = vrot.slane %v2649_v5, 1  ;;  %v1029_v18 = vshrl.u32 %v2649_v5, 16 }
  0x63   : > { %2444 = vmatmul.mubr.msk.bf16.gmra.mrb[40].mxu1 %vm446_vm1, %v2637_v61  ;;  %v1007_v61 = vor.u32 %v1006_v57, %v1002_v56  ;;  %v1425_v56 = vrot.slane %v2655_v53, 1 }
  0x64   : > { %2447 = vmatprep.mubr.msk.bf16.mxu1 %vm2673_vm0, %v2672_v1  ;;  %v1414_v12 = vsel %vm1407_vm3, %v1411_v63, %v1413_v8 }
  0x65   : > { %v1012_v0 = vsel %vm299_vm2, %v1007_v61, %v1011_v62  ;;  %v2656_v61 = vld [vmem:[%s2722_s21 + $0x58] sm:$0xff]  }
  0x69   : > { %2374 = vmatmul.mubr.msk.bf16.gmra.mrb[40].mxu0 %vm446_vm1, %v391_v11  ;;  %v1025_v11 = vshll.u32 %v2649_v5, 16 }
  0x6a   : > { %2377 = vmatprep.mubr.msk.bf16.mxu0 %vm2673_vm0, %v2672_v1 }
  0x6b   : > { %2448 = vmatmul.mubr.msk.bf16.gmra.mrb[44].mxu1 %vm446_vm1, %v2638_v4  ;;  %v1412_v4 = vsel %vm1407_vm3, %v1409_v54, %v1411_v63  ;;  %v1027_v15 = vrot.slane %v1025_v11, 1  ;;  %v1063_v54 = vor.u32 %v1061_v50, %v1059_v47 }
  0x6c   : > { %2451 = vmatprep.mubr.msk.bf16.mxu1 %vm2673_vm0, %v2672_v1 }
  0x71   : > { %2378 = vmatmul.mubr.msk.bf16.gmra.mrb[44].mxu0 %vm446_vm1, %v399_v17 }
  0x72   : > { %2381 = vmatprep.mubr.msk.bf16.mxu0 %vm2673_vm0, %v2672_v1 }
  0x73   : > { %2452 = vmatmul.mubr.msk.bf16.gmra.mrb[48].mxu1 %vm446_vm1, %v2639_v10  ;;  %v1021_v10 = vshrl.u32 %v2648_v60, 16  ;;  %v1426_v60 = vsel %vm1407_vm3, %v1423_v48, %v1425_v56 }
  0x74   : > { %2455 = vmatprep.mubr.msk.bf16.mxu1 %vm2673_vm0, %v2672_v1 }
  0x75   : > { %v1023_v14 = vor.u32 %v1021_v10, %v1019_v7 }
  0x77   : > { %v1028_v17 = vsel %vm299_vm2, %v1023_v14, %v1027_v15  ;;  %v1089_v14 = vshll.u32 %v2657_v6, 16 }
  0x79   : > { %2382 = vmatmul.mubr.msk.bf16.gmra.mrb[48].mxu0 %vm446_vm1, %v407_v23  ;;  %v1035_v23 = vrot.slane %v1033_v19, 1 }
  0x7a   : > { %2385 = vmatprep.mubr.msk.bf16.mxu0 %vm2673_vm0, %v2672_v1 }
  0x7b   : > { %2456 = vmatmul.mubr.msk.bf16.gmra.mrb[52].mxu1 %vm446_vm1, %v2640_v16  ;;  %v1415_v16 = vrot.slane %v2650_v13, 1  ;;  %v1039_v30 = vor.u32 %v1037_v26, %v1035_v23  ;;  %v1085_v13 = vshrl.u32 %v2656_v61, 16 }
  0x7c   : > { %2459 = vmatprep.mubr.msk.bf16.mxu1 %vm2673_vm0, %v2672_v1 }
  0x7d   : > { %v1416_v20 = vsel %vm1407_vm3, %v1413_v8, %v1415_v16  ;;  %v1044_v33 = vsel %vm299_vm2, %v1039_v30, %v1043_v31 }
  0x81   : > { %2386 = vmatmul.mubr.msk.bf16.gmra.mrb[52].mxu0 %vm446_vm1, %v415_v29  ;;  %v2652_v29 = vld [vmem:[%s2722_s21 + $0x38] sm:$0xff]  }
  0x82   : > { %2389 = vmatprep.mubr.msk.bf16.mxu0 %vm2673_vm0, %v2672_v1  ;;  %v1419_v32 = vrot.slane %v2652_v29, 1  ;;  %v1053_v42 = vshrl.u32 %v2652_v29, 16 }
  0x83   : > { %2460 = vmatmul.mubr.msk.bf16.gmra.mrb[56].mxu1 %vm446_vm1, %v2641_v22  ;;  %v1031_v22 = vor.u32 %v1029_v18, %v1027_v15  ;;  %v2658_v18 = vld [vmem:[%s2722_s21 + $0x68] sm:$0xff]  }
  0x84   : > { %2463 = vmatprep.mubr.msk.bf16.mxu1 %vm2673_vm0, %v2672_v1  ;;  %v1420_v36 = vsel %vm1407_vm3, %v1417_v24, %v1419_v32 }
  0x85   : > { %v1036_v25 = vsel %vm299_vm2, %v1031_v22, %v1035_v23  ;;  %v1431_v22 = vrot.slane %v2658_v18, 1 }
  0x89   : > { %2390 = vmatmul.mubr.msk.bf16.gmra.mrb[56].mxu0 %vm446_vm1, %v423_v35  ;;  %v1049_v35 = vshll.u32 %v2652_v29, 16  ;;  %v1097_v29 = vshll.u32 %v2658_v18, 16 }
  0x8a   : > { %2393 = vmatprep.mubr.msk.bf16.mxu0 %vm2673_vm0, %v2672_v1 }
  0x8b   : > { %2464 = vmatmul.mubr.msk.bf16.gmra.mrb[60].mxu1 %vm446_vm1, %v2642_v28  ;;  %v1418_v28 = vsel %vm1407_vm3, %v1415_v16, %v1417_v24  ;;  %v1051_v39 = vrot.slane %v1049_v35, 1  ;;  %v2659_v35 = vld [vmem:[%s2722_s21 + $0x70] sm:$0xff]  }
  0x8c   : > { %2467 = vmatprep.mubr.msk.bf16.mxu1 %vm2673_vm0, %v2672_v1 }
  0x8d   : > { %v1055_v46 = vor.u32 %v1053_v42, %v1051_v39 }
  0x8f   : > { %v1060_v49 = vsel %vm299_vm2, %v1055_v46, %v1059_v47  ;;  %v1101_v46 = vshrl.u32 %v2658_v18, 16  ;;  %v1105_v47 = vshll.u32 %v2659_v35, 16 }
  0x91   : > { %2394 = vmatmul.mubr.msk.bf16.gmra.mrb[60].mxu0 %vm446_vm1, %v431_v44  ;;  %v1422_v44 = vsel %vm1407_vm3, %v1419_v32, %v1421_v40  ;;  %v1433_v40 = vrot.slane %v2659_v35, 1 }
  0x92   : > { %2397 = vmatprep.mubr.msk.bf16.mxu0 %vm2673_vm0, %v2672_v1 }
  0x93   : > { %2468 = vmatmul.mubr.msk.bf16.gmra.mrb[64].mxu1 %vm446_vm1, %v2643_v34  ;;  %v1045_v34 = vshrl.u32 %v2651_v21, 16 }
  0x94   : > { %2543 = vmatprep.mubr.msk.bf16.mxu1 %vm2673_vm0, %v2672_v1 }
  0x95   : > { %v1047_v38 = vor.u32 %v1045_v34, %v1043_v31 }
  0x97   : > { %v1052_v41 = vsel %vm299_vm2, %v1047_v38, %v1051_v39  ;;  %v1099_v38 = vrot.slane %v1097_v29, 1 }
  0x99   : > { %2398 = vmatmul.mubr.msk.bf16.gmra.mrb[64].mxu0 %vm446_vm1, %v439_v55  ;;  %v1067_v55 = vrot.slane %v1065_v51, 1 }
  0x9a   : > { %2473 = vmatprep.mubr.msk.bf16.mxu0 %vm2673_vm0, %v2672_v1 }
  0x9b   : > { %2544 = vmatmul.mubr.msk.bf16.vlgmr.msra.gmra.mrb[68].mxu1 %vm446_vm1, %v1410_v59  ;;  %v1068_v57 = vsel %vm299_vm2, %v1063_v54, %v1067_v55  ;;  %v1073_v59 = vshll.u32 %v2655_v53, 16  ;;  %v1071_v62 = vor.u32 %v1069_v58, %v1067_v55  ;;  %v2660_v53 = vld [vmem:[%s2722_s21 + $0x78] sm:$0xff]   ;;  %v1103_v55 = vor.u32 %v1101_v46, %v1099_v38 }
  0x9c   : > { %2547 = vmatprep.mubr.msk.bf16.mxu1 %vm2673_vm0, %v2672_v1  ;;  %v1435_v58 = vrot.slane %v2660_v53, 1 }
  0x9d   : > { %v1075_v63 = vrot.slane %v1073_v59, 1 }
  0x9f   : > { %v1076_v2 = vsel %vm299_vm2, %v1071_v62, %v1075_v63  ;;  %v1079_v7 = vor.u32 %v1077_v3, %v1075_v63 }
  0xa1   : > { %2474 = vmatmul.mubr.msk.bf16.vlgmr.msra.gmra.mrb[68].mxu0 %vm446_vm1, %v1012_v0  ;;  %v1427_v0 = vrot.slane %v2656_v61, 1 }
  0xa2   : > { %2477 = vmatprep.mubr.msk.bf16.mxu0 %vm2673_vm0, %v2672_v1 }
  0xa3   : > { %2548 = vmatmul.mubr.msk.bf16.gmra.mrb[72].mxu1 %vm446_vm1, %v1412_v4  ;;  %v1081_v4 = vshll.u32 %v2656_v61, 16  ;;  %v1428_v5 = vsel %vm1407_vm3, %v1425_v56, %v1427_v0  ;;  %v1107_v56 = vrot.slane %v1105_v47, 1  ;;  %v2663_v47 = vld [vmem:[%s2722_s21 + $0x90] ss:$0 sps:$4 sm:$0x11]  }
  0xa4   : > { %2551 = vmatprep.mubr.msk.bf16.mxu1 %vm2673_vm0, %v2672_v1 }
  0xa5   : > { %v1083_v8 = vrot.slane %v1081_v4, 1  ;;  %v1108_v62 = vsel %vm299_vm2, %v1103_v55, %v1107_v56 }
  0xa7   : > { %v1084_v11 = vsel %vm299_vm2, %v1079_v7, %v1083_v8  ;;  %v1087_v19 = vor.u32 %v1085_v13, %v1083_v8  ;;  %v1436_v7 = vsel %vm1407_vm3, %v1433_v40, %v1435_v58  ;;  %v2661_v8 = vld [vmem:[%s2722_s21 + $0x80] sm:$0xff]  }
  0xa8   : > { %v1437_v13 = vrot.slane %v2661_v8, 1 }
  0xa9   : > { %2478 = vmatmul.mubr.msk.bf16.gmra.mrb[72].mxu0 %vm446_vm1, %v1020_v9  ;;  %v1429_v9 = vrot.slane %v2657_v6, 1 }
  0xaa   : > { %2481 = vmatprep.mubr.msk.bf16.mxu0 %vm2673_vm0, %v2672_v1 }
  0xab   : > { %2552 = vmatmul.mubr.msk.bf16.gmra.mrb[76].mxu1 %vm446_vm1, %v1414_v12  ;;  %v1432_v34 = vsel %vm1407_vm3, %v1429_v9, %v1431_v22 }
  0xac   : > { %2555 = vmatprep.mubr.msk.bf16.mxu1 %vm2673_vm0, %v2672_v1 }
  0xb1   : > { %2482 = vmatmul.mubr.msk.bf16.gmra.mrb[76].mxu0 %vm446_vm1, %v1028_v17  ;;  %v1430_v17 = vsel %vm1407_vm3, %v1427_v0, %v1429_v9  ;;  %v1109_v0 = vshrl.u32 %v2659_v35, 16 }
  0xb2   : > { %2485 = vmatprep.mubr.msk.bf16.mxu0 %vm2673_vm0, %v2672_v1 }
  0xb3   : > { %2556 = vmatmul.mubr.msk.bf16.gmra.mrb[80].mxu1 %vm446_vm1, %v1416_v20  ;;  %v1091_v20 = vrot.slane %v1089_v14, 1 }
  0xb4   : > { %2559 = vmatprep.mubr.msk.bf16.mxu1 %vm2673_vm0, %v2672_v1 }
  0xb5   : > { %v1092_v26 = vsel %vm299_vm2, %v1087_v19, %v1091_v20  ;;  %v1117_v19 = vshrl.u32 %v2660_v53, 16 }
  0xb9   : > { %2486 = vmatmul.mubr.msk.bf16.gmra.mrb[80].mxu0 %vm446_vm1, %v1036_v25 }
  0xba   : > { %2489 = vmatprep.mubr.msk.bf16.mxu0 %vm2673_vm0, %v2672_v1 }
  0xbb   : > { %2560 = vmatmul.mubr.msk.bf16.gmra.mrb[84].mxu1 %vm446_vm1, %v1418_v28  ;;  %v1093_v28 = vshrl.u32 %v2657_v6, 16 }
  0xbc   : > { %2563 = vmatprep.mubr.msk.bf16.mxu1 %vm2673_vm0, %v2672_v1 }
  0xbd   : > { %v1095_v37 = vor.u32 %v1093_v28, %v1091_v20  ;;  %v1121_v20 = vshll.u32 %v2661_v8, 16 }
  0xc1   : > { %2490 = vmatmul.mubr.msk.bf16.gmra.mrb[84].mxu0 %vm446_vm1, %v1044_v33 }
  0xc2   : > { %2493 = vmatprep.mubr.msk.bf16.mxu0 %vm2673_vm0, %v2672_v1 }
  0xc3   : > { %2564 = vmatmul.mubr.msk.bf16.gmra.mrb[88].mxu1 %vm446_vm1, %v1420_v36 }
  0xc4   : > { %2567 = vmatprep.mubr.msk.bf16.mxu1 %vm2673_vm0, %v2672_v1 }
  0xc9   : > { %2494 = vmatmul.mubr.msk.bf16.gmra.mrb[88].mxu0 %vm446_vm1, %v1052_v41 }
  0xca   : > { %2497 = vmatprep.mubr.msk.bf16.mxu0 %vm2673_vm0, %v2672_v1 }
  0xcb   : > { %2568 = vmatmul.mubr.msk.bf16.gmra.mrb[92].mxu1 %vm446_vm1, %v1422_v44  ;;  %v1100_v44 = vsel %vm299_vm2, %v1095_v37, %v1099_v38 }
  0xcc   : > { %2571 = vmatprep.mubr.msk.bf16.mxu1 %vm2673_vm0, %v2672_v1 }
  0xd1   : > { %2498 = vmatmul.mubr.msk.bf16.gmra.mrb[92].mxu0 %vm446_vm1, %v1060_v49 }
  0xd2   : > { %2501 = vmatprep.mubr.msk.bf16.mxu0 %vm2673_vm0, %v2672_v1 }
  0xd3   : > { %2572 = vmatmul.mubr.msk.bf16.gmra.mrb[96].mxu1 %vm446_vm1, %v1424_v52  ;;  %v1434_v52 = vsel %vm1407_vm3, %v1431_v22, %v1433_v40 }
  0xd4   : > { %2575 = vmatprep.mubr.msk.bf16.mxu1 %vm2673_vm0, %v2672_v1 }
  0xd9   : > { %2502 = vmatmul.mubr.msk.bf16.gmra.mrb[96].mxu0 %vm446_vm1, %v1068_v57 }
  0xda   : > { %2505 = vmatprep.mubr.msk.bf16.mxu0 %vm2673_vm0, %v2672_v1 }
  0xdb   : > { %2576 = vmatmul.mubr.msk.bf16.gmra.mrb[100].mxu1 %vm446_vm1, %v1426_v60 }
  0xdc   : > { %2579 = vmatprep.mubr.msk.bf16.mxu1 %vm2673_vm0, %v2672_v1 }
  0xe1   : > { %2506 = vmatmul.mubr.msk.bf16.gmra.mrb[100].mxu0 %vm446_vm1, %v1076_v2  ;;  %v1113_v2 = vshll.u32 %v2660_v53, 16  ;;  %v1441_v53 = vrot.slane %v2663_v47, 1 }
  0xe2   : > { %2509 = vmatprep.mubr.msk.bf16.mxu0 %vm2673_vm0, %v2672_v1 }
  0xe3   : > { %2580 = vmatmul.mubr.msk.bf16.gmra.mrb[104].mxu1 %vm446_vm1, %v1428_v5 }
  0xe4   : > { %2583 = vmatprep.mubr.msk.bf16.mxu1 %vm2673_vm0, %v2672_v1 }
  0xe5   : > { %v741_v10 = vpop.f32.mrb[0].mxu1 }
  0xe6   : > { %v2405_v12 = vpop.f32.mrb[1].mxu1 }
  0xe7   : > { %v744_v15 = vpop.f32.mrb[2].mxu1 }
  0xe8   : > { %v2406_v16 = vpop.f32.mrb[3].mxu1 }
  0xe9   : > { %2510 = vmatmul.mubr.msk.bf16.gmra.mrb[104].mxu0 %vm446_vm1, %v1084_v11  ;;  %v1115_v11 = vrot.slane %v1113_v2, 1 }
  0xea   : > { %2513 = vmatprep.mubr.msk.bf16.mxu0 %vm2673_vm0, %v2672_v1 }
  0xeb   : > { %2584 = vmatmul.mubr.msk.bf16.gmra.mrb[108].mxu1 %vm446_vm1, %v1430_v17  ;;  %v1119_v29 = vor.u32 %v1117_v19, %v1115_v11 }
  0xec   : > { %v532_v21 = vpop.f32.mrb[0].mxu0  ;;  %2587 = vmatprep.mubr.msk.bf16.mxu1 %vm2673_vm0, %v2672_v1 }
  0xed   : > { %v2966_v23 = vadd.f32 %v741_v10, %v532_v21  ;;  %v2335_v24 = vpop.f32.mrb[1].mxu0  ;;  %v1111_v10 = vor.u32 %v1109_v0, %v1107_v56 }
  0xee   : > { %v535_v25 = vpop.f32.mrb[2].mxu0  ;;  %v749_v27 = vpop.f32.mrb[4].mxu1 }
  0xef   : > { %v2969_v30 = vadd.f32 %v744_v15, %v535_v25  ;;  %v2336_v31 = vpop.f32.mrb[3].mxu0  ;;  %v2409_v32 = vpop.f32.mrb[5].mxu1  ;;  %v1116_v17 = vsel %vm299_vm2, %v1111_v10, %v1115_v11 }
  0xf0   : > { %v752_v33 = vpop.f32.mrb[6].mxu1  ;;  %v1123_v31 = vrot.slane %v1121_v20, 1 }
  0xf1   : > { %2514 = vmatmul.mubr.msk.bf16.gmra.mrb[108].mxu0 %vm446_vm1, %v1092_v26  ;;  %v2410_v36 = vpop.f32.mrb[7].mxu1  ;;  %v1438_v26 = vsel %vm1407_vm3, %v1435_v58, %v1437_v13 }
  0xf2   : > { %2517 = vmatprep.mubr.msk.bf16.mxu0 %vm2673_vm0, %v2672_v1  ;;  %v1124_v37 = vsel %vm299_vm2, %v1119_v29, %v1123_v31 }
  0xf3   : > { %2588 = vmatmul.mubr.msk.bf16.gmra.mrb[112].mxu1 %vm446_vm1, %v1432_v34 }
  0xf4   : > { %v540_v39 = vpop.f32.mrb[4].mxu0  ;;  %2591 = vmatprep.mubr.msk.bf16.mxu1 %vm2673_vm0, %v2672_v1 }
  0xf5   : > { %v2979_v41 = vadd.f32 %v749_v27, %v540_v39  ;;  %v2339_v42 = vpop.f32.mrb[5].mxu0  ;;  %v2662_v27 = vld [vmem:[%s2722_s21 + $0x88] sm:$0xff]   ;;  %v1125_v39 = vshrl.u32 %v2661_v8, 16 }
  0xf6   : > { %v543_v43 = vpop.f32.mrb[6].mxu0  ;;  %v757_v45 = vpop.f32.mrb[8].mxu1  ;;  %v1129_v40 = vshll.u32 %v2662_v27, 16 }
  0xf7   : > { %v2982_v48 = vadd.f32 %v752_v33, %v543_v43  ;;  %v2340_v49 = vpop.f32.mrb[7].mxu0  ;;  %v2413_v50 = vpop.f32.mrb[9].mxu1  ;;  %v1439_v33 = vrot.slane %v2662_v27, 1 }
  0xf8   : > { %v760_v51 = vpop.f32.mrb[10].mxu1  ;;  %v1127_v50 = vor.u32 %v1125_v39, %v1123_v31 }
  0xf9   : > { %2518 = vmatmul.mubr.msk.bf16.gmra.mrb[112].mxu0 %vm446_vm1, %v1100_v44  ;;  %v2414_v54 = vpop.f32.mrb[11].mxu1  ;;  %v1440_v46 = vsel %vm1407_vm3, %v1437_v13, %v1439_v33 }
  0xfa   : > { %2521 = vmatprep.mubr.msk.bf16.mxu0 %vm2673_vm0, %v2672_v1 }
  0xfb   : > { %2592 = vmatmul.mubr.msk.bf16.gmra.mrb[116].mxu1 %vm446_vm1, %v1434_v52 }
  0xfc   : > { %v548_v57 = vpop.f32.mrb[8].mxu0  ;;  %2595 = vmatprep.mubr.msk.bf16.mxu1 %vm2673_vm0, %v2672_v1 }
  0xfd   : > { %v2992_v59 = vadd.f32 %v757_v45, %v548_v57  ;;  %v2343_v60 = vpop.f32.mrb[9].mxu0 }
  0xfe   : > { %v551_v61 = vpop.f32.mrb[10].mxu0  ;;  %v765_v63 = vpop.f32.mrb[12].mxu1  ;;  %v1133_v60 = vshrl.u32 %v2662_v27, 16 }
  0xff   : > { %v2995_v3 = vadd.f32 %v760_v51, %v551_v61  ;;  %v2344_v4 = vpop.f32.mrb[11].mxu0  ;;  %v2417_v5 = vpop.f32.mrb[13].mxu1  ;;  %v1131_v51 = vrot.slane %v1129_v40, 1  ;;  %v1137_v61 = vshll.u32 %v2663_v47, 16 }
 0x100   : > { %v768_v6 = vpop.f32.mrb[14].mxu1  ;;  %v1442_v4 = vsel %vm1407_vm3, %v1439_v33, %v1441_v53 }
 0x101   : > { %2522 = vmatmul.mubr.msk.bf16.gmra.mrb[116].mxu0 %vm446_vm1, %v1108_v62  ;;  %v2418_v9 = vpop.f32.mrb[15].mxu1  ;;  %v1132_v57 = vsel %vm299_vm2, %v1127_v50, %v1131_v51 }
 0x102   : > { %2525 = vmatprep.mubr.msk.bf16.mxu0 %vm2673_vm0, %v2672_v1 }
 0x103   : > { %2596 = vmatmul.mubr.msk.bf16.gmra.mrb[120].mxu1 %vm446_vm1, %v1436_v7  ;;  %v1139_v7 = vrot.slane %v1137_v61, 1 }
 0x104   : > { %v556_v12 = vpop.f32.mrb[12].mxu0  ;;  %2599 = vmatprep.mubr.msk.bf16.mxu1 %vm2673_vm0, %v2672_v1 }
 0x105   : > { %v3005_v14 = vadd.f32 %v765_v63, %v556_v12  ;;  %v2347_v15 = vpop.f32.mrb[13].mxu0 }
 0x106   : > { %v559_v16 = vpop.f32.mrb[14].mxu0  ;;  %v773_v18 = vpop.f32.mrb[16].mxu1 }
 0x107   : > { %v3008_v21 = vadd.f32 %v768_v6, %v559_v16  ;;  %v2348_v22 = vpop.f32.mrb[15].mxu0  ;;  %v2421_v24 = vpop.f32.mrb[17].mxu1  ;;  %v1135_v6 = vor.u32 %v1133_v60, %v1131_v51 }
 0x108   : > { %v776_v25 = vpop.f32.mrb[18].mxu1 }
 0x109   : > { %2526 = vmatmul.mubr.msk.bf16.gmra.mrb[120].mxu0 %vm446_vm1, %v1116_v17  ;;  %v2422_v28 = vpop.f32.mrb[19].mxu1  ;;  %v1140_v12 = vsel %vm299_vm2, %v1135_v6, %v1139_v7 }
 0x10a   : > { %2529 = vmatprep.mubr.msk.bf16.mxu0 %vm2673_vm0, %v2672_v1 }
 0x10b   : > { %2600 = vmatmul.mubr.msk.bf16.gmra.mrb[124].mxu1 %vm446_vm1, %v1438_v26 }
 0x10c   : > { %v564_v32 = vpop.f32.mrb[16].mxu0  ;;  %2603 = vmatprep.mubr.msk.bf16.mxu1 %vm2673_vm0, %v2672_v1 }
 0x10d   : > { %v3018_v34 = vadd.f32 %v773_v18, %v564_v32  ;;  %v2351_v35 = vpop.f32.mrb[17].mxu0 }
 0x10e   : > { %v567_v36 = vpop.f32.mrb[18].mxu0  ;;  %v781_v38 = vpop.f32.mrb[20].mxu1 }
 0x10f   : > { %v3021_v42 = vadd.f32 %v776_v25, %v567_v36  ;;  %v2352_v43 = vpop.f32.mrb[19].mxu0  ;;  %v2425_v44 = vpop.f32.mrb[21].mxu1 }
 0x110   : > { %v784_v45 = vpop.f32.mrb[22].mxu1 }
 0x111   : > { %2530 = vmatmul.mubr.msk.bf16.gmra.mrb[124].mxu0 %vm446_vm1, %v1124_v37  ;;  %v2426_v49 = vpop.f32.mrb[23].mxu1 }
 0x112   : > { %2533 = vmatprep.mubr.msk.bf16.mxu0 %vm2673_vm0, %v2672_v1 }
 0x113   : > { %2604 = vmatmul.mubr.msk.bf16.gmra.mrb[128].mxu1 %vm446_vm1, %v1440_v46 }
 0x114   : > { %v572_v52 = vpop.f32.mrb[20].mxu0  ;;  %2607 = vmatprep.mubr.msk.bf16.mxu1 %vm2673_vm0, %v2672_v1 }
 0x115   : > { %v3031_v54 = vadd.f32 %v781_v38, %v572_v52  ;;  %v2355_v55 = vpop.f32.mrb[21].mxu0 }
 0x116   : > { %v575_v56 = vpop.f32.mrb[22].mxu0  ;;  %v789_v58 = vpop.f32.mrb[24].mxu1 }
 0x117   : > { %v3034_v62 = vadd.f32 %v784_v45, %v575_v56  ;;  %v2356_v63 = vpop.f32.mrb[23].mxu0  ;;  %v2429_v0 = vpop.f32.mrb[25].mxu1 }
 0x118   : > { %v792_v2 = vpop.f32.mrb[26].mxu1 }
 0x119   : > { %2534 = vmatmul.mubr.msk.bf16.gmra.mrb[128].mxu0 %vm446_vm1, %v1132_v57  ;;  %v2430_v5 = vpop.f32.mrb[27].mxu1 }
 0x11a   : > { %2537 = vmatprep.mubr.msk.bf16.mxu0 %vm2673_vm0, %v2672_v1 }
 0x11b   : > { %2608 = vmatmul.mubr.msk.bf16.gmra.mrb[132].mxu1 %vm446_vm1, %v1442_v4 }
 0x11c   : > { %v580_v8 = vpop.f32.mrb[24].mxu0 }
 0x11d   : > { %v3041_v9 = vadd.f32 %v789_v58, %v580_v8  ;;  %v2359_v10 = vpop.f32.mrb[25].mxu0 }
 0x11e   : > { %v583_v11 = vpop.f32.mrb[26].mxu0  ;;  %v797_v13 = vpop.f32.mrb[28].mxu1 }
 0x11f   : > { %v3044_v15 = vadd.f32 %v792_v2, %v583_v11  ;;  %v2360_v16 = vpop.f32.mrb[27].mxu0  ;;  %v2433_v17 = vpop.f32.mrb[29].mxu1 }
 0x120   : > { %v800_v18 = vpop.f32.mrb[30].mxu1 }
 0x121   : > { %2538 = vmatmul.mubr.msk.bf16.gmra.mrb[132].mxu0 %vm446_vm1, %v1140_v12  ;;  %v2434_v1 = vpop.f32.mrb[31].mxu1 }
 0x124   : > { %v588_v19 = vpop.f32.mrb[28].mxu0 }
 0x125   : > { %v3047_v20 = vadd.f32 %v797_v13, %v588_v19  ;;  %v2363_v22 = vpop.f32.mrb[29].mxu0 }
 0x126   : > { %v591_v24 = vpop.f32.mrb[30].mxu0  ;;  %v805_v25 = vpop.f32.mrb[32].mxu1 }
 0x127   : > { %v3049_v26 = vadd.f32 %v800_v18, %v591_v24  ;;  %v2364_v27 = vpop.f32.mrb[31].mxu0  ;;  %v2437_v28 = vpop.f32.mrb[33].mxu1 }
 0x128   : > { %v808_v29 = vpop.f32.mrb[34].mxu1 }
 0x129   : > { %v2438_v31 = vpop.f32.mrb[35].mxu1 }
 0x12c   : > { %v596_v32 = vpop.f32.mrb[32].mxu0 }
 0x12d   : > { %v3051_v33 = vadd.f32 %v805_v25, %v596_v32  ;;  %v2367_v35 = vpop.f32.mrb[33].mxu0 }
 0x12e   : > { %v599_v36 = vpop.f32.mrb[34].mxu0  ;;  %v813_v37 = vpop.f32.mrb[36].mxu1 }
 0x12f   : > { %v3053_v38 = vadd.f32 %v808_v29, %v599_v36  ;;  %v2368_v39 = vpop.f32.mrb[35].mxu0  ;;  %v2441_v40 = vpop.f32.mrb[37].mxu1 }
 0x130   : > { %v816_v43 = vpop.f32.mrb[38].mxu1 }
 0x131   : > { %v2442_v44 = vpop.f32.mrb[39].mxu1 }
 0x134   : > { %v604_v45 = vpop.f32.mrb[36].mxu0 }
 0x135   : > { %v3055_v46 = vadd.f32 %v813_v37, %v604_v45  ;;  %v2371_v47 = vpop.f32.mrb[37].mxu0 }
 0x136   : > { %v607_v49 = vpop.f32.mrb[38].mxu0  ;;  %v821_v50 = vpop.f32.mrb[40].mxu1 }
 0x137   : > { %v3057_v51 = vadd.f32 %v816_v43, %v607_v49  ;;  %v2372_v52 = vpop.f32.mrb[39].mxu0  ;;  %v2445_v53 = vpop.f32.mrb[41].mxu1 }
 0x138   : > { %v824_v55 = vpop.f32.mrb[42].mxu1 }
 0x139   : > { %v2446_v56 = vpop.f32.mrb[43].mxu1 }
 0x13c   : > { %v612_v57 = vpop.f32.mrb[40].mxu0 }
 0x13d   : > { %v3059_v58 = vadd.f32 %v821_v50, %v612_v57  ;;  %v2375_v60 = vpop.f32.mrb[41].mxu0 }
 0x13e   : > { %v615_v61 = vpop.f32.mrb[42].mxu0  ;;  %v829_v63 = vpop.f32.mrb[44].mxu1 }
 0x13f   : > { %v3061_v0 = vadd.f32 %v824_v55, %v615_v61  ;;  %v2376_v2 = vpop.f32.mrb[43].mxu0  ;;  %v2449_v4 = vpop.f32.mrb[45].mxu1 }
 0x140   : > { %v832_v5 = vpop.f32.mrb[46].mxu1 }
 0x141   : > { %v2450_v6 = vpop.f32.mrb[47].mxu1 }
 0x144   : > { %v620_v7 = vpop.f32.mrb[44].mxu0 }
 0x145   : > { %v3063_v8 = vadd.f32 %v829_v63, %v620_v7  ;;  %v2379_v10 = vpop.f32.mrb[45].mxu0 }
 0x146   : > { %v623_v11 = vpop.f32.mrb[46].mxu0  ;;  %v837_v12 = vpop.f32.mrb[48].mxu1 }
 0x147   : > { %v3065_v13 = vadd.f32 %v832_v5, %v623_v11  ;;  %v2380_v16 = vpop.f32.mrb[47].mxu0  ;;  %v2453_v17 = vpop.f32.mrb[49].mxu1 }
 0x148   : > { %v840_v18 = vpop.f32.mrb[50].mxu1 }
 0x149   : > { %v2454_v1 = vpop.f32.mrb[51].mxu1 }
 0x14c   : > { %v628_v19 = vpop.f32.mrb[48].mxu0 }
 0x14d   : > { %v3067_v22 = vadd.f32 %v837_v12, %v628_v19  ;;  %v2383_v24 = vpop.f32.mrb[49].mxu0 }
 0x14e   : > { %v631_v25 = vpop.f32.mrb[50].mxu0  ;;  %v845_v27 = vpop.f32.mrb[52].mxu1 }
 0x14f   : > { %v3069_v28 = vadd.f32 %v840_v18, %v631_v25  ;;  %v2384_v29 = vpop.f32.mrb[51].mxu0  ;;  %v2457_v31 = vpop.f32.mrb[53].mxu1 }
 0x150   : > { %v848_v32 = vpop.f32.mrb[54].mxu1 }
 0x151   : > { %v2458_v35 = vpop.f32.mrb[55].mxu1 }
 0x154   : > { %v636_v36 = vpop.f32.mrb[52].mxu0 }
 0x155   : > { %v3071_v37 = vadd.f32 %v845_v27, %v636_v36  ;;  %v2387_v39 = vpop.f32.mrb[53].mxu0 }
 0x156   : > { %v639_v40 = vpop.f32.mrb[54].mxu0  ;;  %v853_v43 = vpop.f32.mrb[56].mxu1 }
 0x157   : > { %v3073_v44 = vadd.f32 %v848_v32, %v639_v40  ;;  %v2388_v45 = vpop.f32.mrb[55].mxu0  ;;  %v2461_v47 = vpop.f32.mrb[57].mxu1 }
 0x158   : > { %v856_v49 = vpop.f32.mrb[58].mxu1  ;;  %v3091_v47 = vld [vmem:[%s3239_s2] ss:$0 sm:$0xff] }
 0x159   : > { %v2462_v50 = vpop.f32.mrb[59].mxu1 }
 0x15c   : > { %v644_v52 = vpop.f32.mrb[56].mxu0 }
 0x15d   : > { %v3075_v53 = vadd.f32 %v853_v43, %v644_v52  ;;  %v2391_v55 = vpop.f32.mrb[57].mxu0 }
 0x15e   : > { %v647_v56 = vpop.f32.mrb[58].mxu0  ;;  %v861_v57 = vpop.f32.mrb[60].mxu1 }
 0x15f   : > { %v3077_v60 = vadd.f32 %v856_v49, %v647_v56  ;;  %v2392_v61 = vpop.f32.mrb[59].mxu0  ;;  %v2465_v63 = vpop.f32.mrb[61].mxu1 }
 0x160   : > { %v864_v2 = vpop.f32.mrb[62].mxu1 }
 0x161   : > { %v2466_v4 = vpop.f32.mrb[63].mxu1 }
 0x164   : > { %v652_v5 = vpop.f32.mrb[60].mxu0 }
 0x165   : > { %v3079_v6 = vadd.f32 %v861_v57, %v652_v5  ;;  %v2395_v7 = vpop.f32.mrb[61].mxu0 }
 0x166   : > { %v655_v10 = vpop.f32.mrb[62].mxu0  ;;  %v869_v11 = vpop.f32.mrb[64].mxu1 }
 0x167   : > { %v3081_v12 = vadd.f32 %v864_v2, %v655_v10  ;;  %v2396_v16 = vpop.f32.mrb[63].mxu0  ;;  %v2469_v17 = vpop.f32.mrb[65].mxu1 }
 0x168   : > { %v872_v18 = vpop.f32.mrb[66].mxu1 }
 0x169   : > { %v2470_v1 = vpop.f32.mrb[67].mxu1 }
 0x16c   : > { %v660_v19 = vpop.f32.mrb[64].mxu0 }
 0x16d   : > { %v3083_v24 = vadd.f32 %v869_v11, %v660_v19  ;;  %v2399_v25 = vpop.f32.mrb[65].mxu0 }
 0x16e   : > { %v663_v27 = vpop.f32.mrb[66].mxu0  ;;  %v1534_v29 = vpop.f32.mrb[68].mxu1 }
 0x16f   : > { %v3085_v31 = vadd.f32 %v872_v18, %v663_v27  ;;  %v2400_v32 = vpop.f32.mrb[67].mxu0  ;;  %v2545_v35 = vpop.f32.mrb[69].mxu1 }
 0x170   : > { %v1537_v36 = vpop.f32.mrb[70].mxu1 }
 0x171   : > { %v2546_v39 = vpop.f32.mrb[71].mxu1 }
 0x174   : > { %v1232_v40 = vpop.f32.mrb[68].mxu0 }
 0x175   : > { %v1367_v43 = vadd.f32 %v1232_v40, %v2966_v23  ;;  %v2475_v45 = vpop.f32.mrb[69].mxu0 }
 0x176   : > { %v1235_v49 = vpop.f32.mrb[70].mxu0  ;;  %v1542_v50 = vpop.f32.mrb[72].mxu1 }
 0x177   : > { %v1669_v52 = vadd.f32 %v1534_v29, %v1367_v43  ;;  %v1368_v55 = vadd.f32 %v1235_v49, %v2969_v30  ;;  %v2476_v56 = vpop.f32.mrb[71].mxu0  ;;  %v2549_v57 = vpop.f32.mrb[73].mxu1 }
 0x178   : > { %v1545_v61 = vpop.f32.mrb[74].mxu1 }
 0x179   : > { %v1710_v63 = vadd.f32 %v3091_v47, %v1669_v52  ;;  %v1670_v2 = vadd.f32 %v1537_v36, %v1368_v55  ;;  %v2550_v4 = vpop.f32.mrb[75].mxu1 }
 0x17b   : > { %vm1744_vm4 = vcmp.ge.f32.partialorder %v1710_v63, 0.0  ;;  %v1778_v23 = vmul.f32 0.2, %v1710_v63  ;;  %v1711_v5 = vadd.f32 %v3091_v47, %v1670_v2 }
 0x17c   : > { %v1240_v7 = vpop.f32.mrb[72].mxu0 }
 0x17d   : > { %v1812_v30 = vsel %vm1744_vm4, %v1710_v63, %v1778_v23  ;;  %vm1745_vm6 = vcmp.ge.f32.partialorder %v1711_v5, 0.0  ;;  %v1779_v10 = vmul.f32 0.2, %v1711_v5  ;;  %v1369_v11 = vadd.f32 %v1240_v7, %v2979_v41  ;;  %v2479_v16 = vpop.f32.mrb[73].mxu0 }
 0x17e   : > { %v2225_v17 = vpack.c.bf16 %v1812_v30, %v1812_v30  ;;  %v1243_v18 = vpop.f32.mrb[74].mxu0  ;;  %v1550_v1 = vpop.f32.mrb[76].mxu1 }
 0x17f   : > { %v1813_v19 = vsel %vm1745_vm6, %v1711_v5, %v1779_v10  ;;  %v1671_v25 = vadd.f32 %v1542_v50, %v1369_v11  ;;  %v1370_v27 = vadd.f32 %v1243_v18, %v2982_v48  ;;  %v2480_v29 = vpop.f32.mrb[75].mxu0  ;;  %v2553_v32 = vpop.f32.mrb[77].mxu1 }
 0x180   : > { %1983 = vst.msk [vmem:[%s3100_s4] sm:$0xf] %vm1982_vm5, %v2225_v17  ;;  %v2226_v35 = vpack.c.bf16 %v1813_v19, %v1813_v19  ;;  %v1553_v36 = vpop.f32.mrb[78].mxu1 }
 0x181   : > { %v1712_v39 = vadd.f32 %v3091_v47, %v1671_v25  ;;  %v1672_v40 = vadd.f32 %v1545_v61, %v1370_v27  ;;  %v2554_v43 = vpop.f32.mrb[79].mxu1 }
 0x182   : > { %1984 = vst.msk [vmem:[%s3100_s4 + $0x4] sm:$0xf] %vm1982_vm5, %v2226_v35 }
 0x183   : > { %vm1746_vm7 = vcmp.ge.f32.partialorder %v1712_v39, 0.0  ;;  %v1780_v41 = vmul.f32 0.2, %v1712_v39  ;;  %v1713_v45 = vadd.f32 %v3091_v47, %v1672_v40 }
 0x184   : > { %v1248_v49 = vpop.f32.mrb[76].mxu0 }
 0x185   : > { %v1814_v50 = vsel %vm1746_vm7, %v1712_v39, %v1780_v41  ;;  %vm1747_vm8 = vcmp.ge.f32.partialorder %v1713_v45, 0.0  ;;  %v1781_v48 = vmul.f32 0.2, %v1713_v45  ;;  %v1371_v52 = vadd.f32 %v1248_v49, %v2992_v59  ;;  %v2483_v55 = vpop.f32.mrb[77].mxu0 }
 0x186   : > { %v2227_v56 = vpack.c.bf16 %v1814_v50, %v1814_v50  ;;  %v1251_v57 = vpop.f32.mrb[78].mxu0  ;;  %v1558_v63 = vpop.f32.mrb[80].mxu1 }
 0x187   : > { %v1815_v61 = vsel %vm1747_vm8, %v1713_v45, %v1781_v48  ;;  %v1673_v2 = vadd.f32 %v1550_v1, %v1371_v52  ;;  %v1372_v4 = vadd.f32 %v1251_v57, %v2995_v3  ;;  %v2484_v23 = vpop.f32.mrb[79].mxu0  ;;  %v2557_v5 = vpop.f32.mrb[81].mxu1 }
 0x188   : > { %1985 = vst.msk [vmem:[%s3100_s4 + $0x8] sm:$0xf] %vm1982_vm5, %v2227_v56  ;;  %v2228_v7 = vpack.c.bf16 %v1815_v61, %v1815_v61  ;;  %v1561_v30 = vpop.f32.mrb[82].mxu1 }
 0x189   : > { %v1714_v10 = vadd.f32 %v3091_v47, %v1673_v2  ;;  %v1674_v11 = vadd.f32 %v1553_v36, %v1372_v4  ;;  %v2558_v16 = vpop.f32.mrb[83].mxu1 }
 0x18a   : > { %1986 = vst.msk [vmem:[%s3100_s4 + $0xc] sm:$0xf] %vm1982_vm5, %v2228_v7 }
 0x18b   : > { %vm1748_vm9 = vcmp.ge.f32.partialorder %v1714_v10, 0.0  ;;  %v1782_v59 = vmul.f32 0.2, %v1714_v10  ;;  %v1715_v17 = vadd.f32 %v3091_v47, %v1674_v11 }
 0x18c   : > { %v1256_v18 = vpop.f32.mrb[80].mxu0 }
 0x18d   : > { %v1816_v1 = vsel %vm1748_vm9, %v1714_v10, %v1782_v59  ;;  %vm1749_vm10 = vcmp.ge.f32.partialorder %v1715_v17, 0.0  ;;  %v1783_v3 = vmul.f32 0.2, %v1715_v17  ;;  %v1373_v19 = vadd.f32 %v1256_v18, %v3005_v14  ;;  %v2487_v25 = vpop.f32.mrb[81].mxu0 }
 0x18e   : > { %v2229_v27 = vpack.c.bf16 %v1816_v1, %v1816_v1  ;;  %v1259_v29 = vpop.f32.mrb[82].mxu0  ;;  %v1566_v32 = vpop.f32.mrb[84].mxu1 }
 0x18f   : > { %v1817_v35 = vsel %vm1749_vm10, %v1715_v17, %v1783_v3  ;;  %v1675_v36 = vadd.f32 %v1558_v63, %v1373_v19  ;;  %v1374_v39 = vadd.f32 %v1259_v29, %v3008_v21  ;;  %v2488_v40 = vpop.f32.mrb[83].mxu0  ;;  %v2561_v43 = vpop.f32.mrb[85].mxu1 }
 0x190   : > { %1987 = vst.msk [vmem:[%s3100_s4 + $0x10] sm:$0xf] %vm1982_vm5, %v2229_v27  ;;  %v2230_v41 = vpack.c.bf16 %v1817_v35, %v1817_v35  ;;  %v1569_v45 = vpop.f32.mrb[86].mxu1 }
 0x191   : > { %v1716_v49 = vadd.f32 %v3091_v47, %v1675_v36  ;;  %v1676_v50 = vadd.f32 %v1561_v30, %v1374_v39  ;;  %v2562_v48 = vpop.f32.mrb[87].mxu1 }
 0x192   : > { %1988 = vst.msk [vmem:[%s3100_s4 + $0x14] sm:$0xf] %vm1982_vm5, %v2230_v41 }
 0x193   : > { %vm1750_vm11 = vcmp.ge.f32.partialorder %v1716_v49, 0.0  ;;  %v1784_v14 = vmul.f32 0.2, %v1716_v49  ;;  %v1717_v52 = vadd.f32 %v3091_v47, %v1676_v50 }
 0x194   : > { %v1264_v55 = vpop.f32.mrb[84].mxu0 }
 0x195   : > { %v1818_v56 = vsel %vm1750_vm11, %v1716_v49, %v1784_v14  ;;  %vm1751_vm12 = vcmp.ge.f32.partialorder %v1717_v52, 0.0  ;;  %v1785_v21 = vmul.f32 0.2, %v1717_v52  ;;  %v1375_v57 = vadd.f32 %v1264_v55, %v3018_v34  ;;  %v2491_v63 = vpop.f32.mrb[85].mxu0 }
 0x196   : > { %v2231_v61 = vpack.c.bf16 %v1818_v56, %v1818_v56  ;;  %v1267_v2 = vpop.f32.mrb[86].mxu0  ;;  %v1574_v4 = vpop.f32.mrb[88].mxu1 }
 0x197   : > { %v1819_v23 = vsel %vm1751_vm12, %v1717_v52, %v1785_v21  ;;  %v1677_v5 = vadd.f32 %v1566_v32, %v1375_v57  ;;  %v1376_v7 = vadd.f32 %v1267_v2, %v3021_v42  ;;  %v2492_v30 = vpop.f32.mrb[87].mxu0  ;;  %v2565_v10 = vpop.f32.mrb[89].mxu1 }
 0x198   : > { %1989 = vst.msk [vmem:[%s3100_s4 + $0x18] sm:$0xf] %vm1982_vm5, %v2231_v61  ;;  %v2232_v11 = vpack.c.bf16 %v1819_v23, %v1819_v23  ;;  %v1577_v16 = vpop.f32.mrb[90].mxu1 }
 0x199   : > { %v1718_v59 = vadd.f32 %v3091_v47, %v1677_v5  ;;  %v1678_v17 = vadd.f32 %v1569_v45, %v1376_v7  ;;  %v2566_v18 = vpop.f32.mrb[91].mxu1 }
 0x19a   : > { %1990 = vst.msk [vmem:[%s3100_s4 + $0x1c] sm:$0xf] %vm1982_vm5, %v2232_v11 }
 0x19b   : > { %vm1752_vm13 = vcmp.ge.f32.partialorder %v1718_v59, 0.0  ;;  %v1786_v34 = vmul.f32 0.2, %v1718_v59  ;;  %v1719_v1 = vadd.f32 %v3091_v47, %v1678_v17 }
 0x19c   : > { %v1272_v3 = vpop.f32.mrb[88].mxu0 }
 0x19d   : > { %v1820_v19 = vsel %vm1752_vm13, %v1718_v59, %v1786_v34  ;;  %vm1753_vm14 = vcmp.ge.f32.partialorder %v1719_v1, 0.0  ;;  %v1787_v42 = vmul.f32 0.2, %v1719_v1  ;;  %v1377_v25 = vadd.f32 %v1272_v3, %v3031_v54  ;;  %v2495_v27 = vpop.f32.mrb[89].mxu0 }
 0x19e   : > { %v2233_v29 = vpack.c.bf16 %v1820_v19, %v1820_v19  ;;  %v1275_v32 = vpop.f32.mrb[90].mxu0  ;;  %v1582_v35 = vpop.f32.mrb[92].mxu1 }
 0x19f   : > { %v1821_v36 = vsel %vm1753_vm14, %v1719_v1, %v1787_v42  ;;  %v1679_v39 = vadd.f32 %v1574_v4, %v1377_v25  ;;  %v1378_v40 = vadd.f32 %v1275_v32, %v3034_v62  ;;  %v2496_v43 = vpop.f32.mrb[91].mxu0  ;;  %v2569_v41 = vpop.f32.mrb[93].mxu1 }
 0x1a0   : > { %1991 = vst.msk [vmem:[%s3100_s4 + $0x20] sm:$0xf] %vm1982_vm5, %v2233_v29  ;;  %v2234_v45 = vpack.c.bf16 %v1821_v36, %v1821_v36  ;;  %v1585_v49 = vpop.f32.mrb[94].mxu1 }
 0x1a1   : > { %v1720_v50 = vadd.f32 %v3091_v47, %v1679_v39  ;;  %v1680_v48 = vadd.f32 %v1577_v16, %v1378_v40  ;;  %v2570_v14 = vpop.f32.mrb[95].mxu1 }
 0x1a2   : > { %1992 = vst.msk [vmem:[%s3100_s4 + $0x24] sm:$0xf] %vm1982_vm5, %v2234_v45 }
 0x1a3   : > { %vm1754_vm15 = vcmp.ge.f32.partialorder %v1720_v50, 0.0  ;;  %v1788_v54 = vmul.f32 0.2, %v1720_v50  ;;  %v1721_v52 = vadd.f32 %v3091_v47, %v1680_v48 }
 0x1a4   : > { %v1280_v55 = vpop.f32.mrb[92].mxu0 }
 0x1a5   : > { %v1822_v56 = vsel %vm1754_vm15, %v1720_v50, %v1788_v54  ;;  %vm1755_vm0 = vcmp.ge.f32.partialorder %v1721_v52, 0.0  ;;  %v1789_v62 = vmul.f32 0.2, %v1721_v52  ;;  %v1379_v21 = vadd.f32 %v1280_v55, %v3041_v9  ;;  %v2499_v57 = vpop.f32.mrb[93].mxu0 }
 0x1a6   : > { %v2235_v63 = vpack.c.bf16 %v1822_v56, %v1822_v56  ;;  %v1283_v61 = vpop.f32.mrb[94].mxu0  ;;  %v1590_v2 = vpop.f32.mrb[96].mxu1 }
 0x1a7   : > { %v1823_v4 = vsel %vm1755_vm0, %v1721_v52, %v1789_v62  ;;  %v1681_v23 = vadd.f32 %v1582_v35, %v1379_v21  ;;  %v1380_v5 = vadd.f32 %v1283_v61, %v3044_v15  ;;  %v2500_v7 = vpop.f32.mrb[95].mxu0  ;;  %v2573_v30 = vpop.f32.mrb[97].mxu1 }
 0x1a8   : > { %1993 = vst.msk [vmem:[%s3100_s4 + $0x28] sm:$0xf] %vm1982_vm5, %v2235_v63  ;;  %v2236_v10 = vpack.c.bf16 %v1823_v4, %v1823_v4  ;;  %v1593_v11 = vpop.f32.mrb[98].mxu1 }
 0x1a9   : > { %v1722_v16 = vadd.f32 %v3091_v47, %v1681_v23  ;;  %v1682_v59 = vadd.f32 %v1585_v49, %v1380_v5  ;;  %v2574_v17 = vpop.f32.mrb[99].mxu1 }
 0x1aa   : > { %1994 = vst.msk [vmem:[%s3100_s4 + $0x2c] sm:$0xf] %vm1982_vm5, %v2236_v10 }
 0x1ab   : > { %vm1756_vm1 = vcmp.ge.f32.partialorder %v1722_v16, 0.0  ;;  %v1790_v9 = vmul.f32 0.2, %v1722_v16  ;;  %v1723_v18 = vadd.f32 %v3091_v47, %v1682_v59 }
 0x1ac   : > { %v1288_v34 = vpop.f32.mrb[96].mxu0 }
 0x1ad   : > { %v1824_v1 = vsel %vm1756_vm1, %v1722_v16, %v1790_v9  ;;  %vm1757_vm2 = vcmp.ge.f32.partialorder %v1723_v18, 0.0  ;;  %v1791_v15 = vmul.f32 0.2, %v1723_v18  ;;  %v1381_v3 = vadd.f32 %v1288_v34, %v3047_v20  ;;  %v2503_v19 = vpop.f32.mrb[97].mxu0 }
 0x1ae   : > { %v2237_v42 = vpack.c.bf16 %v1824_v1, %v1824_v1  ;;  %v1291_v25 = vpop.f32.mrb[98].mxu0  ;;  %v1598_v27 = vpop.f32.mrb[100].mxu1 }
 0x1af   : > { %v1825_v29 = vsel %vm1757_vm2, %v1723_v18, %v1791_v15  ;;  %v1683_v32 = vadd.f32 %v1590_v2, %v1381_v3  ;;  %v1382_v35 = vadd.f32 %v1291_v25, %v3049_v26  ;;  %v2504_v36 = vpop.f32.mrb[99].mxu0  ;;  %v2577_v39 = vpop.f32.mrb[101].mxu1 }
 0x1b0   : > { %1995 = vst.msk [vmem:[%s3100_s4 + $0x30] sm:$0xf] %vm1982_vm5, %v2237_v42  ;;  %v2238_v40 = vpack.c.bf16 %v1825_v29, %v1825_v29  ;;  %v1601_v43 = vpop.f32.mrb[102].mxu1 }
 0x1b1   : > { %v1724_v41 = vadd.f32 %v3091_v47, %v1683_v32  ;;  %v1684_v45 = vadd.f32 %v1593_v11, %v1382_v35  ;;  %v2578_v49 = vpop.f32.mrb[103].mxu1 }
 0x1b2   : > { %1996 = vst.msk [vmem:[%s3100_s4 + $0x34] sm:$0xf] %vm1982_vm5, %v2238_v40 }
 0x1b3   : > { %vm1758_vm3 = vcmp.ge.f32.partialorder %v1724_v41, 0.0  ;;  %v1792_v20 = vmul.f32 0.2, %v1724_v41  ;;  %v1725_v50 = vadd.f32 %v3091_v47, %v1684_v45 }
 0x1b4   : > { %v1296_v48 = vpop.f32.mrb[100].mxu0 }
 0x1b5   : > { %v1826_v14 = vsel %vm1758_vm3, %v1724_v41, %v1792_v20  ;;  %vm1759_vm4 = vcmp.ge.f32.partialorder %v1725_v50, 0.0  ;;  %v1793_v26 = vmul.f32 0.2, %v1725_v50  ;;  %v1383_v54 = vadd.f32 %v1296_v48, %v3051_v33  ;;  %v2507_v52 = vpop.f32.mrb[101].mxu0 }
 0x1b6   : > { %v2239_v55 = vpack.c.bf16 %v1826_v14, %v1826_v14  ;;  %v1299_v56 = vpop.f32.mrb[102].mxu0  ;;  %v1606_v62 = vpop.f32.mrb[104].mxu1 }
 0x1b7   : > { %v1827_v21 = vsel %vm1759_vm4, %v1725_v50, %v1793_v26  ;;  %v1685_v57 = vadd.f32 %v1598_v27, %v1383_v54  ;;  %v1384_v63 = vadd.f32 %v1299_v56, %v3053_v38  ;;  %v2508_v61 = vpop.f32.mrb[103].mxu0  ;;  %v2581_v2 = vpop.f32.mrb[105].mxu1 }
 0x1b8   : > { %1997 = vst.msk [vmem:[%s3100_s4 + $0x38] sm:$0xf] %vm1982_vm5, %v2239_v55  ;;  %v2240_v4 = vpack.c.bf16 %v1827_v21, %v1827_v21  ;;  %v1609_v23 = vpop.f32.mrb[106].mxu1 }
 0x1b9   : > { %v1726_v5 = vadd.f32 %v3091_v47, %v1685_v57  ;;  %v1686_v7 = vadd.f32 %v1601_v43, %v1384_v63  ;;  %v2582_v30 = vpop.f32.mrb[107].mxu1 }
 0x1ba   : > { %1998 = vst.msk [vmem:[%s3100_s4 + $0x3c] sm:$0xf] %vm1982_vm5, %v2240_v4 }
 0x1bb   : > { %vm1760_vm6 = vcmp.ge.f32.partialorder %v1726_v5, 0.0  ;;  %v1794_v33 = vmul.f32 0.2, %v1726_v5  ;;  %v1727_v10 = vadd.f32 %v3091_v47, %v1686_v7 }
 0x1bc   : > { %v1304_v11 = vpop.f32.mrb[104].mxu0 }
 0x1bd   : > { %v1828_v16 = vsel %vm1760_vm6, %v1726_v5, %v1794_v33  ;;  %vm1761_vm7 = vcmp.ge.f32.partialorder %v1727_v10, 0.0  ;;  %v1795_v38 = vmul.f32 0.2, %v1727_v10  ;;  %v1385_v59 = vadd.f32 %v1304_v11, %v3055_v46  ;;  %v2511_v17 = vpop.f32.mrb[105].mxu0 }
 0x1be   : > { %v2241_v9 = vpack.c.bf16 %v1828_v16, %v1828_v16  ;;  %v1307_v18 = vpop.f32.mrb[106].mxu0  ;;  %v1614_v34 = vpop.f32.mrb[108].mxu1 }
 0x1bf   : > { %v1829_v1 = vsel %vm1761_vm7, %v1727_v10, %v1795_v38  ;;  %v1687_v15 = vadd.f32 %v1606_v62, %v1385_v59  ;;  %v1386_v3 = vadd.f32 %v1307_v18, %v3057_v51  ;;  %v2512_v19 = vpop.f32.mrb[107].mxu0  ;;  %v2585_v42 = vpop.f32.mrb[109].mxu1 }
 0x1c0   : > { %1999 = vst.msk [vmem:[%s3100_s4 + $0x40] sm:$0xf] %vm1982_vm5, %v2241_v9  ;;  %v2242_v25 = vpack.c.bf16 %v1829_v1, %v1829_v1  ;;  %v1617_v27 = vpop.f32.mrb[110].mxu1 }
 0x1c1   : > { %v1728_v29 = vadd.f32 %v3091_v47, %v1687_v15  ;;  %v1688_v32 = vadd.f32 %v1609_v23, %v1386_v3  ;;  %v2586_v35 = vpop.f32.mrb[111].mxu1 }
 0x1c2   : > { %2000 = vst.msk [vmem:[%s3100_s4 + $0x44] sm:$0xf] %vm1982_vm5, %v2242_v25 }
 0x1c3   : > { %vm1762_vm8 = vcmp.ge.f32.partialorder %v1728_v29, 0.0  ;;  %v1796_v46 = vmul.f32 0.2, %v1728_v29  ;;  %v1729_v36 = vadd.f32 %v3091_v47, %v1688_v32 }
 0x1c4   : > { %v1312_v39 = vpop.f32.mrb[108].mxu0 }
 0x1c5   : > { %v1830_v40 = vsel %vm1762_vm8, %v1728_v29, %v1796_v46  ;;  %vm1763_vm9 = vcmp.ge.f32.partialorder %v1729_v36, 0.0  ;;  %v1797_v51 = vmul.f32 0.2, %v1729_v36  ;;  %v1387_v43 = vadd.f32 %v1312_v39, %v3059_v58  ;;  %v2515_v41 = vpop.f32.mrb[109].mxu0 }
 0x1c6   : > { %v2243_v45 = vpack.c.bf16 %v1830_v40, %v1830_v40  ;;  %v1315_v49 = vpop.f32.mrb[110].mxu0  ;;  %v1622_v20 = vpop.f32.mrb[112].mxu1 }
 0x1c7   : > { %v1831_v50 = vsel %vm1763_vm9, %v1729_v36, %v1797_v51  ;;  %v1689_v48 = vadd.f32 %v1614_v34, %v1387_v43  ;;  %v1388_v14 = vadd.f32 %v1315_v49, %v3061_v0  ;;  %v2516_v26 = vpop.f32.mrb[111].mxu0  ;;  %v2589_v54 = vpop.f32.mrb[113].mxu1 }
 0x1c8   : > { %2001 = vst.msk [vmem:[%s3100_s4 + $0x48] sm:$0xf] %vm1982_vm5, %v2243_v45  ;;  %v2244_v52 = vpack.c.bf16 %v1831_v50, %v1831_v50  ;;  %v1625_v55 = vpop.f32.mrb[114].mxu1 }
 0x1c9   : > { %v1730_v56 = vadd.f32 %v3091_v47, %v1689_v48  ;;  %v1690_v62 = vadd.f32 %v1617_v27, %v1388_v14  ;;  %v2590_v21 = vpop.f32.mrb[115].mxu1 }
 0x1ca   : > { %2002 = vst.msk [vmem:[%s3100_s4 + $0x4c] sm:$0xf] %vm1982_vm5, %v2244_v52 }
 0x1cb   : > { %vm1764_vm10 = vcmp.ge.f32.partialorder %v1730_v56, 0.0  ;;  %v1798_v58 = vmul.f32 0.2, %v1730_v56  ;;  %v1731_v57 = vadd.f32 %v3091_v47, %v1690_v62 }
 0x1cc   : > { %v1320_v63 = vpop.f32.mrb[112].mxu0 }
 0x1cd   : > { %v1832_v61 = vsel %vm1764_vm10, %v1730_v56, %v1798_v58  ;;  %vm1765_vm11 = vcmp.ge.f32.partialorder %v1731_v57, 0.0  ;;  %v1799_v0 = vmul.f32 0.2, %v1731_v57  ;;  %v1389_v2 = vadd.f32 %v1320_v63, %v3063_v8  ;;  %v2519_v4 = vpop.f32.mrb[113].mxu0 }
 0x1ce   : > { %v2245_v23 = vpack.c.bf16 %v1832_v61, %v1832_v61  ;;  %v1323_v5 = vpop.f32.mrb[114].mxu0  ;;  %v1630_v7 = vpop.f32.mrb[116].mxu1 }
 0x1cf   : > { %v1833_v30 = vsel %vm1765_vm11, %v1731_v57, %v1799_v0  ;;  %v1691_v33 = vadd.f32 %v1622_v20, %v1389_v2  ;;  %v1390_v10 = vadd.f32 %v1323_v5, %v3065_v13  ;;  %v2520_v11 = vpop.f32.mrb[115].mxu0  ;;  %v2593_v16 = vpop.f32.mrb[117].mxu1 }
 0x1d0   : > { %2003 = vst.msk [vmem:[%s3100_s4 + $0x50] sm:$0xf] %vm1982_vm5, %v2245_v23  ;;  %v2246_v38 = vpack.c.bf16 %v1833_v30, %v1833_v30  ;;  %v1633_v59 = vpop.f32.mrb[118].mxu1 }
 0x1d1   : > { %v1732_v17 = vadd.f32 %v3091_v47, %v1691_v33  ;;  %v1692_v9 = vadd.f32 %v1625_v55, %v1390_v10  ;;  %v2594_v18 = vpop.f32.mrb[119].mxu1 }
 0x1d2   : > { %2004 = vst.msk [vmem:[%s3100_s4 + $0x54] sm:$0xf] %vm1982_vm5, %v2246_v38 }
 0x1d3   : > { %vm1766_vm12 = vcmp.ge.f32.partialorder %v1732_v17, 0.0  ;;  %v1800_v8 = vmul.f32 0.2, %v1732_v17  ;;  %v1733_v34 = vadd.f32 %v3091_v47, %v1692_v9 }
 0x1d4   : > { %v1328_v1 = vpop.f32.mrb[116].mxu0 }
 0x1d5   : > { %v1834_v15 = vsel %vm1766_vm12, %v1732_v17, %v1800_v8  ;;  %vm1767_vm13 = vcmp.ge.f32.partialorder %v1733_v34, 0.0  ;;  %v1801_v13 = vmul.f32 0.2, %v1733_v34  ;;  %v1391_v3 = vadd.f32 %v1328_v1, %v3067_v22  ;;  %v2523_v19 = vpop.f32.mrb[117].mxu0 }
 0x1d6   : > { %v2247_v42 = vpack.c.bf16 %v1834_v15, %v1834_v15  ;;  %v1331_v25 = vpop.f32.mrb[118].mxu0  ;;  %v1638_v27 = vpop.f32.mrb[120].mxu1 }
 0x1d7   : > { %v1835_v29 = vsel %vm1767_vm13, %v1733_v34, %v1801_v13  ;;  %v1693_v32 = vadd.f32 %v1630_v7, %v1391_v3  ;;  %v1392_v35 = vadd.f32 %v1331_v25, %v3069_v28  ;;  %v2524_v46 = vpop.f32.mrb[119].mxu0  ;;  %v2597_v36 = vpop.f32.mrb[121].mxu1 }
 0x1d8   : > { %2005 = vst.msk [vmem:[%s3100_s4 + $0x58] sm:$0xf] %vm1982_vm5, %v2247_v42  ;;  %v2248_v39 = vpack.c.bf16 %v1835_v29, %v1835_v29  ;;  %v1641_v40 = vpop.f32.mrb[122].mxu1 }
 0x1d9   : > { %v1734_v51 = vadd.f32 %v3091_v47, %v1693_v32  ;;  %v1694_v43 = vadd.f32 %v1633_v59, %v1392_v35  ;;  %v2598_v41 = vpop.f32.mrb[123].mxu1 }
 0x1da   : > { %2006 = vst.msk [vmem:[%s3100_s4 + $0x5c] sm:$0xf] %vm1982_vm5, %v2248_v39 }
 0x1db   : > { %vm1768_vm14 = vcmp.ge.f32.partialorder %v1734_v51, 0.0  ;;  %v1802_v22 = vmul.f32 0.2, %v1734_v51  ;;  %v1735_v45 = vadd.f32 %v3091_v47, %v1694_v43 }
 0x1dc   : > { %v1336_v49 = vpop.f32.mrb[120].mxu0 }
 0x1dd   : > { %v1836_v20 = vsel %vm1768_vm14, %v1734_v51, %v1802_v22  ;;  %vm1769_vm15 = vcmp.ge.f32.partialorder %v1735_v45, 0.0  ;;  %v1803_v28 = vmul.f32 0.2, %v1735_v45  ;;  %v1393_v50 = vadd.f32 %v1336_v49, %v3071_v37  ;;  %v2527_v48 = vpop.f32.mrb[121].mxu0 }
 0x1de   : > { %v2249_v14 = vpack.c.bf16 %v1836_v20, %v1836_v20  ;;  %v1339_v26 = vpop.f32.mrb[122].mxu0  ;;  %v1646_v54 = vpop.f32.mrb[124].mxu1 }
 0x1df   : > { %v1837_v52 = vsel %vm1769_vm15, %v1735_v45, %v1803_v28  ;;  %v1695_v55 = vadd.f32 %v1638_v27, %v1393_v50  ;;  %v1394_v56 = vadd.f32 %v1339_v26, %v3073_v44  ;;  %v2528_v62 = vpop.f32.mrb[123].mxu0  ;;  %v2601_v21 = vpop.f32.mrb[125].mxu1 }
 0x1e0   : > { %2007 = vst.msk [vmem:[%s3100_s4 + $0x60] sm:$0xf] %vm1982_vm5, %v2249_v14  ;;  %v2250_v58 = vpack.c.bf16 %v1837_v52, %v1837_v52  ;;  %v1649_v57 = vpop.f32.mrb[126].mxu1 }
 0x1e1   : > { %v1736_v63 = vadd.f32 %v3091_v47, %v1695_v55  ;;  %v1696_v61 = vadd.f32 %v1641_v40, %v1394_v56  ;;  %v2602_v0 = vpop.f32.mrb[127].mxu1 }
 0x1e2   : > { %2008 = vst.msk [vmem:[%s3100_s4 + $0x64] sm:$0xf] %vm1982_vm5, %v2250_v58 }
 0x1e3   : > { %vm1770_vm0 = vcmp.ge.f32.partialorder %v1736_v63, 0.0  ;;  %v1804_v37 = vmul.f32 0.2, %v1736_v63  ;;  %v1737_v2 = vadd.f32 %v3091_v47, %v1696_v61 }
 0x1e4   : > { %v1344_v4 = vpop.f32.mrb[124].mxu0 }
 0x1e5   : > { %v1838_v23 = vsel %vm1770_vm0, %v1736_v63, %v1804_v37  ;;  %vm1771_vm1 = vcmp.ge.f32.partialorder %v1737_v2, 0.0  ;;  %v1805_v44 = vmul.f32 0.2, %v1737_v2  ;;  %v1395_v5 = vadd.f32 %v1344_v4, %v3075_v53  ;;  %v2531_v7 = vpop.f32.mrb[125].mxu0 }
 0x1e6   : > { %v2251_v30 = vpack.c.bf16 %v1838_v23, %v1838_v23  ;;  %v1347_v33 = vpop.f32.mrb[126].mxu0  ;;  %v1654_v10 = vpop.f32.mrb[128].mxu1 }
 0x1e7   : > { %v1839_v11 = vsel %vm1771_vm1, %v1737_v2, %v1805_v44  ;;  %v1697_v16 = vadd.f32 %v1646_v54, %v1395_v5  ;;  %v1396_v38 = vadd.f32 %v1347_v33, %v3077_v60  ;;  %v2532_v59 = vpop.f32.mrb[127].mxu0  ;;  %v2605_v17 = vpop.f32.mrb[129].mxu1 }
 0x1e8   : > { %2009 = vst.msk [vmem:[%s3100_s4 + $0x68] sm:$0xf] %vm1982_vm5, %v2251_v30  ;;  %v2252_v9 = vpack.c.bf16 %v1839_v11, %v1839_v11  ;;  %v1657_v18 = vpop.f32.mrb[130].mxu1 }
 0x1e9   : > { %v1738_v8 = vadd.f32 %v3091_v47, %v1697_v16  ;;  %v1698_v34 = vadd.f32 %v1649_v57, %v1396_v38  ;;  %v2606_v1 = vpop.f32.mrb[131].mxu1 }
 0x1ea   : > { %2010 = vst.msk [vmem:[%s3100_s4 + $0x6c] sm:$0xf] %vm1982_vm5, %v2252_v9 }
 0x1eb   : > { %vm1772_vm2 = vcmp.ge.f32.partialorder %v1738_v8, 0.0  ;;  %v1806_v53 = vmul.f32 0.2, %v1738_v8  ;;  %v1739_v15 = vadd.f32 %v3091_v47, %v1698_v34 }
 0x1ec   : > { %v1352_v13 = vpop.f32.mrb[128].mxu0 }
 0x1ed   : > { %v1840_v3 = vsel %vm1772_vm2, %v1738_v8, %v1806_v53  ;;  %vm1773_vm3 = vcmp.ge.f32.partialorder %v1739_v15, 0.0  ;;  %v1807_v60 = vmul.f32 0.2, %v1739_v15  ;;  %v1397_v19 = vadd.f32 %v1352_v13, %v3079_v6  ;;  %v2535_v42 = vpop.f32.mrb[129].mxu0 }
 0x1ee   : > { %v2253_v25 = vpack.c.bf16 %v1840_v3, %v1840_v3  ;;  %v1355_v27 = vpop.f32.mrb[130].mxu0  ;;  %v1662_v29 = vpop.f32.mrb[132].mxu1 }
 0x1ef   : > { %v1841_v32 = vsel %vm1773_vm3, %v1739_v15, %v1807_v60  ;;  %v1699_v35 = vadd.f32 %v1654_v10, %v1397_v19  ;;  %v1398_v46 = vadd.f32 %v1355_v27, %v3081_v12  ;;  %v2536_v36 = vpop.f32.mrb[131].mxu0  ;;  %v2609_v39 = vpop.f32.mrb[133].mxu1 }
 0x1f0   : > { %2011 = vst.msk [vmem:[%s3100_s4 + $0x70] sm:$0xf] %vm1982_vm5, %v2253_v25  ;;  %v2254_v40 = vpack.c.bf16 %v1841_v32, %v1841_v32  ;;  %v1665_v51 = vpop.f32.mrb[134].mxu1 }
 0x1f1   : > { %v1740_v43 = vadd.f32 %v3091_v47, %v1699_v35  ;;  %v1700_v41 = vadd.f32 %v1657_v18, %v1398_v46  ;;  %v2610_v22 = vpop.f32.mrb[135].mxu1 }
 0x1f2   : > { %2012 = vst.msk [vmem:[%s3100_s4 + $0x74] sm:$0xf] %vm1982_vm5, %v2254_v40 }
 0x1f3   : > { %vm1774_vm4 = vcmp.ge.f32.partialorder %v1740_v43, 0.0  ;;  %v1808_v6 = vmul.f32 0.2, %v1740_v43  ;;  %v1741_v45 = vadd.f32 %v3091_v47, %v1700_v41 }
 0x1f4   : > { %v1360_v49 = vpop.f32.mrb[132].mxu0 }
 0x1f5   : > { %v1842_v12 = vsel %vm1774_vm4, %v1740_v43, %v1808_v6  ;;  %vm1775_vm6 = vcmp.ge.f32.partialorder %v1741_v45, 0.0  ;;  %v1809_v20 = vmul.f32 0.2, %v1741_v45  ;;  %v1399_v28 = vadd.f32 %v1360_v49, %v3083_v24  ;;  %v2539_v50 = vpop.f32.mrb[133].mxu0 }
 0x1f6   : > { %v2255_v48 = vpack.c.bf16 %v1842_v12, %v1842_v12  ;;  %v1363_v14 = vpop.f32.mrb[134].mxu0 }
 0x1f7   : > { %v1843_v26 = vsel %vm1775_vm6, %v1741_v45, %v1809_v20  ;;  %v1701_v54 = vadd.f32 %v1662_v29, %v1399_v28  ;;  %v1400_v52 = vadd.f32 %v1363_v14, %v3085_v31  ;;  %v2540_v55 = vpop.f32.mrb[135].mxu0 }
 0x1f8   : > { %2013 = vst.msk [vmem:[%s3100_s4 + $0x78] sm:$0xf] %vm1982_vm5, %v2255_v48  ;;  %v2256_v56 = vpack.c.bf16 %v1843_v26, %v1843_v26 }
 0x1f9   : > { %v1742_v62 = vadd.f32 %v3091_v47, %v1701_v54  ;;  %v1702_v21 = vadd.f32 %v1665_v51, %v1400_v52 }
 0x1fa   : > { %2014 = vst.msk [vmem:[%s3100_s4 + $0x7c] sm:$0xf] %vm1982_vm5, %v2256_v56 }
 0x1fb   : > { %vm1776_vm7 = vcmp.ge.f32.partialorder %v1742_v62, 0.0  ;;  %v1810_v24 = vmul.f32 0.2, %v1742_v62  ;;  %v1743_v58 = vadd.f32 %v3091_v47, %v1702_v21 }
 0x1fd   : > { %v1844_v57 = vsel %vm1776_vm7, %v1742_v62, %v1810_v24  ;;  %vm1777_vm8 = vcmp.ge.f32.partialorder %v1743_v58, 0.0  ;;  %v1811_v63 = vmul.f32 0.2, %v1743_v58 }
 0x1fe   : > { %v2257_v61 = vpack.c.bf16 %v1844_v57, %v1844_v57 }
 0x1ff   : > { %v1845_v0 = vsel %vm1777_vm8, %v1743_v58, %v1811_v63 }
 0x200   : > { %2015 = vst.msk [vmem:[%s3100_s4 + $0x80] sm:$0xf] %vm1982_vm5, %v2257_v61  ;;  %v2258_v31 = vpack.c.bf16 %v1845_v0, %v1845_v0 }
 0x202   : > { %2016 = vst.msk [vmem:[%s3100_s4 + $0x84] sm:$0xf] %vm1982_vm5, %v2258_v31 }
 0x203 PF: > { %s13_s12 = sadd.s32 1, %s2670_s12  }
 0x204   : > { %p10_p4 = scmp.ge.s32.totalorder %s13_s12, 4  }
 0x206   :  { %12 = sbr.rel (!%p10_p4) target bundleno = 1 (0x1), region = 62 }

// kernel: _lambda_.6
= control target key start
LH: loop header
LB: loop body
LE: loop exit
PB: predicated region body
PF: predicated region fallthrough
CT: control target
= control target key end

     0   :  { %s1266_s12 = smov 0   ;;  %s1513_s0 = inlined_call_operand.vmem [shape: bf16[2,90,64], index: 0, kind: input, shape index: {}]   ;;  %s1514_s1 = inlined_call_operand.vmem [shape: bf16[256,32], index: 1, kind: input, shape index: {}]   ;;  %s1515_s2 = inlined_call_operand.vmem [shape: f32[1,32], index: 2, kind: input, shape index: {}]   ;;  %s1516_s3 = inlined_call_operand.vmem [shape: bf16[2,72,32], index: 3, kind: output, shape index: {}]  }
   0x1 LB: > { %s972_s13 = sadd.s32 4294967295, %s1242_s12   ;;  %p976_p0 = scmp.ge.s32.totalorder %s1242_s12, 1  ;;  %s1242_s12 = sphi %s1266_s12, %s13_s12  }
   0x2   : > { %p137_p1 = scmp.lt.s32.totalorder %s1242_s12, 3 }
   0x4   : > { %p138_p2 = pnand %p976_p0, %p137_p1 }
   0x5   : > { %v1208_v0 = vld [vmem:[%s1514_s1 + $0x20] sm:$0xff] (!%p138_p2)   ;;  %v1244_v1 = vmov (!%p138_p2), 0.0   ;;  %v1210_v3 = vld [vmem:[%s1514_s1 + $0x28] sm:$0xff] (!%p138_p2)   ;;  %vm1245_vm0 = vmmov (!%p138_p2), 0   ;;  %p161_p3 = scmp.lt.s32.totalorder (!%p138_p2), %s972_s13, 1  ;;  %v1212_v5 = vld [vmem:[%s1514_s1 + $0x30] sm:$0xff] (!%p138_p2)  }
   0x6   : > { %141 = sbr.rel (%p138_p2) target bundleno = 321 (0x141), region = 32  ;;  %1084 = vmatprep.subr.bf16.mxu0 (!%p138_p2), %v1244_v1  ;;  %1112 = vmatprep.subr.bf16.mxu1 (!%p138_p2), %v1244_v1  ;;  %v1209_v2 = vld [vmem:[%s1514_s1] sm:$0xff] (!%p138_p2)   ;;  %v1211_v4 = vld [vmem:[%s1514_s1 + $0x8] sm:$0xff] (!%p138_p2)   ;;  %v1213_v6 = vld [vmem:[%s1514_s1 + $0x10] sm:$0xff] (!%p138_p2)   ;;  %vm287_vm1 = vcmask (!%p138_p2), 523264   ;;  %vm697_vm3 = vcmask (!%p138_p2), 1046528  }
   0x7   : > { %1085 = vmatpush3.bf16.msra.mxu0 (!%p138_p2), %v1208_v0  ;;  %1092 = vmatprep.mubr.msk.bf16.mxu0 (!%p138_p2), %vm1245_vm0, %v1244_v1  ;;  %v1214_v7 = vld [vmem:[%s1514_s1 + $0x38] sm:$0xff] (!%p138_p2)   ;;  %vm223_vm2 = vsmask.f32 (!%p138_p2), 7424  ;;  %v1219_v17 = vld [vmem:[%s1514_s1 + $0x60] sm:$0xff] (!%p138_p2)   ;;  %v1221_v24 = vld [vmem:[%s1514_s1 + $0x48] sm:$0xff] (!%p138_p2)   ;;  %vm907_vm5 = vcmask (!%p138_p2), 257024  }
   0x8   : > { %1113 = vmatpush3.bf16.msra.mxu1 (!%p138_p2), %v1209_v2  ;;  %1086 = vmatprep.subr.bf16.mxu0 (!%p138_p2), %v1244_v1  ;;  %v1215_v10 = vld [vmem:[%s1514_s1 + $0x18] sm:$0xff] (!%p138_p2)   ;;  %v1218_v20 = vld [vmem:[%s1514_s1 + $0x40] sm:$0xff] (!%p138_p2)   ;;  %v1222_v25 = vld [vmem:[%s1514_s1 + $0x68] sm:$0xff] (!%p138_p2)  }
   0x9   : > { %1114 = vmatprep.subr.bf16.mxu1 (!%p138_p2), %v1244_v1  ;;  %1120 = vmatprep.mubr.msk.bf16.mxu1 (!%p138_p2), %vm1245_vm0, %v1244_v1  ;;  %v1224_v29 = vld [vmem:[%s1514_s1 + $0x50] sm:$0xff] (!%p138_p2)   ;;  %v1227_v39 = vld [vmem:[%s1514_s1 + $0x58] sm:$0xff] (!%p138_p2)  }
   0xa   : > { %v1225_v32 = vld [vmem:[%s1514_s1 + $0x70] sm:$0xff] (!%p138_p2)   ;;  %v1229_v41 = vld [vmem:[%s1514_s1 + $0x78] sm:$0xff] (!%p138_p2)  }
   0xb   : > { %1087 = vmatpush3.bf16.msra.mxu0 (!%p138_p2), %v1210_v3 }
   0xc   : > { %1115 = vmatpush3.bf16.msra.mxu1 (!%p138_p2), %v1211_v4  ;;  %1088 = vmatprep.subr.bf16.mxu0 (!%p138_p2), %v1244_v1 }
   0xd   : > { %s1518_s13 = smov (!%p161_p3, %s972_s13), 1  ;;  %1116 = vmatprep.subr.bf16.mxu1 %v1244_v1 }
   0xe   : > { %s1196_s24 = smul.u32 48, %s1518_s13 }
   0xf   : > { %1089 = vmatpush3.bf16.msra.mxu0 %v1212_v5  ;;  %s1197_s27 = smul.u32 36, %s1518_s13 }
  0x10   : > { %s1311_s4 = scalar_lea.vmem %s1513_s0, %s1196_s24  ;;  %1117 = vmatpush3.bf16.msra.mxu1 %v1213_v6  ;;  %1090 = vmatprep.subr.bf16.mxu0 %v1244_v1 }
  0x11   : > { %v1216_v8 = vld [vmem:[%s1311_s4] sm:$0xff]   ;;  %v1217_v9 = vld [vmem:[%s1311_s4 + $0x8] sm:$0xff]   ;;  %1118 = vmatprep.subr.bf16.mxu1 %v1244_v1  ;;  %v1321_v14 = vld [vmem:[%s1311_s4 + $0x10] sm:$0xff]   ;;  %s1477_s30 = scalar_lea.vmem %s1516_s3, %s1197_s27 }
  0x12   : > { %v225_v11 = vshrl.u32 %v1216_v8, 16  ;;  %v227_v12 = vshll.u32 %v1216_v8, 16  ;;  %v232_v13 = vshll.u32 %v1217_v9, 16  ;;  %v240_v18 = vshll.u32 %v1321_v14, 16  ;;  %v1223_v26 = vld [vmem:[%s1311_s4 + $0x18] sm:$0xff]   ;;  %v1231_v59 = vld [vmem:[%s1311_s4 + $0xc] sm:$0xff]  }
  0x13   : > { %1091 = vmatpush3.bf16.msra.mxu0 %v1214_v7  ;;  %v236_v21 = vshrl.u32 %v1217_v9, 16  ;;  %v244_v28 = vshrl.u32 %v1321_v14, 16  ;;  %v248_v31 = vshll.u32 %v1223_v26, 16  ;;  %v180_v33 = vld [vmem:[%s1311_s4 + $0x20] sm:$0xf]  ;;  %v252_v47 = vshrl.u32 %v1223_v26, 16 }
  0x14   : > { %v229_v15 = vrot.slane %v227_v12, 1  ;;  %v234_v16 = vrot.slane %v232_v13, 1  ;;  %1119 = vmatpush3.bf16.msra.mxu1 %v1215_v10  ;;  %1140 = vmatprep.subr.bf16.mxu0 %v1244_v1  ;;  %v242_v23 = vrot.slane %v240_v18, 1  ;;  %v189_v34 = vld [vmem:[%s1311_s4 + $0x24] sm:$0x1]  ;;  %v1362_v35 = vld [vmem:[%s1311_s4 + $0x1c] sm:$0xff]   ;;  %v993_v62 = vcombine.low %v180_v33, %v180_v33 }
  0x15   : > { %1168 = vmatprep.subr.bf16.mxu1 %v1244_v1  ;;  %v250_v37 = vrot.slane %v248_v31, 1  ;;  %v983_v38 = vcombine.low %v180_v33, %v189_v34  ;;  %v550_v40 = vshll.u32 %v1362_v35, 16  ;;  %v1378_v42 = vld [vmem:[%s1311_s4 + $0x24] sm:$0x1f]   ;;  %v554_v44 = vshrl.u32 %v1362_v35, 16 }
  0x16   : > { %v230_v19 = vor.u32 %v229_v15, %v225_v11  ;;  %v238_v27 = vor.u32 %v236_v21, %v234_v16  ;;  %v246_v36 = vor.u32 %v244_v28, %v242_v23  ;;  %v558_v45 = vshll.u32 %v1378_v42, 16  ;;  %v483_v54 = vld [vmem:[%s1311_s4 + $0x4] sm:$0xf]  ;;  %v484_v55 = vld [vmem:[%s1311_s4 + $0x8] sm:$0xf] }
  0x17   : > { %1121 = vmatmul.mubr.msk.bf16.vlgmr.msra.gmra.mrb[0].mxu1 %vm287_vm1, %v1216_v8  ;;  %v1381_v43 = vrot.slane %v550_v40, 1  ;;  %v256_v48 = vshll.u32 %v983_v38, 16  ;;  %v254_v52 = vor.u32 %v252_v47, %v250_v37  ;;  %v1003_v57 = vcombine.low %v483_v54, %v484_v55  ;;  %v685_v61 = vld [vmem:[%s1311_s4 + $0x4] sm:$0xe] }
  0x18   : > { %v235_v22 = vsel %vm223_vm2, %v230_v19, %v234_v16  ;;  %1169 = vmatpush3.bf16.msra.mxu1 %v1219_v17  ;;  %1124 = vmatprep.mubr.msk.bf16.mxu1 %vm1245_vm0, %v1244_v1  ;;  %v243_v30 = vsel %vm223_vm2, %v238_v27, %v242_v23  ;;  %v251_v46 = vsel %vm223_vm2, %v246_v36, %v250_v37  ;;  %v1387_v50 = vrot.slane %v558_v45, 1 }
  0x19   : > { %1093 = vmatmul.mubr.msk.bf16.vlgmr.msra.gmra.mrb[0].mxu0 %vm287_vm1, %v235_v22  ;;  %1170 = vmatprep.subr.bf16.mxu1 %v1244_v1  ;;  %v556_v49 = vor.u32 %v554_v44, %v1381_v43  ;;  %v258_v53 = vrot.slane %v256_v48, 1  ;;  %v260_v58 = vshrl.u32 %v983_v38, 16  ;;  %v529_v60 = vshll.u32 %v1003_v57, 16 }
  0x1a   : > { %1141 = vmatpush3.bf16.msra.mxu0 %v1218_v20  ;;  %1096 = vmatprep.mubr.msk.bf16.mxu0 %vm1245_vm0, %v1244_v1  ;;  %v1017_v0 = vcombine.low %v685_v61, %v484_v55  ;;  %v527_v2 = vshrl.u32 %v1003_v57, 16  ;;  %v534_v4 = vshll.u32 %v1231_v59, 16  ;;  %v699_v6 = vrot.slane %v1231_v59, 1 }
  0x1b   : > { %1142 = vmatprep.subr.bf16.mxu0 %v1244_v1  ;;  %v561_v51 = vsel %vm223_vm2, %v556_v49, %v1387_v50  ;;  %v259_v56 = vsel %vm223_vm2, %v254_v52, %v258_v53  ;;  %v262_v63 = vor.u32 %v260_v58, %v258_v53  ;;  %v531_v3 = vrot.slane %v529_v60, 1 }
  0x1c   : > { %1171 = vmatpush3.bf16.msra.mxu1 %v1222_v25  ;;  %v698_v5 = vrot.slane %v1017_v0, 1  ;;  %v536_v8 = vrot.slane %v534_v4, 1  ;;  %v538_v12 = vshrl.u32 %v1231_v59, 16  ;;  %v703_v20 = vrot.slane %v1362_v35, 1 }
  0x1d   : > { %1172 = vmatprep.subr.bf16.mxu1 %v1244_v1  ;;  %v532_v7 = vor.u32 %v531_v3, %v527_v2 }
  0x1e   : > { %1143 = vmatpush3.bf16.msra.mxu0 %v1221_v24  ;;  %v700_v10 = vsel %vm697_vm3, %v698_v5, %v699_v6  ;;  %v540_v15 = vor.u32 %v538_v12, %v536_v8  ;;  %v705_v24 = vrot.slane %v1378_v42, 1 }
  0x1f   : > { %1144 = vmatprep.subr.bf16.mxu0 %v1244_v1  ;;  %1125 = vmatmul.mubr.msk.bf16.gmra.mrb[4].mxu1 %vm287_vm1, %v1217_v9  ;;  %v1233_v9 = vld [vmem:[%s1311_s4 + $0x14] sm:$0xff]   ;;  %v537_v11 = vsel %vm223_vm2, %v532_v7, %v536_v8 }
  0x20   : > { %1128 = vmatprep.mubr.msk.bf16.mxu1 %vm1245_vm0, %v1244_v1  ;;  %1173 = vmatpush3.bf16.msra.mxu1 %v1225_v32  ;;  %v542_v13 = vshll.u32 %v1233_v9, 16  ;;  %v546_v19 = vshrl.u32 %v1233_v9, 16  ;;  %v706_v25 = vsel %vm697_vm3, %v703_v20, %v705_v24 }
  0x21   : > { %1097 = vmatmul.mubr.msk.bf16.gmra.mrb[4].mxu0 %vm287_vm1, %v243_v30  ;;  %1174 = vmatprep.subr.bf16.mxu1 %v1244_v1 }
  0x22   : > { %1100 = vmatprep.mubr.msk.bf16.mxu0 %vm1245_vm0, %v1244_v1  ;;  %1145 = vmatpush3.bf16.msra.mxu0 %v1224_v29  ;;  %v544_v16 = vrot.slane %v542_v13, 1 }
  0x23   : > { %1146 = vmatprep.subr.bf16.mxu0 %v1244_v1 }
  0x24   : > { %1175 = vmatpush3.bf16.msra.mxu1 %v1229_v41  ;;  %v545_v18 = vsel %vm223_vm2, %v540_v15, %v544_v16  ;;  %v548_v21 = vor.u32 %v546_v19, %v544_v16  ;;  %v1469_v19 = vld [vmem:[%s1515_s2] ss:$0 sm:$0xff] }
  0x26   : > { %1147 = vmatpush3.bf16.msra.mxu0 %v1227_v39  ;;  %v553_v23 = vsel %vm223_vm2, %v548_v21, %v1381_v43 }
  0x27   : > { %1129 = vmatmul.mubr.msk.bf16.gmra.mrb[8].mxu1 %vm287_vm1, %v1321_v14  ;;  %v701_v14 = vrot.slane %v1233_v9, 1 }
  0x28   : > { %1132 = vmatprep.mubr.msk.bf16.mxu1 %vm1245_vm0, %v1244_v1 }
  0x29   : > { %1101 = vmatmul.mubr.msk.bf16.gmra.mrb[8].mxu0 %vm287_vm1, %v251_v46  ;;  %v702_v17 = vsel %vm697_vm3, %v699_v6, %v701_v14  ;;  %v704_v22 = vsel %vm697_vm3, %v701_v14, %v703_v20 }
  0x2a   : > { %1104 = vmatprep.mubr.msk.bf16.mxu0 %vm1245_vm0, %v1244_v1 }
  0x2f   : > { %1133 = vmatmul.mubr.msk.bf16.gmra.mrb[12].mxu1 %vm287_vm1, %v1223_v26  ;;  %v562_v26 = vshrl.u32 %v1378_v42, 16 }
  0x30   : > { %1136 = vmatprep.mubr.msk.bf16.mxu1 %vm1245_vm0, %v1244_v1 }
  0x31   : > { %1105 = vmatmul.mubr.msk.bf16.gmra.mrb[12].mxu0 %vm287_vm1, %v259_v56  ;;  %v564_v27 = vor.u32 %v562_v26, %v1387_v50 }
  0x32   : > { %1108 = vmatprep.mubr.msk.bf16.mxu0 %vm1245_vm0, %v1244_v1 }
  0x37   : > { %1137 = vmatmul.mubr.msk.bf16.gmra.mrb[16].mxu1 %vm287_vm1, %v993_v62 }
  0x38   : > { %1176 = vmatprep.mubr.msk.bf16.mxu1 %vm1245_vm0, %v1244_v1 }
  0x39   : > { %1109 = vmatmul.mubr.msk.bf16.gmra.mrb[16].mxu0 %vm287_vm1, %v262_v63 }
  0x3a   : > { %1148 = vmatprep.mubr.msk.bf16.mxu0 %vm1245_vm0, %v1244_v1 }
  0x3f   : > { %1177 = vmatmul.mubr.msk.bf16.vlgmr.msra.gmra.mrb[20].mxu1 %vm287_vm1, %v700_v10 }
  0x40   : > { %1180 = vmatprep.mubr.msk.bf16.mxu1 %vm1245_vm0, %v1244_v1 }
  0x41   : > { %1149 = vmatmul.mubr.msk.bf16.vlgmr.msra.gmra.mrb[20].mxu0 %vm287_vm1, %v537_v11 }
  0x42   : > { %1152 = vmatprep.mubr.msk.bf16.mxu0 %vm1245_vm0, %v1244_v1 }
  0x47   : > { %1181 = vmatmul.mubr.msk.bf16.gmra.mrb[24].mxu1 %vm287_vm1, %v702_v17 }
  0x48   : > { %1184 = vmatprep.mubr.msk.bf16.mxu1 %vm1245_vm0, %v1244_v1 }
  0x49   : > { %1153 = vmatmul.mubr.msk.bf16.gmra.mrb[24].mxu0 %vm287_vm1, %v545_v18 }
  0x4a   : > { %1156 = vmatprep.mubr.msk.bf16.mxu0 %vm1245_vm0, %v1244_v1 }
  0x4f   : > { %1185 = vmatmul.mubr.msk.bf16.gmra.mrb[28].mxu1 %vm287_vm1, %v704_v22 }
  0x50   : > { %1188 = vmatprep.mubr.msk.bf16.mxu1 %vm1245_vm0, %v1244_v1 }
  0x51   : > { %1157 = vmatmul.mubr.msk.bf16.gmra.mrb[28].mxu0 %vm287_vm1, %v553_v23 }
  0x52   : > { %1160 = vmatprep.mubr.msk.bf16.mxu0 %vm1245_vm0, %v1244_v1 }
  0x57   : > { %1189 = vmatmul.mubr.msk.bf16.gmra.mrb[32].mxu1 %vm287_vm1, %v706_v25 }
  0x58   : > { %1192 = vmatprep.mubr.msk.bf16.mxu1 %vm1245_vm0, %v1244_v1 }
  0x59   : > { %1161 = vmatmul.mubr.msk.bf16.gmra.mrb[32].mxu0 %vm287_vm1, %v561_v51 }
  0x5a   : > { %1164 = vmatprep.mubr.msk.bf16.mxu0 %vm1245_vm0, %v1244_v1 }
  0x5f   : > { %1193 = vmatmul.mubr.msk.bf16.gmra.mrb[36].mxu1 %vm287_vm1, %v705_v24 }
  0x61   : > { %1165 = vmatmul.mubr.msk.bf16.gmra.mrb[36].mxu0 %vm287_vm1, %v564_v27 }
  0xea   : > { %v445_v28 = vpop.f32.mrb[0].mxu1 }
  0xeb   : > { %v1122_v30 = vpop.f32.mrb[1].mxu1 }
  0xec   : > { %v337_v29 = vpop.f32.mrb[0].mxu0  ;;  %v448_v33 = vpop.f32.mrb[2].mxu1 }
  0xed   : > { %v446_v31 = vadd.f32 %v445_v28, %v337_v29  ;;  %v1094_v32 = vpop.f32.mrb[1].mxu0  ;;  %v1123_v35 = vpop.f32.mrb[3].mxu1 }
  0xee   : > { %v340_v34 = vpop.f32.mrb[2].mxu0 }
  0xef   : > { %v449_v36 = vadd.f32 %v448_v33, %v340_v34  ;;  %v1095_v37 = vpop.f32.mrb[3].mxu0 }
  0xf2   : > { %v453_v38 = vpop.f32.mrb[4].mxu1 }
  0xf3   : > { %v1126_v40 = vpop.f32.mrb[5].mxu1 }
  0xf4   : > { %v345_v39 = vpop.f32.mrb[4].mxu0  ;;  %v456_v42 = vpop.f32.mrb[6].mxu1 }
  0xf5   : > { %v454_v1 = vadd.f32 %v453_v38, %v345_v39  ;;  %v1098_v41 = vpop.f32.mrb[5].mxu0  ;;  %v1127_v44 = vpop.f32.mrb[7].mxu1 }
  0xf6   : > { %v348_v43 = vpop.f32.mrb[6].mxu0 }
  0xf7   : > { %v1454_v45 = vadd.f32 %v456_v42, %v348_v43  ;;  %v1099_v46 = vpop.f32.mrb[7].mxu0 }
  0xfa   : > { %v461_v47 = vpop.f32.mrb[8].mxu1 }
  0xfb   : > { %v1130_v49 = vpop.f32.mrb[9].mxu1 }
  0xfc   : > { %v353_v48 = vpop.f32.mrb[8].mxu0  ;;  %v464_v52 = vpop.f32.mrb[10].mxu1 }
  0xfd   : > { %v1456_v50 = vadd.f32 %v461_v47, %v353_v48  ;;  %v1102_v51 = vpop.f32.mrb[9].mxu0  ;;  %v1131_v54 = vpop.f32.mrb[11].mxu1 }
  0xfe   : > { %v356_v53 = vpop.f32.mrb[10].mxu0 }
  0xff   : > { %v1458_v55 = vadd.f32 %v464_v52, %v356_v53  ;;  %v1103_v56 = vpop.f32.mrb[11].mxu0 }
 0x102   : > { %v469_v57 = vpop.f32.mrb[12].mxu1 }
 0x103   : > { %v1134_v59 = vpop.f32.mrb[13].mxu1 }
 0x104   : > { %v361_v58 = vpop.f32.mrb[12].mxu0  ;;  %v472_v62 = vpop.f32.mrb[14].mxu1 }
 0x105   : > { %v1460_v60 = vadd.f32 %v469_v57, %v361_v58  ;;  %v1106_v61 = vpop.f32.mrb[13].mxu0  ;;  %v1135_v0 = vpop.f32.mrb[15].mxu1 }
 0x106   : > { %v364_v63 = vpop.f32.mrb[14].mxu0 }
 0x107   : > { %v1462_v2 = vadd.f32 %v472_v62, %v364_v63  ;;  %v1107_v3 = vpop.f32.mrb[15].mxu0 }
 0x10a   : > { %v477_v4 = vpop.f32.mrb[16].mxu1 }
 0x10b   : > { %v1138_v6 = vpop.f32.mrb[17].mxu1 }
 0x10c   : > { %v369_v5 = vpop.f32.mrb[16].mxu0  ;;  %v480_v9 = vpop.f32.mrb[18].mxu1 }
 0x10d   : > { %v1464_v7 = vadd.f32 %v477_v4, %v369_v5  ;;  %v1110_v8 = vpop.f32.mrb[17].mxu0  ;;  %v1139_v11 = vpop.f32.mrb[19].mxu1 }
 0x10e   : > { %v372_v10 = vpop.f32.mrb[18].mxu0 }
 0x10f   : > { %v1111_v12 = vpop.f32.mrb[19].mxu0 }
 0x112   : > { %v780_v13 = vpop.f32.mrb[20].mxu1 }
 0x113   : > { %v1178_v15 = vpop.f32.mrb[21].mxu1 }
 0x114   : > { %v638_v14 = vpop.f32.mrb[20].mxu0  ;;  %v783_v18 = vpop.f32.mrb[22].mxu1 }
 0x115   : > { %v676_v16 = vadd.f32 %v638_v14, %v446_v31  ;;  %v1150_v17 = vpop.f32.mrb[21].mxu0  ;;  %v1179_v21 = vpop.f32.mrb[23].mxu1 }
 0x116   : > { %v641_v20 = vpop.f32.mrb[22].mxu0 }
 0x117   : > { %v818_v22 = vadd.f32 %v780_v13, %v676_v16  ;;  %v677_v23 = vadd.f32 %v641_v20, %v449_v36  ;;  %v1151_v24 = vpop.f32.mrb[23].mxu0 }
 0x119   : > { %v834_v25 = vadd.f32 %v1469_v19, %v818_v22  ;;  %v819_v26 = vadd.f32 %v783_v18, %v677_v23 }
 0x11a   : > { %v788_v29 = vpop.f32.mrb[24].mxu1 }
 0x11b   : > { %vm843_vm4 = vcmp.ge.f32.partialorder %v834_v25, 0.0  ;;  %v852_v27 = vmul.f32 0.2, %v834_v25  ;;  %v835_v28 = vadd.f32 %v1469_v19, %v819_v26  ;;  %v1182_v31 = vpop.f32.mrb[25].mxu1 }
 0x11c   : > { %v646_v30 = vpop.f32.mrb[24].mxu0  ;;  %v791_v36 = vpop.f32.mrb[26].mxu1 }
 0x11d   : > { %v861_v32 = vsel %vm843_vm4, %v834_v25, %v852_v27  ;;  %vm844_vm6 = vcmp.ge.f32.partialorder %v835_v28, 0.0  ;;  %v853_v33 = vmul.f32 0.2, %v835_v28  ;;  %v678_v34 = vadd.f32 %v646_v30, %v454_v1  ;;  %v1154_v35 = vpop.f32.mrb[25].mxu0  ;;  %v1183_v39 = vpop.f32.mrb[27].mxu1 }
 0x11e   : > { %v1039_v37 = vpack.c.bf16 %v861_v32, %v861_v32  ;;  %v649_v38 = vpop.f32.mrb[26].mxu0 }
 0x11f   : > { %v862_v40 = vsel %vm844_vm6, %v835_v28, %v853_v33  ;;  %v820_v41 = vadd.f32 %v788_v29, %v678_v34  ;;  %v679_v42 = vadd.f32 %v649_v38, %v1454_v45  ;;  %v1155_v43 = vpop.f32.mrb[27].mxu0 }
 0x120   : > { %908 = vst.msk [vmem:[%s1477_s30] sm:$0xf] %vm907_vm5, %v1039_v37  ;;  %v1040_v44 = vpack.c.bf16 %v862_v40, %v862_v40 }
 0x121   : > { %v836_v46 = vadd.f32 %v1469_v19, %v820_v41  ;;  %v821_v47 = vadd.f32 %v791_v36, %v679_v42 }
 0x122   : > { %909 = vst.msk [vmem:[%s1477_s30 + $0x4] sm:$0xf] %vm907_vm5, %v1040_v44  ;;  %v796_v49 = vpop.f32.mrb[28].mxu1 }
 0x123   : > { %vm845_vm7 = vcmp.ge.f32.partialorder %v836_v46, 0.0  ;;  %v854_v1 = vmul.f32 0.2, %v836_v46  ;;  %v837_v48 = vadd.f32 %v1469_v19, %v821_v47  ;;  %v1186_v52 = vpop.f32.mrb[29].mxu1 }
 0x124   : > { %v654_v51 = vpop.f32.mrb[28].mxu0  ;;  %v799_v57 = vpop.f32.mrb[30].mxu1 }
 0x125   : > { %v863_v53 = vsel %vm845_vm7, %v836_v46, %v854_v1  ;;  %vm846_vm8 = vcmp.ge.f32.partialorder %v837_v48, 0.0  ;;  %v855_v45 = vmul.f32 0.2, %v837_v48  ;;  %v680_v54 = vadd.f32 %v654_v51, %v1456_v50  ;;  %v1158_v56 = vpop.f32.mrb[29].mxu0  ;;  %v1187_v61 = vpop.f32.mrb[31].mxu1 }
 0x126   : > { %v1041_v58 = vpack.c.bf16 %v863_v53, %v863_v53  ;;  %v657_v59 = vpop.f32.mrb[30].mxu0 }
 0x127   : > { %v864_v62 = vsel %vm846_vm8, %v837_v48, %v855_v45  ;;  %v822_v63 = vadd.f32 %v796_v49, %v680_v54  ;;  %v681_v0 = vadd.f32 %v657_v59, %v1458_v55  ;;  %v1159_v3 = vpop.f32.mrb[31].mxu0 }
 0x128   : > { %910 = vst.msk [vmem:[%s1477_s30 + $0x8] sm:$0xf] %vm907_vm5, %v1041_v58  ;;  %v1042_v4 = vpack.c.bf16 %v864_v62, %v864_v62 }
 0x129   : > { %v838_v5 = vadd.f32 %v1469_v19, %v822_v63  ;;  %v823_v6 = vadd.f32 %v799_v57, %v681_v0 }
 0x12a   : > { %911 = vst.msk [vmem:[%s1477_s30 + $0xc] sm:$0xf] %vm907_vm5, %v1042_v4  ;;  %v804_v9 = vpop.f32.mrb[32].mxu1 }
 0x12b   : > { %vm847_vm9 = vcmp.ge.f32.partialorder %v838_v5, 0.0  ;;  %v856_v50 = vmul.f32 0.2, %v838_v5  ;;  %v839_v8 = vadd.f32 %v1469_v19, %v823_v6  ;;  %v1190_v11 = vpop.f32.mrb[33].mxu1 }
 0x12c   : > { %v662_v10 = vpop.f32.mrb[32].mxu0  ;;  %v807_v15 = vpop.f32.mrb[34].mxu1 }
 0x12d   : > { %v865_v12 = vsel %vm847_vm9, %v838_v5, %v856_v50  ;;  %vm848_vm10 = vcmp.ge.f32.partialorder %v839_v8, 0.0  ;;  %v857_v55 = vmul.f32 0.2, %v839_v8  ;;  %v682_v13 = vadd.f32 %v662_v10, %v1460_v60  ;;  %v1162_v14 = vpop.f32.mrb[33].mxu0  ;;  %v1191_v18 = vpop.f32.mrb[35].mxu1 }
 0x12e   : > { %v1043_v16 = vpack.c.bf16 %v865_v12, %v865_v12  ;;  %v665_v17 = vpop.f32.mrb[34].mxu0 }
 0x12f   : > { %v866_v20 = vsel %vm848_vm10, %v839_v8, %v857_v55  ;;  %v824_v21 = vadd.f32 %v804_v9, %v682_v13  ;;  %v683_v22 = vadd.f32 %v665_v17, %v1462_v2  ;;  %v1163_v23 = vpop.f32.mrb[35].mxu0 }
 0x130   : > { %912 = vst.msk [vmem:[%s1477_s30 + $0x10] sm:$0xf] %vm907_vm5, %v1043_v16  ;;  %v1044_v24 = vpack.c.bf16 %v866_v20, %v866_v20 }
 0x131   : > { %v840_v25 = vadd.f32 %v1469_v19, %v824_v21  ;;  %v825_v26 = vadd.f32 %v807_v15, %v683_v22 }
 0x132   : > { %913 = vst.msk [vmem:[%s1477_s30 + $0x14] sm:$0xf] %vm907_vm5, %v1044_v24  ;;  %v812_v28 = vpop.f32.mrb[36].mxu1 }
 0x133   : > { %vm849_vm11 = vcmp.ge.f32.partialorder %v840_v25, 0.0  ;;  %v858_v60 = vmul.f32 0.2, %v840_v25  ;;  %v841_v27 = vadd.f32 %v1469_v19, %v825_v26  ;;  %v1194_v30 = vpop.f32.mrb[37].mxu1 }
 0x134   : > { %v670_v29 = vpop.f32.mrb[36].mxu0  ;;  %v815_v34 = vpop.f32.mrb[38].mxu1 }
 0x135   : > { %v867_v31 = vsel %vm849_vm11, %v840_v25, %v858_v60  ;;  %vm850_vm12 = vcmp.ge.f32.partialorder %v841_v27, 0.0  ;;  %v859_v2 = vmul.f32 0.2, %v841_v27  ;;  %v684_v32 = vadd.f32 %v670_v29, %v1464_v7  ;;  %v1166_v33 = vpop.f32.mrb[37].mxu0  ;;  %v1195_v37 = vpop.f32.mrb[39].mxu1 }
 0x136   : > { %v1045_v35 = vpack.c.bf16 %v867_v31, %v867_v31  ;;  %v673_v36 = vpop.f32.mrb[38].mxu0 }
 0x137   : > { %v868_v38 = vsel %vm850_vm12, %v841_v27, %v859_v2  ;;  %v826_v39 = vadd.f32 %v812_v28, %v684_v32  ;;  %v1167_v40 = vpop.f32.mrb[39].mxu0 }
 0x138   : > { %914 = vst.msk [vmem:[%s1477_s30 + $0x18] sm:$0xf] %vm907_vm5, %v1045_v35  ;;  %v1046_v41 = vpack.c.bf16 %v868_v38, %v868_v38 }
 0x139   : > { %v842_v42 = vadd.f32 %v1469_v19, %v826_v39 }
 0x13a   : > { %915 = vst.msk [vmem:[%s1477_s30 + $0x1c] sm:$0xf] %vm907_vm5, %v1046_v41 }
 0x13b   : > { %vm851_vm13 = vcmp.ge.f32.partialorder %v842_v42, 0.0  ;;  %v860_v43 = vmul.f32 0.2, %v842_v42 }
 0x13d   : > { %v869_v44 = vsel %vm851_vm13, %v842_v42, %v860_v43 }
 0x13e   : > { %v1047_v7 = vpack.c.bf16 %v869_v44, %v869_v44 }
 0x140   : > { %916 = vst.msk [vmem:[%s1477_s30 + $0x20] sm:$0xf] %vm907_vm5, %v1047_v7 }
 0x141 PF: > { %s13_s12 = sadd.s32 1, %s1242_s12  }
 0x142   : > { %p10_p4 = scmp.ge.s32.totalorder %s13_s12, 4  }
 0x144   :  { %12 = sbr.rel (!%p10_p4) target bundleno = 1 (0x1), region = 62 }

// kernel: _lambda_.7
= control target key start
LH: loop header
LB: loop body
LE: loop exit
PB: predicated region body
PF: predicated region fallthrough
CT: control target
= control target key end

     0   :  { %s1048_s12 = smov 0   ;;  %s1178_s0 = inlined_call_operand.vmem [shape: bf16[2,30,128], index: 0, kind: input, shape index: {}]   ;;  %s1179_s1 = inlined_call_operand.vmem [shape: bf16[512,64], index: 1, kind: input, shape index: {}]   ;;  %s1180_s2 = inlined_call_operand.vmem [shape: f32[1,64], index: 2, kind: input, shape index: {}]   ;;  %s1181_s3 = inlined_call_operand.vmem [shape: bf16[2,20,64], index: 3, kind: output, shape index: {}]  }
   0x1 LB: > { %s797_s13 = sadd.s32 4294967295, %s1026_s12   ;;  %p801_p0 = scmp.ge.s32.totalorder %s1026_s12, 1  ;;  %s1026_s12 = sphi %s1048_s12, %s13_s12  }
   0x2   : > { %p137_p1 = scmp.lt.s32.totalorder %s1026_s12, 3 }
   0x4   : > { %p138_p2 = pnand %p801_p0, %p137_p1 }
   0x5   : > { %v982_v0 = vld [vmem:[%s1179_s1 + $0x40] sm:$0xff] (!%p138_p2)   ;;  %v984_v2 = vld [vmem:[%s1179_s1 + $0x48] sm:$0xff] (!%p138_p2)   ;;  %p161_p3 = scmp.lt.s32.totalorder (!%p138_p2), %s797_s13, 1  ;;  %v986_v4 = vld [vmem:[%s1179_s1 + $0x50] sm:$0xff] (!%p138_p2)   ;;  %vm216_vm0 = vsmask.f32 (!%p138_p2), 7424 }
   0x6   : > { %141 = sbr.rel (%p138_p2) target bundleno = 297 (0x129), region = 32  ;;  %v983_v1 = vld [vmem:[%s1179_s1] sm:$0xff] (!%p138_p2)   ;;  %893 = vmatprep.subr.bf16.mxu0 (!%p138_p2), %v982_v0  ;;  %v985_v3 = vld [vmem:[%s1179_s1 + $0x8] sm:$0xff] (!%p138_p2)   ;;  %v987_v5 = vld [vmem:[%s1179_s1 + $0x10] sm:$0xff] (!%p138_p2)   ;;  %vm600_vm1 = vcmask (!%p138_p2), 1044480   ;;  %vm740_vm5 = vcmask (!%p138_p2), 517120  }
   0x7   : > { %913 = vmatprep.subr.bf16.mxu1 (!%p138_p2), %v983_v1  ;;  %894 = vmatpush3.bf16.msra.mxu0 (!%p138_p2), %v982_v0  ;;  %v988_v6 = vld [vmem:[%s1179_s1 + $0x58] sm:$0xff] (!%p138_p2)   ;;  %v990_v8 = vld [vmem:[%s1179_s1 + $0x60] sm:$0xff] (!%p138_p2)   ;;  %v992_v10 = vld [vmem:[%s1179_s1 + $0x68] sm:$0xff] (!%p138_p2)   ;;  %vm461_vm2 = vsmask.f32 (!%p138_p2), 5376  ;;  %vm737_vm6 = vcmask (!%p138_p2), 519168  }
   0x8   : > { %914 = vmatpush3.bf16.msra.mxu1 (!%p138_p2), %v983_v1  ;;  %895 = vmatprep.subr.bf16.mxu0 (!%p138_p2), %v984_v2  ;;  %v989_v7 = vld [vmem:[%s1179_s1 + $0x18] sm:$0xff] (!%p138_p2)   ;;  %v991_v9 = vld [vmem:[%s1179_s1 + $0x20] sm:$0xff] (!%p138_p2)   ;;  %v993_v11 = vld [vmem:[%s1179_s1 + $0x28] sm:$0xff] (!%p138_p2)  }
   0x9   : > { %915 = vmatprep.subr.bf16.mxu1 (!%p138_p2), %v985_v3  ;;  %v994_v14 = vld [vmem:[%s1179_s1 + $0x70] sm:$0xff] (!%p138_p2)   ;;  %v996_v22 = vld [vmem:[%s1179_s1 + $0x78] sm:$0xff] (!%p138_p2)   ;;  %v1001_v26 = vld [vmem:[%s1179_s1 + $0x80] sm:$0xff] (!%p138_p2)  }
   0xa   : > { %v995_v15 = vld [vmem:[%s1179_s1 + $0x30] sm:$0xff] (!%p138_p2)   ;;  %v997_v23 = vld [vmem:[%s1179_s1 + $0x38] sm:$0xff] (!%p138_p2)   ;;  %v1002_v28 = vld [vmem:[%s1179_s1 + $0xc0] sm:$0xff] (!%p138_p2)  }
   0xb   : > { %896 = vmatpush3.bf16.msra.mxu0 (!%p138_p2), %v984_v2  ;;  %v1003_v30 = vld [vmem:[%s1179_s1 + $0x88] sm:$0xff] (!%p138_p2)   ;;  %v1005_v32 = vld [vmem:[%s1179_s1 + $0x90] sm:$0xff] (!%p138_p2)   ;;  %v1007_v45 = vld [vmem:[%s1179_s1 + $0x98] sm:$0xff] (!%p138_p2)  }
   0xc   : > { %916 = vmatpush3.bf16.msra.mxu1 (!%p138_p2), %v985_v3  ;;  %897 = vmatprep.subr.bf16.mxu0 (!%p138_p2), %v986_v4  ;;  %v1004_v31 = vld [vmem:[%s1179_s1 + $0xc8] sm:$0xff] (!%p138_p2)   ;;  %v1006_v37 = vld [vmem:[%s1179_s1 + $0xd0] sm:$0xff] (!%p138_p2)   ;;  %v1008_v50 = vld [vmem:[%s1179_s1 + $0xd8] sm:$0xff] (!%p138_p2)  }
   0xd   : > { %s1183_s13 = smov (!%p161_p3, %s797_s13), 1  ;;  %917 = vmatprep.subr.bf16.mxu1 %v987_v5  ;;  %v1009_v55 = vld [vmem:[%s1179_s1 + $0xa0] sm:$0xff]   ;;  %v1011_v58 = vld [vmem:[%s1179_s1 + $0xa8] sm:$0xff]   ;;  %v1013_v60 = vld [vmem:[%s1179_s1 + $0xb0] sm:$0xff]  }
   0xe   : > { %s849_s30 = sshll.u32 %s1183_s13, 4  ;;  %v1010_v57 = vld [vmem:[%s1179_s1 + $0xe0] sm:$0xff]   ;;  %v1012_v59 = vld [vmem:[%s1179_s1 + $0xe8] sm:$0xff]   ;;  %v1014_v61 = vld [vmem:[%s1179_s1 + $0xf0] sm:$0xff]   ;;  %s973_s7 = smul.u32 12, %s1183_s13 }
   0xf   : > { %898 = vmatpush3.bf16.msra.mxu0 %v986_v4  ;;  %s1092_s10 = scalar_lea.vmem %s1178_s0, %s849_s30  ;;  %v1015_v62 = vld [vmem:[%s1179_s1 + $0xb8] sm:$0xff]  }
  0x10   : > { %918 = vmatpush3.bf16.msra.mxu1 %v987_v5  ;;  %899 = vmatprep.subr.bf16.mxu0 %v988_v6  ;;  %v998_v12 = vld [vmem:[%s1092_s10] sm:$0xff]   ;;  %v999_v13 = vld [vmem:[%s1092_s10 + $0x8] ss:$0 sps:$4 sm:$0x77]   ;;  %v1016_v63 = vld [vmem:[%s1179_s1 + $0xf8] sm:$0xff]   ;;  %s170_s11 = scalar_lea.vmem %s1181_s3, %s973_s7 }
  0x11   : > { %919 = vmatprep.subr.bf16.mxu1 %v989_v7  ;;  %v218_v16 = vshrl.u32 %v998_v12, 16  ;;  %v220_v17 = vshll.u32 %v998_v12, 16  ;;  %v225_v18 = vshll.u32 %v999_v13, 16  ;;  %929 = vmatprep.mubr.bf16.mxu1 %v998_v12  ;;  %v229_v25 = vshrl.u32 %v999_v13, 16  ;;  %v431_v33 = vld [vmem:[%s1092_s10] sm:$0xc] }
  0x12   : > { %v1000_v27 = vld [vmem:[%s1092_s10 + $0x8] ss:$0 sps:$4 sm:$0x33]   ;;  %v432_v34 = vld [vmem:[%s1092_s10 + $0x4] sm:$0xf] }
  0x13   : > { %900 = vmatpush3.bf16.msra.mxu0 %v988_v6  ;;  %v222_v19 = vrot.slane %v220_v17, 1  ;;  %v227_v20 = vrot.slane %v225_v18, 1  ;;  %v824_v35 = vcombine.low %v431_v33, %v432_v34  ;;  %v1018_v36 = vld [vmem:[%s1092_s10 + $0x8] sm:$0x1f]   ;;  %v580_v38 = vld [vmem:[%s1092_s10] sm:$0x8] }
  0x14   : > { %920 = vmatpush3.bf16.msra.mxu1 %v989_v7  ;;  %901 = vmatprep.subr.bf16.mxu0 %v990_v8  ;;  %v471_v41 = vshrl.u32 %v1018_v36, 16  ;;  %v474_v42 = vshll.u32 %v1018_v36, 16  ;;  %v834_v43 = vcombine.low %v580_v38, %v432_v34  ;;  %v602_v44 = vrot.slane %v1018_v36, 3 }
  0x15   : > { %921 = vmatprep.subr.bf16.mxu1 %v991_v9  ;;  %v223_v21 = vor.u32 %v222_v19, %v218_v16  ;;  %v231_v29 = vor.u32 %v229_v25, %v227_v20  ;;  %v463_v39 = vshrl.u32 %v824_v35, 16  ;;  %v466_v40 = vshll.u32 %v824_v35, 16 }
  0x16   : > { %v473_v48 = vrot.slane %v471_v41, 2  ;;  %v476_v49 = vrot.slane %v474_v42, 3  ;;  %v601_v51 = vrot.slane %v834_v43, 3 }
  0x17   : > { %902 = vmatpush3.bf16.msra.mxu0 %v990_v8  ;;  %v228_v24 = vsel %vm216_vm0, %v223_v21, %v227_v20  ;;  %v465_v46 = vrot.slane %v463_v39, 2  ;;  %v468_v47 = vrot.slane %v466_v40, 3 }
  0x18   : > { %922 = vmatpush3.bf16.msra.mxu1 %v991_v9  ;;  %903 = vmatprep.subr.bf16.mxu0 %v992_v10  ;;  %v477_v53 = vor.u32 %v476_v49, %v473_v48  ;;  %v603_v54 = vsel %vm600_vm1, %v601_v51, %v602_v44 }
  0x19   : > { %923 = vmatprep.subr.bf16.mxu1 %v993_v11  ;;  %909 = vmatprep.mubr.bf16.mxu0 %v228_v24  ;;  %v469_v52 = vor.u32 %v468_v47, %v465_v46 }
  0x1b   : > { %904 = vmatpush3.bf16.msra.mxu0 %v992_v10  ;;  %v478_v56 = vsel %vm461_vm2, %v469_v52, %v477_v53 }
  0x1c   : > { %924 = vmatpush3.bf16.msra.mxu1 %v993_v11  ;;  %905 = vmatprep.subr.bf16.mxu0 %v994_v14 }
  0x1d   : > { %925 = vmatprep.subr.bf16.mxu1 %v995_v15 }
  0x1f   : > { %906 = vmatpush3.bf16.msra.mxu0 %v994_v14 }
  0x20   : > { %926 = vmatpush3.bf16.msra.mxu1 %v995_v15  ;;  %907 = vmatprep.subr.bf16.mxu0 %v996_v22  ;;  %v843_v15 = vld [vmem:[%s1180_s2] ss:$0 sm:$0xff] }
  0x21   : > { %927 = vmatprep.subr.bf16.mxu1 %v997_v23 }
  0x23   : > { %908 = vmatpush3.bf16.msra.mxu0 %v996_v22 }
  0x24   : > { %928 = vmatpush3.bf16.msra.mxu1 %v997_v23  ;;  %933 = vmatprep.subr.bf16.mxu0 %v1001_v26 }
  0x25   : > { %953 = vmatprep.subr.bf16.mxu1 %v1002_v28 }
  0x26   : > { %910 = vmatmul.mubr.bf16.vlgmr.msra.gmra.mrb[0].mxu0 %v231_v29 }
  0x27   : > { %930 = vmatmul.mubr.bf16.vlgmr.msra.gmra.mrb[0].mxu1 %v1000_v27  ;;  %934 = vmatpush3.bf16.msra.mxu0 %v1001_v26 }
  0x28   : > { %954 = vmatpush3.bf16.msra.mxu1 %v1002_v28  ;;  %935 = vmatprep.subr.bf16.mxu0 %v1003_v30 }
  0x29   : > { %955 = vmatprep.subr.bf16.mxu1 %v1004_v31  ;;  %949 = vmatprep.mubr.bf16.mxu0 %v478_v56 }
  0x2a   : > { %969 = vmatprep.mubr.bf16.mxu1 %v603_v54 }
  0x2b   : > { %936 = vmatpush3.bf16.msra.mxu0 %v1003_v30 }
  0x2c   : > { %956 = vmatpush3.bf16.msra.mxu1 %v1004_v31  ;;  %937 = vmatprep.subr.bf16.mxu0 %v1005_v32 }
  0x2d   : > { %957 = vmatprep.subr.bf16.mxu1 %v1006_v37 }
  0x2f   : > { %938 = vmatpush3.bf16.msra.mxu0 %v1005_v32 }
  0x30   : > { %958 = vmatpush3.bf16.msra.mxu1 %v1006_v37  ;;  %939 = vmatprep.subr.bf16.mxu0 %v1007_v45 }
  0x31   : > { %959 = vmatprep.subr.bf16.mxu1 %v1008_v50 }
  0x33   : > { %940 = vmatpush3.bf16.msra.mxu0 %v1007_v45 }
  0x34   : > { %960 = vmatpush3.bf16.msra.mxu1 %v1008_v50  ;;  %941 = vmatprep.subr.bf16.mxu0 %v1009_v55 }
  0x35   : > { %961 = vmatprep.subr.bf16.mxu1 %v1010_v57 }
  0x37   : > { %942 = vmatpush3.bf16.msra.mxu0 %v1009_v55 }
  0x38   : > { %962 = vmatpush3.bf16.msra.mxu1 %v1010_v57  ;;  %943 = vmatprep.subr.bf16.mxu0 %v1011_v58 }
  0x39   : > { %963 = vmatprep.subr.bf16.mxu1 %v1012_v59 }
  0x3b   : > { %944 = vmatpush3.bf16.msra.mxu0 %v1011_v58 }
  0x3c   : > { %964 = vmatpush3.bf16.msra.mxu1 %v1012_v59  ;;  %945 = vmatprep.subr.bf16.mxu0 %v1013_v60 }
  0x3d   : > { %965 = vmatprep.subr.bf16.mxu1 %v1014_v61 }
  0x3f   : > { %946 = vmatpush3.bf16.msra.mxu0 %v1013_v60 }
  0x40   : > { %966 = vmatpush3.bf16.msra.mxu1 %v1014_v61  ;;  %947 = vmatprep.subr.bf16.mxu0 %v1015_v62 }
  0x41   : > { %967 = vmatprep.subr.bf16.mxu1 %v1016_v63 }
  0x43   : > { %948 = vmatpush3.bf16.msra.mxu0 %v1015_v62 }
  0x44   : > { %968 = vmatpush3.bf16.msra.mxu1 %v1016_v63 }
  0x46   : > { %950 = vmatmul.mubr.bf16.vlgmr.msra.gmra.mrb[4].mxu0 %v477_v53 }
  0x47   : > { %970 = vmatmul.mubr.bf16.vlgmr.msra.gmra.mrb[4].mxu1 %v602_v44 }
  0xf9   : > { %v911_v0 = vpop.f32.mrb[0].mxu0 }
  0xfa   : > { %v931_v1 = vpop.f32.mrb[0].mxu1  ;;  %v316_v2 = vpop.f32.mrb[1].mxu0 }
  0xfb   : > { %v426_v3 = vadd.f32 %v931_v1, %v911_v0  ;;  %v417_v4 = vpop.f32.mrb[1].mxu1  ;;  %v912_v5 = vpop.f32.mrb[2].mxu0 }
  0xfc   : > { %v418_v6 = vadd.f32 %v417_v4, %v316_v2  ;;  %v932_v7 = vpop.f32.mrb[2].mxu1  ;;  %v319_v8 = vpop.f32.mrb[3].mxu0 }
  0xfd   : > { %v420_v9 = vpop.f32.mrb[3].mxu1 }
  0xfe   : > { %v421_v10 = vadd.f32 %v420_v9, %v319_v8 }
 0x119   : > { %v951_v11 = vpop.f32.mrb[4].mxu0 }
 0x11a   : > { %v579_v12 = vadd.f32 %v951_v11, %v426_v3  ;;  %v971_v13 = vpop.f32.mrb[4].mxu1  ;;  %v563_v14 = vpop.f32.mrb[5].mxu0 }
 0x11b   : > { %v577_v16 = vadd.f32 %v563_v14, %v418_v6  ;;  %v688_v17 = vpop.f32.mrb[5].mxu1  ;;  %v952_v18 = vpop.f32.mrb[6].mxu0 }
 0x11c   : > { %v704_v19 = vadd.f32 %v971_v13, %v579_v12  ;;  %v972_v20 = vpop.f32.mrb[6].mxu1  ;;  %v566_v21 = vpop.f32.mrb[7].mxu0 }
 0x11d   : > { %v702_v22 = vadd.f32 %v688_v17, %v577_v16  ;;  %v578_v23 = vadd.f32 %v566_v21, %v421_v10  ;;  %v691_v24 = vpop.f32.mrb[7].mxu1 }
 0x11e   : > { %v714_v25 = vadd.f32 %v843_v15, %v704_v19 }
 0x11f   : > { %v712_v26 = vadd.f32 %v843_v15, %v702_v22  ;;  %v703_v27 = vadd.f32 %v691_v24, %v578_v23 }
 0x120   : > { %vm717_vm3 = vcmp.ge.f32.partialorder %v714_v25, 0.0  ;;  %v720_v28 = vmul.f32 0.2, %v714_v25 }
 0x121   : > { %vm715_vm4 = vcmp.ge.f32.partialorder %v712_v26, 0.0  ;;  %v718_v29 = vmul.f32 0.2, %v712_v26  ;;  %v713_v30 = vadd.f32 %v843_v15, %v703_v27 }
 0x122   : > { %v723_v31 = vsel %vm717_vm3, %v714_v25, %v720_v28 }
 0x123   : > { %v852_v32 = vpack.c.bf16 %v723_v31, %v723_v31  ;;  %v721_v33 = vsel %vm715_vm4, %v712_v26, %v718_v29  ;;  %vm716_vm7 = vcmp.ge.f32.partialorder %v713_v30, 0.0  ;;  %v719_v34 = vmul.f32 0.2, %v713_v30 }
 0x124   : > { %v850_v35 = vpack.c.bf16 %v721_v33, %v721_v33 }
 0x125   : > { %741 = vst.msk [vmem:[%s170_s11 + $0x8] sm:$0x3] %vm740_vm5, %v852_v32  ;;  %v722_v36 = vsel %vm716_vm7, %v713_v30, %v719_v34 }
 0x126   : > { %738 = vst.msk [vmem:[%s170_s11] sm:$0xf] %vm737_vm6, %v850_v35  ;;  %v851_v37 = vpack.c.bf16 %v722_v36, %v722_v36 }
 0x128   : > { %739 = vst.msk [vmem:[%s170_s11 + $0x4] sm:$0xf] %vm737_vm6, %v851_v37 }
 0x129 PF: > { %s13_s12 = sadd.s32 1, %s1026_s12  }
 0x12a   : > { %p10_p4 = scmp.ge.s32.totalorder %s13_s12, 4  }
 0x12c   :  { %12 = sbr.rel (!%p10_p4) target bundleno = 1 (0x1), region = 62 }

// kernel: _lambda_.9
= control target key start
LH: loop header
LB: loop body
LE: loop exit
PB: predicated region body
PF: predicated region fallthrough
CT: control target
= control target key end

     0   :  { %s699_s14 = smov 0   ;;  %s849_s0 = inlined_call_operand.vmem [shape: bf16[2,30,128], index: 0, kind: input, shape index: {}]   ;;  %s850_s1 = inlined_call_operand.vmem [shape: bf16[1,2048], index: 1, kind: input, shape index: {}]   ;;  %s851_s2 = inlined_call_operand.<no memory space> [shape: f32[1,1], index: 2, kind: input, shape index: {}]   ;;  %s852_s3 = inlined_call_operand.vmem [shape: f32[2,10,1], index: 3, kind: output, shape index: {}]  }
   0x1   :  { %v8_v0 = vstv %s851_s2 }
   0x2   :  { %9 = vst [vmem:[#allocation2] sm:$0x1] %v8_v0 }
   0x3 LB: > { %s646_s15 = sadd.s32 4294967295, %s674_s14   ;;  %p650_p0 = scmp.ge.s32.totalorder %s674_s14, 1  ;;  %s674_s14 = sphi %s699_s14, %s15_s14  }
   0x4   : > { %p139_p1 = scmp.lt.s32.totalorder %s674_s14, 3 }
   0x6   : > { %p140_p2 = pnand %p650_p0, %p139_p1 }
   0x7   : > { %p163_p3 = scmp.lt.s32.totalorder (!%p140_p2), %s646_s15, 1  ;;  %v175_v1 = vld [vmem:[%s850_s1] sm:$0x1] (!%p140_p2)  ;;  %v179_v2 = vlaneseq (!%p140_p2)  ;;  %v222_v3 = vld [vmem:[%s850_s1 + $0x2] sm:$0x1] (!%p140_p2)  ;;  %vm231_vm0 = vcmask (!%p140_p2), 1047554  }
   0x8   : > { %143 = sbr.rel (%p140_p2) target bundleno = 239 (0xef), region = 32  ;;  %v194_v4 = vld [vmem:[%s850_s1 + $0x1] sm:$0x1] (!%p140_p2)  ;;  %v176_v5 = vunpack.c.l.bf16 (!%p140_p2), %v175_v1  ;;  %v223_v7 = vunpack.c.l.bf16 (!%p140_p2), %v222_v3  ;;  %v250_v10 = vld [vmem:[%s850_s1 + $0x3] sm:$0x1] (!%p140_p2)  ;;  %vm203_vm1 = vcmask (!%p140_p2), 1047553  }
   0x9   : > { %v180_v6 = vshrl.u32 (!%p140_p2), %v179_v2, 7  ;;  %v195_v8 = vunpack.c.l.bf16 (!%p140_p2), %v194_v4  ;;  %v251_v22 = vunpack.c.l.bf16 (!%p140_p2), %v250_v10  ;;  %v278_v27 = vld [vmem:[%s850_s1 + $0x4] sm:$0x1] (!%p140_p2)  ;;  %vm235_vm2 = vcmask (!%p140_p2), 1043456   ;;  %v305_v34 = vld [vmem:[%s850_s1 + $0x5] sm:$0x1] (!%p140_p2) }
   0xa   : > { %v279_v33 = vunpack.c.l.bf16 (!%p140_p2), %v278_v27  ;;  %vm207_vm3 = vcmask (!%p140_p2), 1042432   ;;  %vm187_vm4 = vcmask (!%p140_p2), 1041408   ;;  %v306_v39 = vunpack.c.l.bf16 (!%p140_p2), %v305_v34  ;;  %v330_v44 = vld [vmem:[%s850_s1 + $0x6] sm:$0x1] (!%p140_p2)  ;;  %v379_v56 = vld [vmem:[%s850_s1 + $0x8] sm:$0x1] (!%p140_p2) }
   0xb   : > { %v719_v9 = vsub.s32 (!%p140_p2), 0, %v180_v6  ;;  %vm259_vm5 = vcmask (!%p140_p2), 1047555   ;;  %vm263_vm6 = vcmask (!%p140_p2), 1044480   ;;  %v331_v49 = vunpack.c.l.bf16 (!%p140_p2), %v330_v44 }
   0xc   : > { %vm288_vm7 = vcmask (!%p140_p2), 1047557   ;;  %vm213_vm8 = vcmask (!%p140_p2), 1046528   ;;  %vm314_vm9 = vcmask (!%p140_p2), 1047558   ;;  %v380_v62 = vunpack.c.l.bf16 (!%p140_p2), %v379_v56 }
   0xd   : > { %v182_v12 = vrot.slane (!%p140_p2), %v176_v5, %v719_v9  ;;  %v228_v14 = vrot.slane (!%p140_p2), %v223_v7, %v719_v9  ;;  %v200_v15 = vrot.slane (!%p140_p2), %v195_v8, %v719_v9  ;;  %v256_v32 = vrot.slane (!%p140_p2), %v251_v22, %v719_v9  ;;  %v362_v7 = vld [vmem:[%s850_s1 + $0x7] sm:$0x1] (!%p140_p2)  ;;  %v405_v8 = vld [vmem:[%s850_s1 + $0x9] sm:$0x1] (!%p140_p2) }
   0xe   : > { %v285_v43 = vrot.slane (!%p140_p2), %v279_v33, %v719_v9  ;;  %v311_v53 = vrot.slane (!%p140_p2), %v306_v39, %v719_v9  ;;  %v336_v59 = vrot.slane (!%p140_p2), %v331_v49, %v719_v9  ;;  %vm340_vm10 = vcmask (!%p140_p2), 1047559  }
   0xf   : > { %s854_s15 = smov (!%p163_p3, %s646_s15), 1  ;;  %v386_v6 = vrot.slane %v380_v62, %v719_v9  ;;  %vm346_vm11 = vcmask 1040384   ;;  %vm439_vm12 = vcmask 1047556   ;;  %vm241_vm13 = vcmask 1045504  }
  0x10   : > { %s658_s21 = sshll.u32 %s854_s15, 4  ;;  %vm589_vm14 = vcmask 1024   ;;  %vm587_vm15 = vcmask 7168  }
  0x11   : > { %s726_s24 = scalar_lea.vmem %s849_s0, %s658_s21  ;;  %s172_s28 = scalar_lea.vmem %s852_s3, %s658_s21 }
  0x12   : > { %v173_v11 = vld [vmem:[%s726_s24] sm:$0xff]   ;;  %v329_v61 = vld [vmem:[%s726_s24 + $0x8] sm:$0x1] }
  0x13   : > { %v221_v13 = vld [vmem:[%s726_s24] sm:$0xe]  ;;  %v193_v16 = vld [vmem:[%s726_s24 + $0x4] sm:$0x3]  ;;  %v177_v17 = vunpack.c.l.bf16 %v173_v11  ;;  %v281_v47 = vunpack.c.h.bf16 %v173_v11  ;;  %v332_v3 = vunpack.c.l.bf16 %v329_v61  ;;  %v378_v4 = vld [vmem:[%s726_s24 + $0x8] sm:$0x3] }
  0x14   : > { %v224_v18 = vunpack.c.l.bf16 %v221_v13  ;;  %v196_v19 = vunpack.c.l.bf16 %v193_v16  ;;  %v174_v20 = vld [vmem:[%s726_s24 + $0x4] sm:$0x1]  ;;  %v276_v38 = vld [vmem:[%s726_s24] sm:$0xc]  ;;  %v377_v63 = vld [vmem:[%s726_s24 + $0x4] sm:$0xe]  ;;  %v382_v10 = vunpack.c.l.bf16 %v378_v4  ;;  %v406_v16 = vunpack.c.l.bf16 %v405_v8 }
  0x15   : > { %v178_v21 = vunpack.c.l.bf16 %v174_v20  ;;  %v183_v23 = vmul.f32 %v182_v12, %v177_v17  ;;  %v201_v25 = vmul.f32 %v200_v15, %v177_v17  ;;  %v249_v28 = vld [vmem:[%s726_s24 + $0x4] sm:$0x7]  ;;  %v280_v42 = vunpack.c.l.bf16 %v276_v38  ;;  %v304_v48 = vld [vmem:[%s726_s24] sm:$0x8]  ;;  %v430_v17 = vld [vmem:[%s850_s1 + $0xa] sm:$0x1] }
  0x16   : > { %v229_v24 = vmul.f32 %v228_v14, %v224_v18  ;;  %v230_v26 = vmul.f32 %v228_v14, %v196_v19  ;;  %v202_v31 = vmul.f32 %v200_v15, %v196_v19  ;;  %v252_v37 = vunpack.c.l.bf16 %v249_v28 }
  0x17   : > { %185 = vadd.xlane.f32.xlu0 %v183_v23  ;;  %v204_v30 = vsel %vm203_vm1, %v201_v25, 0.0  ;;  %v184_v36 = vmul.f32 %v182_v12, %v178_v21  ;;  %v257_v41 = vmul.f32 %v256_v32, %v224_v18  ;;  %v286_v51 = vmul.f32 %v285_v43, %v280_v42  ;;  %v404_v23 = vld [vmem:[%s726_s24 + $0x8] sm:$0x7]  ;;  %v429_v25 = vld [vmem:[%s726_s24 + $0x4] sm:$0xc] }
  0x18   : > { %v232_v29 = vsel %vm231_vm0, %v229_v24, 0.0  ;;  %v236_v35 = vsel %vm235_vm2, %v230_v26, 0.0  ;;  %v208_v40 = vsel %vm207_vm3, %v202_v31, 0.0  ;;  %v258_v46 = vmul.f32 %v256_v32, %v252_v37  ;;  %v456_v26 = vld [vmem:[%s850_s1 + $0xb] sm:$0x1] }
  0x19   : > { %233 = vadd.xlane.f32.xlu1 %v232_v29  ;;  %v188_v45 = vsel %vm187_vm4, %v184_v36, 0.0  ;;  %v260_v50 = vsel %vm259_vm5, %v257_v41, 0.0  ;;  %v307_v52 = vunpack.c.l.bf16 %v304_v48  ;;  %v287_v55 = vmul.f32 %v285_v43, %v281_v47  ;;  %v455_v41 = vld [vmem:[%s726_s24 + $0x8] sm:$0xf]  ;;  %v480_v43 = vld [vmem:[%s726_s24 + $0x4] sm:$0x8] }
  0x1a   : > { %v264_v54 = vsel %vm263_vm6, %v258_v46, 0.0  ;;  %v289_v57 = vsel %vm288_vm7, %v286_v51, 0.0  ;;  %v313_v1 = vmul.f32 %v311_v53, %v281_v47  ;;  %v381_v5 = vunpack.c.l.bf16 %v377_v63  ;;  %v529_v51 = vld [vmem:[%s850_s1 + $0xe] sm:$0x1] }
  0x1b   : > { %205 = vadd.xlane.f32.xlu0 %v204_v30  ;;  %v312_v58 = vmul.f32 %v311_v53, %v307_v52  ;;  %v292_v60 = vsel %vm213_vm8, %v287_v55, 0.0  ;;  %v337_v2 = vmul.f32 %v336_v59, %v307_v52  ;;  %v338_v12 = vmul.f32 %v336_v59, %v281_v47  ;;  %v481_v52 = vld [vmem:[%s726_s24 + $0xc] sm:$0x1] }
  0x1c   : > { %v339_v13 = vmul.f32 %v336_v59, %v332_v3  ;;  %v363_v14 = vunpack.c.l.bf16 %v362_v7  ;;  %v387_v15 = vmul.f32 %v386_v6, %v381_v5  ;;  %v388_v19 = vmul.f32 %v386_v6, %v382_v10  ;;  %v528_v59 = vld [vmem:[%s726_s24 + $0xc] sm:$0x3] }
  0x1d   : > { %237 = vadd.xlane.f32.xlu1 %v236_v35  ;;  %v315_v0 = vsel %vm314_vm9, %v312_v58, 0.0  ;;  %v341_v11 = vsel %vm340_vm10, %v337_v2, 0.0  ;;  %v411_v22 = vrot.slane %v406_v16, %v719_v9  ;;  %v431_v24 = vunpack.c.l.bf16 %v430_v17  ;;  %v482_v35 = vld [vmem:[%s850_s1 + $0xc] sm:$0x1] }
  0x1e   : > { %v347_v18 = vsel %vm346_vm11, %v339_v13, 0.0  ;;  %v367_v20 = vrot.slane %v363_v14, %v719_v9  ;;  %v389_v21 = vsel %vm231_vm0, %v387_v15, 0.0  ;;  %v392_v27 = vsel %vm235_vm2, %v388_v19, 0.0 }
  0x1f   : > { %209 = vadd.xlane.f32.xlu0 %v208_v40  ;;  %v407_v30 = vunpack.c.l.bf16 %v404_v23  ;;  %v412_v31 = vmul.f32 %v411_v22, %v381_v5  ;;  %v432_v32 = vunpack.c.l.bf16 %v429_v25  ;;  %v436_v33 = vrot.slane %v431_v24, %v719_v9 }
  0x20   : > { %v368_v28 = vmul.f32 %v367_v20, %v281_v47  ;;  %v369_v29 = vmul.f32 %v367_v20, %v332_v3  ;;  %v457_v34 = vunpack.c.l.bf16 %v456_v26  ;;  %v483_v42 = vunpack.c.l.bf16 %v482_v35  ;;  %v554_v3 = vld [vmem:[%s850_s1 + $0xf] sm:$0x1] }
  0x21   : > { %189 = vadd.xlane.f32.xlu1 %v188_v45  ;;  %v413_v37 = vmul.f32 %v411_v22, %v407_v30  ;;  %v414_v38 = vsel %vm259_vm5, %v412_v31, 0.0  ;;  %v437_v39 = vmul.f32 %v436_v33, %v432_v32  ;;  %v438_v45 = vmul.f32 %v436_v33, %v407_v30 }
  0x22   : > { %v372_v36 = vsel %vm187_vm4, %v369_v29, 0.0  ;;  %v462_v40 = vrot.slane %v457_v34, %v719_v9  ;;  %v458_v46 = vunpack.c.l.bf16 %v455_v41  ;;  %v484_v49 = vunpack.c.l.bf16 %v480_v43 }
  0x23   : > { %261 = vadd.xlane.f32.xlu0 %v260_v50  ;;  %v417_v44 = vsel %vm263_vm6, %v413_v37, 0.0  ;;  %v440_v47 = vsel %vm439_vm12, %v437_v39, 0.0  ;;  %v489_v50 = vrot.slane %v483_v42, %v719_v9  ;;  %v443_v53 = vsel %vm241_vm13, %v438_v45, 0.0 }
  0x24   : > { %v463_v48 = vmul.f32 %v462_v40, %v432_v32  ;;  %v530_v55 = vunpack.c.l.bf16 %v529_v51  ;;  %v485_v58 = vunpack.c.l.bf16 %v481_v52  ;;  %v555_v6 = vunpack.c.l.bf16 %v554_v3 }
  0x25   : > { %265 = vadd.xlane.f32.xlu1 %v264_v54  ;;  %v464_v54 = vmul.f32 %v462_v40, %v458_v46  ;;  %v491_v4 = vmul.f32 %v489_v50, %v458_v46 }
  0x26   : > { %v465_v56 = vsel %vm288_vm7, %v463_v48, 0.0  ;;  %v535_v62 = vrot.slane %v530_v55, %v719_v9  ;;  %v560_v13 = vrot.slane %v555_v6, %v719_v9 }
  0x27   : > { %290 = vadd.xlane.f32.xlu0 %v289_v57  ;;  %v490_v57 = vmul.f32 %v489_v50, %v484_v49  ;;  %v468_v61 = vsel %vm213_vm8, %v464_v54, 0.0 }
  0x28   : > { %v536_v5 = vmul.f32 %v535_v62, %v458_v46 }
  0x29   : > { %293 = vadd.xlane.f32.xlu1 %v292_v60  ;;  %v513_v60 = vld [vmem:[%s850_s1 + $0xd] sm:$0x1]  ;;  %v493_v63 = vsel %vm340_vm10, %v490_v57, 0.0 }
  0x2a   : > { %v514_v2 = vunpack.c.l.bf16 %v513_v60 }
  0x2b   : > { %316 = vadd.xlane.f32.xlu0 %v315_v0  ;;  %v492_v0 = vmul.f32 %v489_v50, %v485_v58 }
  0x2c   : > { %v518_v10 = vrot.slane %v514_v2, %v719_v9 }
  0x2d   : > { %318 = vadd.xlane.f32.xlu1 %v313_v1  ;;  %v531_v1 = vunpack.c.l.bf16 %v528_v59  ;;  %v498_v7 = vsel %vm346_vm11, %v492_v0, 0.0 }
  0x2e   : > { %v520_v16 = vmul.f32 %v518_v10, %v485_v58  ;;  %v519_v17 = vmul.f32 %v518_v10, %v458_v46 }
  0x2f   : > { %342 = vadd.xlane.f32.xlu0 %v341_v11  ;;  %v537_v8 = vmul.f32 %v535_v62, %v531_v1  ;;  %v553_v11 = vld [vmem:[%s726_s24 + $0x8] sm:$0xe]  ;;  %v562_v20 = vmul.f32 %v560_v13, %v531_v1 }
  0x30   : > { %v556_v14 = vunpack.c.l.bf16 %v553_v11  ;;  %v523_v19 = vsel %vm187_vm4, %v520_v16, 0.0 }
  0x31   : > { %344 = vadd.xlane.f32.xlu1 %v338_v12  ;;  %v538_v12 = vsel %vm203_vm1, %v536_v5, 0.0  ;;  %v541_v15 = vsel %vm207_vm3, %v537_v8, 0.0  ;;  %v566_v22 = vsel %vm235_vm2, %v562_v20, 0.0 }
  0x33   : > { %348 = vadd.xlane.f32.xlu0 %v347_v18  ;;  %v561_v18 = vmul.f32 %v560_v13, %v556_v14 }
  0x35   : > { %390 = vadd.xlane.f32.xlu1 %v389_v21  ;;  %v563_v21 = vsel %vm231_vm0, %v561_v18, 0.0 }
  0x37   : > { %393 = vadd.xlane.f32.xlu0 %v392_v27 }
  0x39   : > { %370 = vadd.xlane.f32.xlu1 %v368_v28 }
  0x3b   : > { %373 = vadd.xlane.f32.xlu0 %v372_v36 }
  0x3d   : > { %415 = vadd.xlane.f32.xlu1 %v414_v38 }
  0x3f   : > { %418 = vadd.xlane.f32.xlu0 %v417_v44 }
  0x41   : > { %441 = vadd.xlane.f32.xlu1 %v440_v47 }
  0x43   : > { %444 = vadd.xlane.f32.xlu0 %v443_v53 }
  0x45   : > { %466 = vadd.xlane.f32.xlu1 %v465_v56 }
  0x47   : > { %469 = vadd.xlane.f32.xlu0 %v468_v61 }
  0x49   : > { %494 = vadd.xlane.f32.xlu1 %v493_v63 }
  0x4b   : > { %496 = vadd.xlane.f32.xlu0 %v491_v4 }
  0x4d   : > { %499 = vadd.xlane.f32.xlu1 %v498_v7 }
  0x4f   : > { %539 = vadd.xlane.f32.xlu0 %v538_v12 }
  0x51   : > { %542 = vadd.xlane.f32.xlu1 %v541_v15 }
  0x53   : > { %521 = vadd.xlane.f32.xlu0 %v519_v17 }
  0x55   : > { %524 = vadd.xlane.f32.xlu1 %v523_v19 }
  0x57   : > { %564 = vadd.xlane.f32.xlu0 %v563_v21 }
  0x59   : > { %567 = vadd.xlane.f32.xlu1 %v566_v22 }
  0xa4   : > { %v186_v9 = vpop.xlane.xlu0 %185 }
  0xa6   : > { %v234_v23 = vpop.xlane.xlu1 %233 }
  0xa7   : > { %v242_v46 = vrot.slane %v234_v23, 2 }
  0xa8   : > { %v206_v24 = vpop.xlane.xlu0 %205 }
  0xa9   : > { %v214_v37 = vrot.slane %v206_v24, 1 }
  0xaa   : > { %v238_v25 = vpop.xlane.xlu1 %237 }
  0xab   : > { %v243_v41 = vrot.slane %v238_v25, 2 }
  0xac   : > { %v210_v26 = vpop.xlane.xlu0 %209 }
  0xad   : > { %v215_v36 = vrot.slane %v210_v26, 1  ;;  %v244_v49 = vsel %vm241_vm13, %v242_v46, %v243_v41 }
  0xae   : > { %v190_v27 = vpop.xlane.xlu1 %189 }
  0xaf   : > { %v216_v40 = vsel %vm213_vm8, %v214_v37, %v215_v36  ;;  %v220_v42 = vadd.f32 %v215_v36, %v190_v27 }
  0xb0   : > { %v262_v28 = vpop.xlane.xlu0 %261  ;;  %v219_v44 = vadd.f32 %v216_v40, %v186_v9 }
  0xb1   : > { %v269_v47 = vrot.slane %v262_v28, 3  ;;  %v248_v50 = vadd.f32 %v243_v41, %v220_v42 }
  0xb2   : > { %v266_v29 = vpop.xlane.xlu1 %265  ;;  %v247_v54 = vadd.f32 %v244_v49, %v219_v44 }
  0xb3   : > { %v270_v48 = vrot.slane %v266_v29, 3 }
  0xb4   : > { %v291_v30 = vpop.xlane.xlu0 %290 }
  0xb5   : > { %v297_v51 = vrot.slane %v291_v30, 5  ;;  %v271_v56 = vsel %vm263_vm6, %v269_v47, %v270_v48  ;;  %v275_v60 = vadd.f32 %v270_v48, %v248_v50 }
  0xb6   : > { %v294_v31 = vpop.xlane.xlu1 %293  ;;  %v274_v1 = vadd.f32 %v271_v56, %v247_v54 }
  0xb7   : > { %v298_v52 = vrot.slane %v294_v31, 5 }
  0xb8   : > { %v317_v32 = vpop.xlane.xlu0 %316 }
  0xb9   : > { %v322_v57 = vrot.slane %v317_v32, 6  ;;  %v299_v61 = vsel %vm207_vm3, %v297_v51, %v298_v52  ;;  %v303_v3 = vadd.f32 %v298_v52, %v275_v60 }
  0xba   : > { %v319_v33 = vpop.xlane.xlu1 %318  ;;  %v302_v5 = vadd.f32 %v299_v61, %v274_v1 }
  0xbb   : > { %v323_v58 = vrot.slane %v319_v33, 6 }
  0xbc   : > { %v343_v34 = vpop.xlane.xlu0 %342 }
  0xbd   : > { %v353_v62 = vrot.slane %v343_v34, 7  ;;  %v324_v4 = vsel %vm187_vm4, %v322_v57, %v323_v58  ;;  %v328_v7 = vadd.f32 %v323_v58, %v303_v3 }
  0xbe   : > { %v345_v35 = vpop.xlane.xlu1 %344  ;;  %v327_v11 = vadd.f32 %v324_v4, %v302_v5 }
  0xbf   : > { %v354_v63 = vrot.slane %v345_v35, 7 }
  0xc0   : > { %v349_v38 = vpop.xlane.xlu0 %348 }
  0xc1   : > { %v356_v59 = vrot.slane %v349_v38, 7  ;;  %v355_v8 = vsel %vm346_vm11, %v353_v62, %v354_v63  ;;  %v655_v62 = vld [vmem:[#allocation2] ss:$0 sm:$0xff] }
  0xc2   : > { %v391_v39 = vpop.xlane.xlu1 %390  ;;  %v360_v15 = vadd.f32 %v355_v8, %v327_v11 }
  0xc3   : > { %v357_v6 = vsel %vm346_vm11, %v354_v63, %v356_v59  ;;  %v397_v16 = vrot.slane %v391_v39, 2 }
  0xc4   : > { %v394_v43 = vpop.xlane.xlu0 %393  ;;  %v361_v14 = vadd.f32 %v357_v6, %v328_v7 }
  0xc5   : > { %v398_v13 = vrot.slane %v394_v43, 2 }
  0xc6   : > { %v371_v45 = vpop.xlane.xlu1 %370 }
  0xc7   : > { %v375_v20 = vadd.f32 %v371_v45, %v360_v15  ;;  %v399_v22 = vsel %vm241_vm13, %v397_v16, %v398_v13 }
  0xc8   : > { %v374_v53 = vpop.xlane.xlu0 %373 }
  0xc9   : > { %v376_v17 = vadd.f32 %v374_v53, %v361_v14  ;;  %v402_v29 = vadd.f32 %v399_v22, %v375_v20 }
  0xca   : > { %v416_v55 = vpop.xlane.xlu1 %415 }
  0xcb   : > { %v422_v9 = vrot.slane %v416_v55, 3  ;;  %v403_v24 = vadd.f32 %v398_v13, %v376_v17 }
  0xcc   : > { %v419_v0 = vpop.xlane.xlu0 %418 }
  0xcd   : > { %v423_v18 = vrot.slane %v419_v0, 3 }
  0xce   : > { %v442_v2 = vpop.xlane.xlu1 %441 }
  0xcf   : > { %v424_v25 = vsel %vm263_vm6, %v422_v9, %v423_v18  ;;  %v448_v26 = vrot.slane %v442_v2, 4  ;;  %v428_v32 = vadd.f32 %v423_v18, %v403_v24 }
  0xd0   : > { %v445_v10 = vpop.xlane.xlu0 %444  ;;  %v427_v36 = vadd.f32 %v424_v25, %v402_v29 }
  0xd1   : > { %v449_v23 = vrot.slane %v445_v10, 4 }
  0xd2   : > { %v467_v12 = vpop.xlane.xlu1 %466 }
  0xd3   : > { %v450_v33 = vsel %vm235_vm2, %v448_v26, %v449_v23  ;;  %v473_v34 = vrot.slane %v467_v12, 5  ;;  %v454_v37 = vadd.f32 %v449_v23, %v428_v32 }
  0xd4   : > { %v470_v19 = vpop.xlane.xlu0 %469  ;;  %v453_v41 = vadd.f32 %v450_v33, %v427_v36 }
  0xd5   : > { %v474_v27 = vrot.slane %v470_v19, 5 }
  0xd6   : > { %v495_v21 = vpop.xlane.xlu1 %494 }
  0xd7   : > { %v475_v38 = vsel %vm207_vm3, %v473_v34, %v474_v27  ;;  %v504_v39 = vrot.slane %v495_v21, 7  ;;  %v479_v44 = vadd.f32 %v474_v27, %v454_v37 }
  0xd8   : > { %v497_v28 = vpop.xlane.xlu0 %496  ;;  %v478_v46 = vadd.f32 %v475_v38, %v453_v41 }
  0xd9   : > { %v505_v30 = vrot.slane %v497_v28, 7 }
  0xda   : > { %v500_v31 = vpop.xlane.xlu1 %499 }
  0xdb   : > { %v507_v35 = vrot.slane %v500_v31, 7  ;;  %v506_v45 = vsel %vm346_vm11, %v504_v39, %v505_v30 }
  0xdc   : > { %v540_v40 = vpop.xlane.xlu0 %539  ;;  %v511_v49 = vadd.f32 %v506_v45, %v478_v46 }
  0xdd   : > { %v508_v43 = vsel %vm346_vm11, %v505_v30, %v507_v35  ;;  %v546_v51 = vrot.slane %v540_v40, 1 }
  0xde   : > { %v543_v42 = vpop.xlane.xlu1 %542  ;;  %v512_v48 = vadd.f32 %v508_v43, %v479_v44 }
  0xdf   : > { %v547_v52 = vrot.slane %v543_v42, 1 }
  0xe0   : > { %v522_v47 = vpop.xlane.xlu0 %521 }
  0xe1   : > { %v526_v54 = vadd.f32 %v522_v47, %v511_v49  ;;  %v548_v58 = vsel %vm213_vm8, %v546_v51, %v547_v52 }
  0xe2   : > { %v525_v50 = vpop.xlane.xlu1 %524 }
  0xe3   : > { %v527_v53 = vadd.f32 %v525_v50, %v512_v48  ;;  %v551_v61 = vadd.f32 %v548_v58, %v526_v54 }
  0xe4   : > { %v565_v55 = vpop.xlane.xlu0 %564 }
  0xe5   : > { %v571_v57 = vrot.slane %v565_v55, 2  ;;  %v552_v59 = vadd.f32 %v547_v52, %v527_v53 }
  0xe6   : > { %v568_v56 = vpop.xlane.xlu1 %567 }
  0xe7   : > { %v572_v60 = vrot.slane %v568_v56, 2 }
  0xe9   : > { %v577_v63 = vadd.f32 %v572_v60, %v552_v59  ;;  %v573_v0 = vsel %vm241_vm13, %v571_v57, %v572_v60 }
  0xea   : > { %v576_v1 = vadd.f32 %v573_v0, %v551_v61 }
  0xeb   : > { %v586_v2 = vadd.f32 %v655_v62, %v577_v63 }
  0xec   : > { %v585_v3 = vadd.f32 %v655_v62, %v576_v1 }
  0xed   : > { %590 = vst.msk [vmem:[%s172_s28 + $0x8] sm:$0x3] %vm589_vm14, %v586_v2 }
  0xee   : > { %588 = vst.msk [vmem:[%s172_s28] sm:$0xff] %vm587_vm15, %v585_v3 }
  0xef PF: > { %s15_s14 = sadd.s32 1, %s674_s14  }
  0xf0   : > { %p12_p4 = scmp.ge.s32.totalorder %s15_s14, 4  }
  0xf2   :  { %14 = sbr.rel (!%p12_p4) target bundleno = 3 (0x3), region = 62 }

// kernel: _lambda_.8
= control target key start
LH: loop header
LB: loop body
LE: loop exit
PB: predicated region body
PF: predicated region fallthrough
CT: control target
= control target key end

     0   :  { %s2490_s12 = smov 0   ;;  %s2824_s0 = inlined_call_operand.vmem [shape: bf16[2,42,64], index: 0, kind: input, shape index: {}]   ;;  %s2825_s1 = inlined_call_operand.vmem [shape: bf16[1024,128], index: 1, kind: input, shape index: {}]   ;;  %s2826_s2 = inlined_call_operand.vmem [shape: f32[1,128], index: 2, kind: input, shape index: {}]   ;;  %s2827_s3 = inlined_call_operand.vmem [shape: bf16[2,18,128], index: 3, kind: output, shape index: {}]  }
   0x1 LB: > { %s1937_s13 = sadd.s32 4294967295, %s2468_s12   ;;  %p1941_p0 = scmp.ge.s32.totalorder %s2468_s12, 1  ;;  %s2468_s12 = sphi %s2490_s12, %s13_s12  }
   0x2   : > { %p137_p1 = scmp.lt.s32.totalorder %s2468_s12, 3 }
   0x4   : > { %p138_p2 = pnand %p1941_p0, %p137_p1 }
   0x5   : > { %v2375_v0 = vld [vmem:[%s2825_s1 + $0x20] sm:$0xff] (!%p138_p2)   ;;  %p161_p3 = scmp.lt.s32.totalorder (!%p138_p2), %s1937_s13, 1  ;;  %v2377_v2 = vld [vmem:[%s2825_s1 + $0x28] sm:$0xff] (!%p138_p2)   ;;  %v2379_v4 = vld [vmem:[%s2825_s1 + $0x30] sm:$0xff] (!%p138_p2)   ;;  %vm240_vm0 = vcmask (!%p138_p2), 523264   ;;  %vm387_vm2 = vcmask (!%p138_p2), 1046528  }
   0x6   : > { %141 = sbr.rel (%p138_p2) target bundleno = 367 (0x16f), region = 32  ;;  %v2376_v1 = vld [vmem:[%s2825_s1] sm:$0xff] (!%p138_p2)   ;;  %2173 = vmatprep.subr.bf16.mxu0 (!%p138_p2), %v2375_v0  ;;  %v2378_v3 = vld [vmem:[%s2825_s1 + $0x8] sm:$0xff] (!%p138_p2)   ;;  %v2380_v5 = vld [vmem:[%s2825_s1 + $0x10] sm:$0xff] (!%p138_p2)   ;;  %vm200_vm1 = vsmask.f32 (!%p138_p2), 7424 }
   0x7   : > { %2185 = vmatprep.subr.bf16.mxu1 (!%p138_p2), %v2376_v1  ;;  %2174 = vmatpush3.bf16.msra.mxu0 (!%p138_p2), %v2375_v0  ;;  %v2381_v6 = vld [vmem:[%s2825_s1 + $0x38] sm:$0xff] (!%p138_p2)   ;;  %v2386_v12 = vld [vmem:[%s2825_s1 + $0x40] sm:$0xff] (!%p138_p2)   ;;  %v2388_v23 = vld [vmem:[%s2825_s1 + $0x48] sm:$0xff] (!%p138_p2)   ;;  %vm484_vm3 = vsmask.f32 (!%p138_p2), 6400  ;;  %vm599_vm4 = vcmask (!%p138_p2), 1044480  }
   0x8   : > { %2186 = vmatpush3.bf16.msra.mxu1 (!%p138_p2), %v2376_v1  ;;  %2175 = vmatprep.subr.bf16.mxu0 (!%p138_p2), %v2377_v2  ;;  %v2382_v9 = vld [vmem:[%s2825_s1 + $0x18] sm:$0xff] (!%p138_p2)   ;;  %v2387_v17 = vld [vmem:[%s2825_s1 + $0x60] sm:$0xff] (!%p138_p2)   ;;  %v2389_v25 = vld [vmem:[%s2825_s1 + $0x68] sm:$0xff] (!%p138_p2)   ;;  %vm706_vm5 = vsmask.f32 (!%p138_p2), 4352  ;;  %vm1019_vm6 = vcmask (!%p138_p2), 1045504  }
   0x9   : > { %2187 = vmatprep.subr.bf16.mxu1 (!%p138_p2), %v2378_v3  ;;  %v2390_v27 = vld [vmem:[%s2825_s1 + $0x50] sm:$0xff] (!%p138_p2)   ;;  %v2392_v37 = vld [vmem:[%s2825_s1 + $0x58] sm:$0xff] (!%p138_p2)   ;;  %v2396_v46 = vld [vmem:[%s2825_s1 + $0x80] sm:$0xff] (!%p138_p2)   ;;  %vm1116_vm7 = vsmask.f32 (!%p138_p2), 5376 }
   0xa   : > { %v2391_v28 = vld [vmem:[%s2825_s1 + $0x70] sm:$0xff] (!%p138_p2)   ;;  %v2393_v42 = vld [vmem:[%s2825_s1 + $0x78] sm:$0xff] (!%p138_p2)   ;;  %v2397_v48 = vld [vmem:[%s2825_s1 + $0xa0] sm:$0xff] (!%p138_p2)  }
   0xb   : > { %2176 = vmatpush3.bf16.msra.mxu0 (!%p138_p2), %v2377_v2  ;;  %v2398_v60 = vld [vmem:[%s2825_s1 + $0x88] sm:$0xff] (!%p138_p2)  }
   0xc   : > { %2188 = vmatpush3.bf16.msra.mxu1 (!%p138_p2), %v2378_v3  ;;  %2177 = vmatprep.subr.bf16.mxu0 (!%p138_p2), %v2379_v4  ;;  %v2399_v61 = vld [vmem:[%s2825_s1 + $0xa8] sm:$0xff] (!%p138_p2)   ;;  %v2400_v3 = vld [vmem:[%s2825_s1 + $0x90] sm:$0xff] (!%p138_p2)  }
   0xd   : > { %s2829_s13 = smov (!%p161_p3, %s1937_s13), 1  ;;  %2189 = vmatprep.subr.bf16.mxu1 %v2380_v5 }
   0xe   : > { %s2365_s24 = smul.u32 24, %s2829_s13 }
   0xf   : > { %2178 = vmatpush3.bf16.msra.mxu0 %v2379_v4  ;;  %s2366_s26 = smul.u32 12, %s2829_s13 }
  0x10   : > { %s2522_s29 = scalar_lea.vmem %s2824_s0, %s2365_s24  ;;  %2190 = vmatpush3.bf16.msra.mxu1 %v2380_v5  ;;  %2179 = vmatprep.subr.bf16.mxu0 %v2381_v6 }
  0x11   : > { %v172_v7 = vld [vmem:[%s2522_s29] sm:$0xf]  ;;  %v2529_v8 = vld [vmem:[%s2522_s29 + $0x4] sm:$0xf]  ;;  %2191 = vmatprep.subr.bf16.mxu1 %v2382_v9  ;;  %v2587_v51 = vld [vmem:[%s2522_s29 + $0x8] ss:$0 sps:$4 sm:$0xff]  }
  0x12   : > { %v1944_v10 = vcombine.low %v172_v7, %v2529_v8  ;;  %v2536_v11 = vld [vmem:[%s2522_s29 + $0x8] ss:$0 sps:$4 sm:$0x33]   ;;  %v375_v26 = vld [vmem:[%s2522_s29] sm:$0xe]  ;;  %v601_v57 = vrot.slane %v2587_v51, 3 }
  0x13   : > { %v209_v15 = vshll.u32 %v2536_v11, 16  ;;  %v213_v16 = vshrl.u32 %v2536_v11, 16  ;;  %v2385_v20 = vld [vmem:[%s2522_s29 + $0x8] ss:$0 sps:$4 sm:$0x11]   ;;  %2180 = vmatpush3.bf16.msra.mxu0 %v2381_v6  ;;  %v1959_v29 = vcombine.low %v375_v26, %v2529_v8  ;;  %v389_v30 = vrot.slane %v2536_v11, 1 }
  0x14   : > { %v202_v13 = vshrl.u32 %v1944_v10, 16  ;;  %v204_v14 = vshll.u32 %v1944_v10, 16  ;;  %2193 = vmatprep.mubr.msk.bf16.mxu1 %vm240_vm0, %v1944_v10  ;;  %2192 = vmatpush3.bf16.msra.mxu1 %v2382_v9  ;;  %v2395_v31 = vld [vmem:[%s2522_s29 + $0x8] ss:$0 sps:$4 sm:$0x77]  }
  0x15   : > { %v211_v19 = vrot.slane %v209_v15, 1  ;;  %2197 = vmatprep.subr.bf16.mxu0 %v2386_v12  ;;  %2209 = vmatprep.subr.bf16.mxu1 %v2387_v17  ;;  %v388_v32 = vrot.slane %v1959_v29, 1  ;;  %v486_v33 = vshrl.u32 %v1959_v29, 16  ;;  %v489_v34 = vshll.u32 %v1959_v29, 16  ;;  %v583_v49 = vld [vmem:[%s2522_s29] sm:$0x8] }
  0x16   : > { %v206_v18 = vrot.slane %v204_v14, 1  ;;  %v494_v35 = vshrl.u32 %v2395_v31, 16  ;;  %v497_v36 = vshll.u32 %v2395_v31, 16  ;;  %v1973_v50 = vcombine.low %v583_v49, %v2529_v8  ;;  %v684_v52 = vld [vmem:[%s2522_s29] sm:$0x8]  ;;  %v2401_v8 = vld [vmem:[%s2825_s1 + $0xb0] sm:$0xff]  }
  0x17   : > { %v215_v22 = vor.u32 %v213_v16, %v211_v19  ;;  %2194 = vmatmul.mubr.msk.bf16.vlgmr.msra.gmra.mrb[0].mxu1 %vm240_vm0, %v2385_v20  ;;  %v390_v38 = vsel %vm387_vm2, %v388_v32, %v389_v30  ;;  %v488_v39 = vrot.slane %v486_v33, 1  ;;  %v491_v40 = vrot.slane %v489_v34, 2  ;;  %v685_v53 = vld [vmem:[%s2522_s29 + $0x4] sm:$0xf]  ;;  %v2592_v54 = vld [vmem:[%s2522_s29 + $0x8] sm:$0xf] }
  0x18   : > { %v207_v21 = vor.u32 %v206_v18, %v202_v13  ;;  %2210 = vmatpush3.bf16.msra.mxu1 %v2387_v17  ;;  %v496_v41 = vrot.slane %v494_v35, 1  ;;  %v499_v43 = vrot.slane %v497_v36, 2  ;;  %v2595_v55 = vld [vmem:[%s2522_s29 + $0xc] sm:$0x1]  ;;  %v600_v56 = vrot.slane %v1973_v50, 3  ;;  %v2403_v14 = vld [vmem:[%s2825_s1 + $0xb8] sm:$0xff]  }
  0x19   : > { %2211 = vmatprep.subr.bf16.mxu1 %v2389_v25  ;;  %v492_v44 = vor.u32 %v491_v40, %v488_v39  ;;  %v1981_v58 = vcombine.low %v684_v52, %v685_v53  ;;  %v1982_v59 = vcombine.low %v2592_v54, %v2595_v55  ;;  %v1989_v7 = vcombine.low %v685_v53, %v2592_v54  ;;  %v2417_v16 = vld [vmem:[%s2522_s29 + $0xc] ss:$0 sps:$4 sm:$0x33]   ;;  %v2408_v20 = vld [vmem:[%s2825_s1 + $0xc0] sm:$0xff]   ;;  %v2413_v31 = vld [vmem:[%s2825_s1 + $0xf0] sm:$0xff]  }
  0x1a   : > { %v212_v24 = vsel %vm200_vm1, %v207_v21, %v211_v19  ;;  %v500_v45 = vor.u32 %v499_v43, %v496_v41  ;;  %v602_v1 = vsel %vm599_vm4, %v600_v56, %v601_v57  ;;  %v915_v19 = vshll.u32 %v2417_v16, 16  ;;  %v2409_v21 = vld [vmem:[%s2825_s1 + $0xe0] sm:$0xff]   ;;  %v2644_v29 = vld [vmem:[%s2522_s29 + $0xc] ss:$0 sps:$4 sm:$0xff]   ;;  %v2414_v36 = vld [vmem:[%s2825_s1 + $0xd8] sm:$0xff]  }
  0x1b   : > { %2181 = vmatprep.mubr.msk.bf16.mxu0 %vm240_vm0, %v212_v24  ;;  %v708_v62 = vshrl.u32 %v1981_v58, 16  ;;  %v711_v63 = vshll.u32 %v1981_v58, 16  ;;  %v716_v0 = vshrl.u32 %v1982_v59, 16  ;;  %v719_v2 = vshll.u32 %v1982_v59, 16  ;;  %v2410_v24 = vld [vmem:[%s2825_s1 + $0xc8] sm:$0xff]  }
  0x1c   : > { %2182 = vmatmul.mubr.msk.bf16.vlgmr.msra.gmra.mrb[0].mxu0 %vm240_vm0, %v215_v22  ;;  %2212 = vmatpush3.bf16.msra.mxu1 %v2389_v25  ;;  %v501_v47 = vsel %vm484_vm3, %v492_v44, %v500_v45  ;;  %v910_v13 = vshll.u32 %v1989_v7, 16  ;;  %v908_v17 = vshrl.u32 %v1989_v7, 16  ;;  %v2411_v25 = vld [vmem:[%s2825_s1 + $0xe8] sm:$0xff]   ;;  %v1003_v26 = vld [vmem:[%s2522_s29 + $0x4] sm:$0xc]  ;;  %v1126_v34 = vshrl.u32 %v2644_v29, 16 }
  0x1d   : > { %2198 = vmatpush3.bf16.msra.mxu0 %v2386_v12  ;;  %2213 = vmatprep.subr.bf16.mxu1 %v2391_v28  ;;  %v710_v4 = vrot.slane %v708_v62, 3  ;;  %v713_v5 = vrot.slane %v711_v63, 4  ;;  %v718_v6 = vrot.slane %v716_v0, 3  ;;  %v721_v9 = vrot.slane %v719_v2, 4  ;;  %v2402_v12 = vld [vmem:[%s2825_s1 + $0x98] sm:$0xff]   ;;  %v2419_v44 = vld [vmem:[%s2825_s1 + $0x100] sm:$0xff]  }
  0x1e   : > { %2199 = vmatprep.subr.bf16.mxu0 %v2388_v23  ;;  %2205 = vmatprep.mubr.msk.bf16.mxu0 %vm240_vm0, %v390_v38  ;;  %v912_v18 = vrot.slane %v910_v13, 1  ;;  %v1129_v35 = vshll.u32 %v2644_v29, 16  ;;  %v2415_v38 = vld [vmem:[%s2825_s1 + $0xf8] sm:$0xff]   ;;  %v919_v39 = vshrl.u32 %v2417_v16, 16  ;;  %v1990_v49 = vcombine.low %v2595_v55, %v2595_v55  ;;  %v2675_v52 = vld [vmem:[%s2522_s29 + $0xc] sm:$0xf] }
  0x1f   : > { %2217 = vmatprep.mubr.msk.bf16.mxu1 %vm240_vm0, %v501_v47  ;;  %v714_v10 = vor.u32 %v713_v5, %v710_v4  ;;  %v722_v11 = vor.u32 %v721_v9, %v718_v6  ;;  %v1314_v53 = vld [vmem:[%s2522_s29 + $0x10] sm:$0x1]  ;;  %v2421_v56 = vld [vmem:[%s2825_s1 + $0x108] sm:$0xff]   ;;  %v1215_v63 = vld [vmem:[%s2522_s29 + $0x4] sm:$0x8] }
  0x20   : > { %2214 = vmatpush3.bf16.msra.mxu1 %v2391_v28  ;;  %v913_v22 = vor.u32 %v912_v18, %v908_v17  ;;  %v2004_v28 = vcombine.low %v1003_v26, %v2592_v54  ;;  %v1131_v43 = vrot.slane %v1129_v35, 3  ;;  %v2439_v58 = vld [vmem:[%s2522_s29 + $0x4] sm:$0xf8]   ;;  %v2423_v55 = vld [vmem:[%s2825_s1 + $0x110] sm:$0xff]   ;;  %v2425_v4 = vld [vmem:[%s2825_s1 + $0x118] sm:$0xff]   ;;  %v2019_v6 = vcombine.low %v1215_v63, %v2592_v54 }
  0x21   : > { %2200 = vmatpush3.bf16.msra.mxu0 %v2388_v23  ;;  %2215 = vmatprep.subr.bf16.mxu1 %v2393_v42  ;;  %v723_v15 = vsel %vm706_vm5, %v714_v10, %v722_v11  ;;  %v917_v23 = vrot.slane %v915_v19, 1  ;;  %v2424_v62 = vld [vmem:[%s2825_s1 + $0x130] sm:$0xff]   ;;  %v1334_v0 = vshrl.u32 %v2439_v58, 16  ;;  %v2426_v5 = vld [vmem:[%s2825_s1 + $0x138] sm:$0xff]   ;;  %v1228_v54 = vrot.slane %v2644_v29, 3  ;;  %v2433_v18 = vld [vmem:[%s2825_s1 + $0x168] sm:$0xff]  }
  0x22   : > { %2201 = vmatprep.subr.bf16.mxu0 %v2390_v27  ;;  %v1118_v32 = vshrl.u32 %v2004_v28, 16  ;;  %v1121_v33 = vshll.u32 %v2004_v28, 16  ;;  %v1227_v13 = vrot.slane %v2019_v6, 3  ;;  %v1431_v17 = vld [vmem:[%s2522_s29 + $0x8] sm:$0xe]  ;;  %v2436_v29 = vld [vmem:[%s2825_s1 + $0x158] sm:$0xff]  }
  0x23   : > { %v2453_v63 = vld [vmem:[%s2825_s1 + $0x1e0] sm:$0xff]  }
  0x24   : > { %2216 = vmatpush3.bf16.msra.mxu1 %v2393_v42  ;;  %v1120_v40 = vrot.slane %v1118_v32, 2  ;;  %v1123_v41 = vrot.slane %v1121_v33, 3  ;;  %v1128_v42 = vrot.slane %v1126_v34, 2  ;;  %v1229_v19 = vsel %vm599_vm4, %v1227_v13, %v1228_v54 }
  0x25   : > { %2202 = vmatpush3.bf16.msra.mxu0 %v2390_v27  ;;  %2233 = vmatprep.subr.bf16.mxu1 %v2397_v48  ;;  %v918_v27 = vsel %vm200_vm1, %v913_v22, %v917_v23  ;;  %v2726_v22 = vld [vmem:[%s2522_s29 + $0x10] ss:$0 sps:$4 sm:$0x77]  }
  0x26   : > { %2203 = vmatprep.subr.bf16.mxu0 %v2392_v37  ;;  %v1124_v50 = vor.u32 %v1123_v41, %v1120_v40  ;;  %v1132_v51 = vor.u32 %v1131_v43, %v1128_v42  ;;  %v1641_v42 = vld [vmem:[%s2522_s29 + $0x8] sm:$0xc] }
  0x27   : > { %2218 = vmatmul.mubr.msk.bf16.vlgmr.msra.gmra.mrb[4].mxu1 %vm240_vm0, %v500_v45  ;;  %v2420_v45 = vld [vmem:[%s2825_s1 + $0x120] sm:$0xff]   ;;  %v2443_v43 = vld [vmem:[%s2825_s1 + $0x188] sm:$0xff]  }
  0x28   : > { %2234 = vmatpush3.bf16.msra.mxu1 %v2397_v48  ;;  %2241 = vmatprep.mubr.msk.bf16.mxu1 %vm240_vm0, %v723_v15  ;;  %v921_v48 = vor.u32 %v919_v39, %v917_v23  ;;  %v2434_v23 = vld [vmem:[%s2825_s1 + $0x150] sm:$0xff]  }
  0x29   : > { %2204 = vmatpush3.bf16.msra.mxu0 %v2392_v37  ;;  %2235 = vmatprep.subr.bf16.mxu1 %v2399_v61  ;;  %v2660_v37 = vld [vmem:[%s2522_s29 + $0xc] ss:$0 sps:$4 sm:$0x77]  }
  0x2a   : > { %2221 = vmatprep.subr.bf16.mxu0 %v2396_v46  ;;  %v1021_v47 = vrot.slane %v2660_v37, 2  ;;  %v2442_v37 = vld [vmem:[%s2825_s1 + $0x1a0] sm:$0xff]  }
  0x2c   : > { %2206 = vmatmul.mubr.msk.bf16.vlgmr.msra.gmra.mrb[4].mxu0 %vm240_vm0, %v389_v30  ;;  %2236 = vmatpush3.bf16.msra.mxu1 %v2399_v61  ;;  %v2412_v30 = vld [vmem:[%s2825_s1 + $0xd0] sm:$0xff]   ;;  %v2027_v61 = vcombine.low %v2675_v52, %v1314_v53 }
  0x2d   : > { %2222 = vmatpush3.bf16.msra.mxu0 %v2396_v46  ;;  %2229 = vmatprep.mubr.msk.bf16.mxu0 %vm240_vm0, %v602_v1  ;;  %v1020_v46 = vrot.slane %v2004_v28, 2  ;;  %v1337_v1 = vshll.u32 %v2439_v58, 16  ;;  %v1555_v28 = vshll.u32 %v2726_v22, 16  ;;  %v2448_v58 = vld [vmem:[%s2825_s1 + $0x1b8] sm:$0xff]  }
  0x2e   : > { %2223 = vmatprep.subr.bf16.mxu0 %v2398_v60  ;;  %2237 = vmatprep.subr.bf16.mxu1 %v2401_v8  ;;  %v1342_v2 = vshrl.u32 %v2027_v61, 16 }
  0x2f   : > { %v1022_v59 = vsel %vm1019_vm6, %v1020_v46, %v1021_v47  ;;  %v1557_v35 = vrot.slane %v1555_v28, 2 }
  0x30   : > { %2238 = vmatpush3.bf16.msra.mxu1 %v2401_v8  ;;  %v1339_v8 = vrot.slane %v1337_v1, 4  ;;  %v1344_v9 = vrot.slane %v1342_v2, 3  ;;  %v1654_v1 = vrot.slane %v2726_v22, 2 }
  0x31   : > { %2224 = vmatpush3.bf16.msra.mxu0 %v2398_v60  ;;  %2239 = vmatprep.subr.bf16.mxu1 %v2403_v14  ;;  %v1133_v60 = vsel %vm1116_vm7, %v1124_v50, %v1132_v51  ;;  %v2446_v50 = vld [vmem:[%s2825_s1 + $0x1b0] sm:$0xff]  }
  0x32   : > { %2225 = vmatprep.subr.bf16.mxu0 %v2400_v3 }
  0x34   : > { %2240 = vmatpush3.bf16.msra.mxu1 %v2403_v14  ;;  %v2432_v14 = vld [vmem:[%s2825_s1 + $0x148] sm:$0xff]  }
  0x35   : > { %2226 = vmatpush3.bf16.msra.mxu0 %v2400_v3  ;;  %2257 = vmatprep.subr.bf16.mxu1 %v2409_v21  ;;  %v1345_v3 = vshll.u32 %v2027_v61, 16 }
  0x36   : > { %2227 = vmatprep.subr.bf16.mxu0 %v2402_v12 }
  0x37   : > { %2242 = vmatmul.mubr.msk.bf16.vlgmr.msra.gmra.mrb[8].mxu1 %vm240_vm0, %v722_v11  ;;  %v1347_v10 = vrot.slane %v1345_v3, 4  ;;  %v2430_v11 = vld [vmem:[%s2825_s1 + $0x140] sm:$0xff]  }
  0x38   : > { %2258 = vmatpush3.bf16.msra.mxu1 %v2409_v21  ;;  %2265 = vmatprep.mubr.msk.bf16.mxu1 %vm240_vm0, %v918_v27  ;;  %v2034_v21 = vcombine.low %v1431_v17, %v2675_v52  ;;  %v1552_v27 = vshrl.u32 %v2726_v22, 16 }
  0x39   : > { %2228 = vmatpush3.bf16.msra.mxu0 %v2402_v12  ;;  %2259 = vmatprep.subr.bf16.mxu1 %v2411_v25  ;;  %v2431_v12 = vld [vmem:[%s2825_s1 + $0x160] sm:$0xff]   ;;  %v1348_v16 = vor.u32 %v1347_v10, %v1344_v9  ;;  %v2457_v9 = vld [vmem:[%s2825_s1 + $0x1f0] sm:$0xff]   ;;  %v2458_v10 = vld [vmem:[%s2825_s1 + $0x1d8] sm:$0xff]  }
  0x3a   : > { %2245 = vmatprep.subr.bf16.mxu0 %v2408_v20  ;;  %v1547_v26 = vshll.u32 %v2034_v21, 16  ;;  %v1554_v34 = vrot.slane %v1552_v27, 1 }
  0x3c   : > { %2230 = vmatmul.mubr.msk.bf16.vlgmr.msra.gmra.mrb[8].mxu0 %vm240_vm0, %v601_v57  ;;  %2260 = vmatpush3.bf16.msra.mxu1 %v2411_v25  ;;  %v2422_v57 = vld [vmem:[%s2825_s1 + $0x128] sm:$0xff]   ;;  %v1544_v25 = vshrl.u32 %v2034_v21, 16  ;;  %v1549_v33 = vrot.slane %v1547_v26, 2  ;;  %v1558_v41 = vor.u32 %v1557_v35, %v1554_v34 }
  0x3d   : > { %2246 = vmatpush3.bf16.msra.mxu0 %v2408_v20  ;;  %2253 = vmatprep.mubr.msk.bf16.mxu0 %vm240_vm0, %v1989_v7  ;;  %v1336_v7 = vrot.slane %v1334_v0, 3 }
  0x3e   : > { %2247 = vmatprep.subr.bf16.mxu0 %v2410_v24  ;;  %2261 = vmatprep.subr.bf16.mxu1 %v2413_v31  ;;  %v1546_v32 = vrot.slane %v1544_v25, 1 }
  0x3f   : > { %v1340_v15 = vor.u32 %v1339_v8, %v1336_v7  ;;  %v2456_v8 = vld [vmem:[%s2825_s1 + $0x1d0] sm:$0xff]  }
  0x40   : > { %2262 = vmatpush3.bf16.msra.mxu1 %v2413_v31  ;;  %v2745_v31 = vld [vmem:[%s2522_s29 + $0x10] ss:$0 sps:$4 sm:$0x33]   ;;  %v1550_v40 = vor.u32 %v1549_v33, %v1546_v32 }
  0x41   : > { %2248 = vmatpush3.bf16.msra.mxu0 %v2410_v24  ;;  %2263 = vmatprep.subr.bf16.mxu1 %v2415_v38  ;;  %v1349_v20 = vsel %vm706_vm5, %v1340_v15, %v1348_v16  ;;  %v2435_v24 = vld [vmem:[%s2825_s1 + $0x170] sm:$0xff]   ;;  %v1448_v39 = vrot.slane %v2745_v31, 1 }
  0x42   : > { %2249 = vmatprep.subr.bf16.mxu0 %v2412_v30  ;;  %v1559_v46 = vsel %vm484_vm3, %v1550_v40, %v1558_v41 }
  0x44   : > { %2264 = vmatpush3.bf16.msra.mxu1 %v2415_v38  ;;  %v1447_v38 = vrot.slane %v2034_v21, 1 }
  0x45   : > { %2250 = vmatpush3.bf16.msra.mxu0 %v2412_v30  ;;  %2281 = vmatprep.subr.bf16.mxu1 %v2420_v45  ;;  %v2437_v30 = vld [vmem:[%s2825_s1 + $0x178] sm:$0xff]  }
  0x46   : > { %2251 = vmatprep.subr.bf16.mxu0 %v2414_v36 }
  0x47   : > { %2266 = vmatmul.mubr.msk.bf16.vlgmr.msra.gmra.mrb[12].mxu1 %vm240_vm0, %v921_v48  ;;  %v2461_v48 = vld [vmem:[%s2522_s29 + $0x10] ss:$0 sps:$4 sm:$0xff]   ;;  %s170_s29 = scalar_lea.vmem %s2827_s3, %s2366_s26 }
  0x48   : > { %2282 = vmatpush3.bf16.msra.mxu1 %v2420_v45  ;;  %2289 = vmatprep.mubr.msk.bf16.mxu1 %vm240_vm0, %v1133_v60  ;;  %v1449_v45 = vsel %vm387_vm2, %v1447_v38, %v1448_v39 }
  0x49   : > { %2252 = vmatpush3.bf16.msra.mxu0 %v2414_v36  ;;  %2283 = vmatprep.subr.bf16.mxu1 %v2422_v57  ;;  %v2441_v36 = vld [vmem:[%s2825_s1 + $0x180] sm:$0xff]  }
  0x4a   : > { %2269 = vmatprep.subr.bf16.mxu0 %v2419_v44 }
  0x4c   : > { %2254 = vmatmul.mubr.msk.bf16.vlgmr.msra.gmra.mrb[12].mxu0 %vm240_vm0, %v1990_v49  ;;  %2284 = vmatpush3.bf16.msra.mxu1 %v2422_v57  ;;  %v2445_v49 = vld [vmem:[%s2825_s1 + $0x190] sm:$0xff]   ;;  %v2447_v57 = vld [vmem:[%s2825_s1 + $0x198] sm:$0xff]  }
  0x4d   : > { %2270 = vmatpush3.bf16.msra.mxu0 %v2419_v44  ;;  %2277 = vmatprep.mubr.msk.bf16.mxu0 %vm240_vm0, %v1022_v59  ;;  %v2444_v44 = vld [vmem:[%s2825_s1 + $0x1a8] sm:$0xff]  }
  0x4e   : > { %2271 = vmatprep.subr.bf16.mxu0 %v2421_v56  ;;  %2285 = vmatprep.subr.bf16.mxu1 %v2424_v62 }
  0x50   : > { %2286 = vmatpush3.bf16.msra.mxu1 %v2424_v62  ;;  %v2452_v62 = vld [vmem:[%s2825_s1 + $0x1c0] sm:$0xff]  }
  0x51   : > { %2272 = vmatpush3.bf16.msra.mxu0 %v2421_v56  ;;  %2287 = vmatprep.subr.bf16.mxu1 %v2426_v5  ;;  %v1761_v56 = vshll.u32 %v2461_v48, 16 }
  0x52   : > { %2273 = vmatprep.subr.bf16.mxu0 %v2423_v55 }
  0x53   : > { %v1763_v61 = vrot.slane %v1761_v56, 3 }
  0x54   : > { %2288 = vmatpush3.bf16.msra.mxu1 %v2426_v5  ;;  %v2455_v5 = vld [vmem:[%s2825_s1 + $0x1e8] sm:$0xff]  }
  0x55   : > { %2274 = vmatpush3.bf16.msra.mxu0 %v2423_v55  ;;  %2305 = vmatprep.subr.bf16.mxu1 %v2431_v12 }
  0x56   : > { %2275 = vmatprep.subr.bf16.mxu0 %v2425_v4 }
  0x57   : > { %2290 = vmatmul.mubr.msk.bf16.vlgmr.msra.gmra.mrb[16].mxu1 %vm240_vm0, %v1132_v51 }
  0x58   : > { %2306 = vmatpush3.bf16.msra.mxu1 %v2431_v12  ;;  %2313 = vmatprep.mubr.msk.bf16.mxu1 %vm240_vm0, %v1349_v20 }
  0x59   : > { %2276 = vmatpush3.bf16.msra.mxu0 %v2425_v4  ;;  %2307 = vmatprep.subr.bf16.mxu1 %v2433_v18  ;;  %v2454_v4 = vld [vmem:[%s2825_s1 + $0x1c8] sm:$0xff]  }
  0x5a   : > { %2293 = vmatprep.subr.bf16.mxu0 %v2430_v11 }
  0x5c   : > { %2278 = vmatmul.mubr.msk.bf16.vlgmr.msra.gmra.mrb[16].mxu0 %vm240_vm0, %v1021_v47  ;;  %2308 = vmatpush3.bf16.msra.mxu1 %v2433_v18  ;;  %v2049_v47 = vcombine.low %v1641_v42, %v2675_v52  ;;  %v1758_v52 = vshrl.u32 %v2461_v48, 16 }
  0x5d   : > { %2294 = vmatpush3.bf16.msra.mxu0 %v2430_v11  ;;  %2301 = vmatprep.mubr.msk.bf16.mxu0 %vm240_vm0, %v1229_v19  ;;  %v2459_v11 = vld [vmem:[%s2825_s1 + $0x1f8] sm:$0xff]  }
  0x5e   : > { %2295 = vmatprep.subr.bf16.mxu0 %v2432_v14  ;;  %2309 = vmatprep.subr.bf16.mxu1 %v2435_v24  ;;  %v1750_v51 = vshrl.u32 %v2049_v47, 16  ;;  %v1753_v53 = vshll.u32 %v2049_v47, 16  ;;  %v1760_v60 = vrot.slane %v1758_v52, 2  ;;  %v1653_v0 = vrot.slane %v2049_v47, 2 }
  0x60   : > { %2310 = vmatpush3.bf16.msra.mxu1 %v2435_v24  ;;  %v1752_v55 = vrot.slane %v1750_v51, 2  ;;  %v1755_v59 = vrot.slane %v1753_v53, 3  ;;  %v1764_v3 = vor.u32 %v1763_v61, %v1760_v60  ;;  %v1655_v6 = vsel %vm1019_vm6, %v1653_v0, %v1654_v1 }
  0x61   : > { %2296 = vmatpush3.bf16.msra.mxu0 %v2432_v14  ;;  %2311 = vmatprep.subr.bf16.mxu1 %v2437_v30 }
  0x62   : > { %2297 = vmatprep.subr.bf16.mxu0 %v2434_v23  ;;  %v1756_v2 = vor.u32 %v1755_v59, %v1752_v55 }
  0x64   : > { %2312 = vmatpush3.bf16.msra.mxu1 %v2437_v30  ;;  %v1765_v7 = vsel %vm1116_vm7, %v1756_v2, %v1764_v3 }
  0x65   : > { %2298 = vmatpush3.bf16.msra.mxu0 %v2434_v23  ;;  %2329 = vmatprep.subr.bf16.mxu1 %v2442_v37 }
  0x66   : > { %2299 = vmatprep.subr.bf16.mxu0 %v2436_v29 }
  0x67   : > { %2314 = vmatmul.mubr.msk.bf16.vlgmr.msra.gmra.mrb[20].mxu1 %vm240_vm0, %v1348_v16 }
  0x68   : > { %2330 = vmatpush3.bf16.msra.mxu1 %v2442_v37  ;;  %2337 = vmatprep.mubr.msk.bf16.mxu1 %vm240_vm0, %v1559_v46 }
  0x69   : > { %2300 = vmatpush3.bf16.msra.mxu0 %v2436_v29  ;;  %2331 = vmatprep.subr.bf16.mxu1 %v2444_v44 }
  0x6a   : > { %2317 = vmatprep.subr.bf16.mxu0 %v2441_v36 }
  0x6c   : > { %2302 = vmatmul.mubr.msk.bf16.vlgmr.msra.gmra.mrb[20].mxu0 %vm240_vm0, %v1228_v54  ;;  %2332 = vmatpush3.bf16.msra.mxu1 %v2444_v44 }
  0x6d   : > { %2318 = vmatpush3.bf16.msra.mxu0 %v2441_v36  ;;  %2325 = vmatprep.mubr.msk.bf16.mxu0 %vm240_vm0, %v1449_v45 }
  0x6e   : > { %2319 = vmatprep.subr.bf16.mxu0 %v2443_v43  ;;  %2333 = vmatprep.subr.bf16.mxu1 %v2446_v50 }
  0x70   : > { %2334 = vmatpush3.bf16.msra.mxu1 %v2446_v50 }
  0x71   : > { %2320 = vmatpush3.bf16.msra.mxu0 %v2443_v43  ;;  %2335 = vmatprep.subr.bf16.mxu1 %v2448_v58 }
  0x72   : > { %2321 = vmatprep.subr.bf16.mxu0 %v2445_v49 }
  0x74   : > { %2336 = vmatpush3.bf16.msra.mxu1 %v2448_v58 }
  0x75   : > { %2322 = vmatpush3.bf16.msra.mxu0 %v2445_v49  ;;  %2353 = vmatprep.subr.bf16.mxu1 %v2453_v63 }
  0x76   : > { %2323 = vmatprep.subr.bf16.mxu0 %v2447_v57 }
  0x77   : > { %2338 = vmatmul.mubr.msk.bf16.vlgmr.msra.gmra.mrb[24].mxu1 %vm240_vm0, %v1558_v41 }
  0x78   : > { %2354 = vmatpush3.bf16.msra.mxu1 %v2453_v63  ;;  %2361 = vmatprep.mubr.msk.bf16.mxu1 %vm240_vm0, %v1765_v7 }
  0x79   : > { %2324 = vmatpush3.bf16.msra.mxu0 %v2447_v57  ;;  %2355 = vmatprep.subr.bf16.mxu1 %v2455_v5 }
  0x7a   : > { %2341 = vmatprep.subr.bf16.mxu0 %v2452_v62 }
  0x7c   : > { %2326 = vmatmul.mubr.msk.bf16.vlgmr.msra.gmra.mrb[24].mxu0 %vm240_vm0, %v1448_v39  ;;  %2356 = vmatpush3.bf16.msra.mxu1 %v2455_v5 }
  0x7d   : > { %2342 = vmatpush3.bf16.msra.mxu0 %v2452_v62  ;;  %2349 = vmatprep.mubr.msk.bf16.mxu0 %vm240_vm0, %v1655_v6 }
  0x7e   : > { %2343 = vmatprep.subr.bf16.mxu0 %v2454_v4  ;;  %2357 = vmatprep.subr.bf16.mxu1 %v2457_v9 }
  0x80   : > { %2358 = vmatpush3.bf16.msra.mxu1 %v2457_v9 }
  0x81   : > { %2344 = vmatpush3.bf16.msra.mxu0 %v2454_v4  ;;  %2359 = vmatprep.subr.bf16.mxu1 %v2459_v11 }
  0x82   : > { %2345 = vmatprep.subr.bf16.mxu0 %v2456_v8 }
  0x84   : > { %2360 = vmatpush3.bf16.msra.mxu1 %v2459_v11 }
  0x85   : > { %2346 = vmatpush3.bf16.msra.mxu0 %v2456_v8 }
  0x86   : > { %2347 = vmatprep.subr.bf16.mxu0 %v2458_v10 }
  0x87   : > { %2362 = vmatmul.mubr.msk.bf16.vlgmr.msra.gmra.mrb[28].mxu1 %vm240_vm0, %v1764_v3 }
  0x89   : > { %2348 = vmatpush3.bf16.msra.mxu0 %v2458_v10 }
  0x8c   : > { %2350 = vmatmul.mubr.msk.bf16.vlgmr.msra.gmra.mrb[28].mxu0 %vm240_vm0, %v1654_v1 }
  0xea   : > { %v2195_v13 = vpop.f32.mrb[0].mxu1 }
  0xeb   : > { %v361_v15 = vpop.f32.mrb[1].mxu1 }
  0xec   : > { %v2196_v18 = vpop.f32.mrb[2].mxu1 }
  0xed   : > { %v364_v20 = vpop.f32.mrb[3].mxu1 }
  0xef   : > { %v2183_v12 = vpop.f32.mrb[0].mxu0 }
  0xf0   : > { %v370_v54 = vadd.f32 %v2195_v13, %v2183_v12  ;;  %v281_v14 = vpop.f32.mrb[1].mxu0 }
  0xf1   : > { %v362_v16 = vadd.f32 %v361_v15, %v281_v14  ;;  %v2184_v17 = vpop.f32.mrb[2].mxu0 }
  0xf2   : > { %v284_v19 = vpop.f32.mrb[3].mxu0 }
  0xf3   : > { %v365_v21 = vadd.f32 %v364_v20, %v284_v19 }
  0xfa   : > { %v2219_v23 = vpop.f32.mrb[4].mxu1 }
  0xfb   : > { %v566_v26 = vpop.f32.mrb[5].mxu1 }
  0xfc   : > { %v2220_v29 = vpop.f32.mrb[6].mxu1 }
  0xfd   : > { %v569_v32 = vpop.f32.mrb[7].mxu1 }
  0xff   : > { %v2207_v22 = vpop.f32.mrb[4].mxu0 }
 0x100   : > { %v471_v24 = vadd.f32 %v2207_v22, %v370_v54  ;;  %v455_v25 = vpop.f32.mrb[5].mxu0 }
 0x101   : > { %v469_v27 = vadd.f32 %v455_v25, %v362_v16  ;;  %v2208_v28 = vpop.f32.mrb[6].mxu0 }
 0x102   : > { %v582_v30 = vadd.f32 %v2219_v23, %v471_v24  ;;  %v458_v31 = vpop.f32.mrb[7].mxu0 }
 0x103   : > { %v580_v33 = vadd.f32 %v566_v26, %v469_v27  ;;  %v470_v34 = vadd.f32 %v458_v31, %v365_v21 }
 0x105   : > { %v581_v35 = vadd.f32 %v569_v32, %v470_v34 }
 0x10a   : > { %v2243_v37 = vpop.f32.mrb[8].mxu1 }
 0x10b   : > { %v788_v40 = vpop.f32.mrb[9].mxu1 }
 0x10c   : > { %v2244_v43 = vpop.f32.mrb[10].mxu1 }
 0x10d   : > { %v791_v46 = vpop.f32.mrb[11].mxu1 }
 0x10f   : > { %v2231_v36 = vpop.f32.mrb[8].mxu0 }
 0x110   : > { %v683_v38 = vadd.f32 %v2231_v36, %v582_v30  ;;  %v667_v39 = vpop.f32.mrb[9].mxu0 }
 0x111   : > { %v681_v41 = vadd.f32 %v667_v39, %v580_v33  ;;  %v2232_v42 = vpop.f32.mrb[10].mxu0 }
 0x112   : > { %v804_v44 = vadd.f32 %v2243_v37, %v683_v38  ;;  %v670_v45 = vpop.f32.mrb[11].mxu0 }
 0x113   : > { %v802_v47 = vadd.f32 %v788_v40, %v681_v41  ;;  %v682_v48 = vadd.f32 %v670_v45, %v581_v35 }
 0x115   : > { %v803_v49 = vadd.f32 %v791_v46, %v682_v48 }
 0x11a   : > { %v2267_v51 = vpop.f32.mrb[12].mxu1 }
 0x11b   : > { %v986_v56 = vpop.f32.mrb[13].mxu1 }
 0x11c   : > { %v2268_v55 = vpop.f32.mrb[14].mxu1 }
 0x11d   : > { %v989_v61 = vpop.f32.mrb[15].mxu1 }
 0x11f   : > { %v2255_v50 = vpop.f32.mrb[12].mxu0 }
 0x120   : > { %v895_v53 = vadd.f32 %v2255_v50, %v804_v44  ;;  %v879_v52 = vpop.f32.mrb[13].mxu0 }
 0x121   : > { %v893_v57 = vadd.f32 %v879_v52, %v802_v47  ;;  %v2256_v58 = vpop.f32.mrb[14].mxu0  ;;  %v2063_v47 = vld [vmem:[%s2826_s2] ss:$0 sm:$0xff] }
 0x122   : > { %v1002_v59 = vadd.f32 %v2267_v51, %v895_v53  ;;  %v882_v60 = vpop.f32.mrb[15].mxu0 }
 0x123   : > { %v1000_v62 = vadd.f32 %v986_v56, %v893_v57  ;;  %v894_v63 = vadd.f32 %v882_v60, %v803_v49 }
 0x125   : > { %v1001_v0 = vadd.f32 %v989_v61, %v894_v63 }
 0x12a   : > { %v2291_v2 = vpop.f32.mrb[16].mxu1 }
 0x12b   : > { %v1198_v5 = vpop.f32.mrb[17].mxu1 }
 0x12c   : > { %v2292_v8 = vpop.f32.mrb[18].mxu1 }
 0x12d   : > { %v1201_v11 = vpop.f32.mrb[19].mxu1 }
 0x12f   : > { %v2279_v1 = vpop.f32.mrb[16].mxu0 }
 0x130   : > { %v1103_v3 = vadd.f32 %v2279_v1, %v1002_v59  ;;  %v1087_v4 = vpop.f32.mrb[17].mxu0 }
 0x131   : > { %v1101_v6 = vadd.f32 %v1087_v4, %v1000_v62  ;;  %v2280_v7 = vpop.f32.mrb[18].mxu0 }
 0x132   : > { %v1214_v9 = vadd.f32 %v2291_v2, %v1103_v3  ;;  %v1090_v10 = vpop.f32.mrb[19].mxu0 }
 0x133   : > { %v1212_v12 = vadd.f32 %v1198_v5, %v1101_v6  ;;  %v1102_v13 = vadd.f32 %v1090_v10, %v1001_v0 }
 0x135   : > { %v1213_v54 = vadd.f32 %v1201_v11, %v1102_v13 }
 0x13a   : > { %v2315_v15 = vpop.f32.mrb[20].mxu1 }
 0x13b   : > { %v1414_v18 = vpop.f32.mrb[21].mxu1 }
 0x13c   : > { %v2316_v21 = vpop.f32.mrb[22].mxu1 }
 0x13d   : > { %v1417_v24 = vpop.f32.mrb[23].mxu1 }
 0x13f   : > { %v2303_v14 = vpop.f32.mrb[20].mxu0 }
 0x140   : > { %v1310_v16 = vadd.f32 %v2303_v14, %v1214_v9  ;;  %v1294_v17 = vpop.f32.mrb[21].mxu0 }
 0x141   : > { %v1308_v19 = vadd.f32 %v1294_v17, %v1212_v12  ;;  %v2304_v20 = vpop.f32.mrb[22].mxu0 }
 0x142   : > { %v1430_v22 = vadd.f32 %v2315_v15, %v1310_v16  ;;  %v1297_v23 = vpop.f32.mrb[23].mxu0 }
 0x143   : > { %v1428_v25 = vadd.f32 %v1414_v18, %v1308_v19  ;;  %v1309_v26 = vadd.f32 %v1297_v23, %v1213_v54 }
 0x145   : > { %v1429_v27 = vadd.f32 %v1417_v24, %v1309_v26 }
 0x14a   : > { %v2339_v29 = vpop.f32.mrb[24].mxu1 }
 0x14b   : > { %v1624_v32 = vpop.f32.mrb[25].mxu1 }
 0x14c   : > { %v2340_v35 = vpop.f32.mrb[26].mxu1 }
 0x14d   : > { %v1627_v38 = vpop.f32.mrb[27].mxu1 }
 0x14f   : > { %v2327_v28 = vpop.f32.mrb[24].mxu0 }
 0x150   : > { %v1530_v30 = vadd.f32 %v2327_v28, %v1430_v22  ;;  %v1514_v31 = vpop.f32.mrb[25].mxu0 }
 0x151   : > { %v1528_v33 = vadd.f32 %v1514_v31, %v1428_v25  ;;  %v2328_v34 = vpop.f32.mrb[26].mxu0 }
 0x152   : > { %v1640_v36 = vadd.f32 %v2339_v29, %v1530_v30  ;;  %v1517_v37 = vpop.f32.mrb[27].mxu0 }
 0x153   : > { %v1638_v39 = vadd.f32 %v1624_v32, %v1528_v33  ;;  %v1529_v40 = vadd.f32 %v1517_v37, %v1429_v27 }
 0x155   : > { %v1639_v41 = vadd.f32 %v1627_v38, %v1529_v40 }
 0x15a   : > { %v2363_v43 = vpop.f32.mrb[28].mxu1 }
 0x15b   : > { %v1830_v46 = vpop.f32.mrb[29].mxu1 }
 0x15c   : > { %v2364_v50 = vpop.f32.mrb[30].mxu1 }
 0x15d   : > { %v1833_v52 = vpop.f32.mrb[31].mxu1 }
 0x15f   : > { %v2351_v42 = vpop.f32.mrb[28].mxu0 }
 0x160   : > { %v1736_v44 = vadd.f32 %v2351_v42, %v1640_v36  ;;  %v1720_v45 = vpop.f32.mrb[29].mxu0 }
 0x161   : > { %v1734_v48 = vadd.f32 %v1720_v45, %v1638_v39  ;;  %v2352_v49 = vpop.f32.mrb[30].mxu0 }
 0x162   : > { %v1846_v51 = vadd.f32 %v2363_v43, %v1736_v44  ;;  %v1723_v53 = vpop.f32.mrb[31].mxu0 }
 0x163   : > { %v1844_v56 = vadd.f32 %v1830_v46, %v1734_v48  ;;  %v1735_v57 = vadd.f32 %v1723_v53, %v1639_v41 }
 0x164   : > { %v1856_v58 = vadd.f32 %v2063_v47, %v1846_v51 }
 0x165   : > { %v1854_v55 = vadd.f32 %v2063_v47, %v1844_v56  ;;  %v1845_v59 = vadd.f32 %v1833_v52, %v1735_v57 }
 0x166   : > { %vm1859_vm8 = vcmp.ge.f32.partialorder %v1856_v58, 0.0  ;;  %v1862_v60 = vmul.f32 0.2, %v1856_v58 }
 0x167   : > { %v1860_v61 = vmul.f32 0.2, %v1854_v55  ;;  %v1855_v62 = vadd.f32 %v2063_v47, %v1845_v59  ;;  %vm1857_vm9 = vcmp.ge.f32.partialorder %v1854_v55, 0.0 }
 0x168   : > { %v1865_v63 = vsel %vm1859_vm8, %v1856_v58, %v1862_v60 }
 0x169   : > { %v2071_v0 = vpack.c.bf16 %v1865_v63, %v1865_v63  ;;  %vm1858_vm10 = vcmp.ge.f32.partialorder %v1855_v62, 0.0  ;;  %v1861_v1 = vmul.f32 0.2, %v1855_v62  ;;  %v1863_v2 = vsel %vm1857_vm9, %v1854_v55, %v1860_v61 }
 0x16b   : > { %1881 = vst [vmem:[%s170_s29 + $0x8] sm:$0x1] %v2071_v0  ;;  %v1864_v3 = vsel %vm1858_vm10, %v1855_v62, %v1861_v1 }
 0x16c   : > { %v2075_v4 = vpack.c.bf16 %v1864_v3, %v1863_v2 }
 0x16e   : > { %2076 = vst [vmem:[%s170_s29] sm:$0xff] %v2075_v4  }
 0x16f PF: > { %s13_s12 = sadd.s32 1, %s2468_s12  }
 0x170   : > { %p10_p4 = scmp.ge.s32.totalorder %s13_s12, 4  }
 0x172   :  { %12 = sbr.rel (!%p10_p4) target bundleno = 1 (0x1), region = 62 }

</bundles_post_ra>
